<compile_context>
chip_gen: v7x
topology: tpu7x:2x2x1
jax: 0.10.0
libtpu: 0.0.40
codegen_flags: <defaults>
</compile_context>

<pallas_src>
import jax
import jax.numpy as jnp
import numpy as np
from jax.experimental import pallas as pl
from jax.experimental.pallas import tpu as pltpu

BN_EPS = 1e-5


# ------------------------------ Pallas kernel -------------------------------

def _fused_localcnn_kernel(x_ref, r1_ref, sh1_ref, wc2_ref, sh2_ref,
                           wh_ref, bh_ref, w2_ref, b2_ref, o_ref, mscr_ref):
    tb = o_ref.shape[0]

    # ---- conv1 (k=6, s=2) + BN1 + ReLU: 3 matmuls, M=tb*16, K=216, N=256 ----
    # x_ref block: (tb, 18, 216) bf16, lanes = p*54 + w2*3 + c (p = stride parity).
    # r1_ref[kh2]: (216, 256) bf16, output columns ordered [even wo | odd wo].
    def conv1_lhs(kh2):
        return x_ref[:, pl.ds(kh2, 16), :].reshape(tb * 16, 216)   # bf16

    acc = jnp.dot(conv1_lhs(0), r1_ref[0], preferred_element_type=jnp.float32)
    for kh2 in (1, 2):
        acc = acc + jnp.dot(conv1_lhs(kh2), r1_ref[kh2],
                            preferred_element_type=jnp.float32)
    y1 = jnp.maximum(acc + sh1_ref[...], 0.0)                      # (tb*16, 256) f32

    # ---- MaxPool2d(2,2) W-direction: lane-half max ([even wo | odd wo]) ----
    mscr_ref[...] = jnp.maximum(y1[:, 0:128], y1[:, 128:256])      # (tb*16, 128) f32

    # ---- MaxPool H-direction + per-sample flatten via strided sublane reads ----
    # Row s*16 + ho of the scratch is sample s, conv1 output row ho.
    cols = []
    for qh in range(8):
        a = mscr_ref[pl.ds(2 * qh, tb, stride=16), :]              # (tb, 128)
        b = mscr_ref[pl.ds(2 * qh + 1, tb, stride=16), :]
        cols.append(jnp.maximum(a, b))
    # xc2 lanes = qh*128 + qw*16 + ci  (8x8x16 pooled image, one row per sample)
    xc2 = jnp.concatenate(cols, axis=-1).astype(jnp.bfloat16)      # (tb, 1024)

    # ---- conv2 (k=3, s=1) + BN2 + ReLU: ONE doubly-banded matmul ----
    # wc2: (1024, 640) bf16; columns = h2*96 + w2*16 + co (576 valid, 64 zero pad).
    y2 = jnp.maximum(
        jnp.dot(xc2, wc2_ref[...], preferred_element_type=jnp.float32)
        + sh2_ref[...], 0.0)                                       # (tb, 640) f32

    # ---- AvgPool + NCHW flatten + linear1 + BN3 (all folded into wh) + ReLU ----
    h1 = jnp.maximum(
        jnp.dot(y2.astype(jnp.bfloat16), wh_ref[...],
                preferred_element_type=jnp.float32) + bh_ref[...], 0.0)  # (tb, 128)

    # ---- linear2, N padded to 256 lanes (lane-dense store, one row/sample) ----
    o_ref[...] = jnp.dot(h1.astype(jnp.bfloat16), w2_ref[...],
                         preferred_element_type=jnp.float32) + b2_ref[...]


# --------------------------- weight / input prep -----------------------------

def _bn_affine(bn):
    gamma, beta, mean, var = bn
    scale = gamma / jnp.sqrt(var + BN_EPS)
    shift = beta - mean * scale
    return scale, shift


def prepare_params(params):
    """One-time (per-parameter-set) weight folding.  Call OUTSIDE the hot path."""
    # conv1 -> 3 banded (216, 256) matrices; K = kh1*108 + kw1*54 + w2*3 + ci,
    # N columns ordered [even wo | odd wo] x co.
    s1, b1sh = _bn_affine(params["bn1"])
    w = params["conv1_w"] * s1[:, None, None, None]                   # (co,ci,kh,kw)
    w = w.reshape(16, 3, 3, 2, 3, 2)                                  # [co,ci,kh2,kh1,kw2,kw1]
    band1 = np.zeros((3, 18, 16), np.float32)                         # [kw2, w2, wo]
    for kw2 in range(3):
        for wo in range(16):
            band1[kw2, wo + kw2, wo] = 1.0
    r1 = jnp.einsum("kvw,oizhkx->zhxviwo", jnp.asarray(band1), w)     # (3,2,2,18,3,16,16)
    r1 = r1.reshape(3, 2, 2, 18, 3, 8, 2, 16)                         # wo -> (q, pw)
    r1 = jnp.transpose(r1, (0, 1, 2, 3, 4, 6, 5, 7)).reshape(3, 216, 256)
    sh1 = jnp.tile(params["conv1_b"] * s1 + b1sh, 16)[None, :]        # (1, 256)

    # conv2 -> one doubly-banded (1024, 640) matrix.
    # K = qh*128 + qw*16 + ci ; N = h2*96 + w2*16 + co (576 valid, pad to 640).
    s2, b2sh = _bn_affine(params["bn2"])
    w2c = params["conv2_w"] * s2[:, None, None, None]                 # (co,ci,kh,kw)
    band2 = np.zeros((3, 8, 6), np.float32)                           # [k, q, out]
    for k in range(3):
        for o in range(6):
            band2[k, o + k, o] = 1.0
    band2 = jnp.asarray(band2)
    wc2 = jnp.einsum("hqa,wrb,oihw->qriabo", band2, band2, w2c)       # (8,8,16,6,6,16)
    wc2 = jnp.pad(wc2.reshape(1024, 576), ((0, 0), (0, 64)))          # (1024, 640)
    b2eff = params["conv2_b"] * s2 + b2sh
    sh2 = jnp.concatenate([jnp.tile(b2eff, 36),
                           jnp.zeros((64,), jnp.float32)])[None, :]   # (1, 640)

    # head: avgpool (x0.25), torch (C,H,W) flatten order, linear1 and BN3 folded
    # into a (640, 128) matrix.
    s3, b3sh = _bn_affine(params["bn3"])
    wl = params["lin1_w"].reshape(128, 16, 3, 3)                      # [o, c, ph, pw]
    wl = jnp.repeat(jnp.repeat(wl, 2, axis=2), 2, axis=3)             # [o, c, h2, w2]
    wl = 0.25 * wl * s3[:, None, None, None]
    wh = jnp.transpose(wl, (2, 3, 1, 0)).reshape(576, 128)            # [h2*96+w2*16+c, o]
    wh = jnp.pad(wh, ((0, 64), (0, 0)))                               # (640, 128)
    bh = (params["lin1_b"] * s3 + b3sh)[None, :]                      # (1, 128)

    # linear2, padded 136 -> 256 output lanes.
    w2p = jnp.zeros((128, 256), jnp.float32).at[:, :136].set(params["lin2_w"].T)
    b2p = jnp.zeros((1, 256), jnp.float32).at[0, :136].set(params["lin2_b"])

    return dict(
        r1=r1.astype(jnp.bfloat16), sh1=sh1,
        wc2=wc2.astype(jnp.bfloat16), sh2=sh2,
        wh=wh.astype(jnp.bfloat16), bh=bh,
        w2=w2p.astype(jnp.bfloat16), b2=b2p,
    )


def local_cnn_forward(prep, x_nchw, *, tb=32):
    B = x_nchw.shape[0]
    # tb: samples per grid step (multiple of 8); shrink for tiny batches.
    tb = int(min(tb, max(8, ((B + 7) // 8) * 8)))
    bpad = ((B + tb - 1) // tb) * tb

    # Raw input -> stride-parity-folded lanes: (Bp, 18, 216), lanes = p*54 + w2*3 + c.
    # Cast to bf16 BEFORE the transpose/reshape chain (half the wrapper HBM bytes).
    x = x_nchw.astype(jnp.bfloat16)
    if bpad != B:
        x = jnp.pad(x, ((0, bpad - B), (0, 0), (0, 0), (0, 0)))
    x = jnp.transpose(x, (0, 2, 3, 1))                                 # (Bp, 36, 36, 3)
    x = x.reshape(bpad, 18, 2, 18, 2, 3)                               # [b,h2,kh1,w2,kw1,c]
    x = x.transpose(0, 1, 2, 4, 3, 5).reshape(bpad, 18, 216)           # [b,h2, p*54+w2*3+c]

    weights = (prep["r1"], prep["sh1"], prep["wc2"], prep["sh2"],
               prep["wh"], prep["bh"], prep["w2"], prep["b2"])

    def fixed(a):
        zeros = (0,) * a.ndim
        return pl.BlockSpec(a.shape, lambda b, z=zeros: z)

    out = pl.pallas_call(
        _fused_localcnn_kernel,
        out_shape=jax.ShapeDtypeStruct((bpad, 256), jnp.float32),
        grid=(bpad // tb,),
        in_specs=[pl.BlockSpec((tb, 18, 216), lambda b: (b, 0, 0))]
                 + [fixed(a) for a in weights],
        out_specs=pl.BlockSpec((tb, 256), lambda b: (b, 0)),
        scratch_shapes=[pltpu.VMEM((tb * 16, 128), jnp.float32)],
        compiler_params=pltpu.CompilerParams(
            dimension_semantics=("parallel",),
            vmem_limit_bytes=32 * 1024 * 1024,
        ),
    )(x, *weights)
    return out[:B, :136]                                               # (B, 136)


# ------------------------------- parameters ----------------------------------

def init_params(key):
    ks = jax.random.split(key, 8)
    p = {}
    p["conv1_w"] = jax.random.normal(ks[0], (16, 3, 6, 6), jnp.float32) * 0.05   # (Cout,Cin,kh,kw)
    p["conv1_b"] = jax.random.normal(ks[1], (16,), jnp.float32) * 0.05
    p["conv2_w"] = jax.random.normal(ks[2], (16, 16, 3, 3), jnp.float32) * 0.05
    p["conv2_b"] = jax.random.normal(ks[3], (16,), jnp.float32) * 0.05
    p["lin1_w"] = jax.random.normal(ks[4], (128, 144), jnp.float32) * 0.05        # (out, in)
    p["lin1_b"] = jax.random.normal(ks[5], (128,), jnp.float32) * 0.05
    p["lin2_w"] = jax.random.normal(ks[6], (136, 128), jnp.float32) * 0.05
    p["lin2_b"] = jax.random.normal(ks[7], (136,), jnp.float32) * 0.05

    def bn(n, salt):
        i = jnp.arange(n, dtype=jnp.float32)
        gamma = 1.0 + 0.01 * jnp.cos(i + salt)
        beta = 0.01 * jnp.sin(i + salt)
        mean = 0.02 * jnp.sin(0.5 * i + salt)
        var = 1.0 + 0.1 * (jnp.cos(0.3 * i + salt) ** 2)
        return gamma, beta, mean, var

    p["bn1"] = bn(16, 0.0)
    p["bn2"] = bn(16, 1.0)
    p["bn3"] = bn(128, 2.0)
    return p


# --------------------------- pure-JAX reference ------------------------------

def reference_forward(params, x_nchw):
    x = jnp.transpose(x_nchw, (0, 2, 3, 1)).astype(jnp.float32)

    def conv(x, w, b, stride):
        y = jax.lax.conv_general_dilated(
            x, jnp.transpose(w, (2, 3, 1, 0)), (stride, stride), "VALID",
            dimension_numbers=("NHWC", "HWIO", "NHWC"))
        return y + b

    def bn(x, gamma, beta, mean, var):
        return (x - mean) / jnp.sqrt(var + BN_EPS) * gamma + beta

    y = jax.nn.relu(bn(conv(x, params["conv1_w"], params["conv1_b"], 2), *params["bn1"]))
    y = jax.lax.reduce_window(y, -jnp.inf, jax.lax.max, (1, 2, 2, 1), (1, 2, 2, 1), "VALID")
    y = jax.nn.relu(bn(conv(y, params["conv2_w"], params["conv2_b"], 1), *params["bn2"]))
    y = jax.lax.reduce_window(y, 0.0, jax.lax.add, (1, 2, 2, 1), (1, 2, 2, 1), "VALID") * 0.25
    flat = jnp.transpose(y, (0, 3, 1, 2)).reshape(x.shape[0], -1)
    h = flat @ params["lin1_w"].T + params["lin1_b"]
    h = jax.nn.relu(bn(h, *params["bn3"]))
    return h @ params["lin2_w"].T + params["lin2_b"]


if __name__ == "__main__":
    key = jax.random.PRNGKey(0)
    kx, kp = jax.random.split(key)
    # Input 36x36 is the smallest clean size yielding the 16*3*3 flatten linear1
    # expects: 36 -conv1-> 16 -maxpool-> 8 -conv2-> 6 -avgpool-> 3.
    x = jax.random.normal(kx, (2, 3, 36, 36), jnp.float32)            # NCHW, like PyTorch
    params = init_params(kp)

    prep = prepare_params(params)          # hoisted out of the per-call path
    fwd = jax.jit(local_cnn_forward)
    ref_fn = jax.jit(reference_forward)

    out = jax.block_until_ready(fwd(prep, x))
    ref = jax.block_until_ready(ref_fn(params, x))

    assert out.shape == (2, 136), out.shape
    # bf16 MXU operands vs f32 reference -> documented 2e-2 tolerance.
    np.testing.assert_allclose(np.asarray(out), np.asarray(ref), rtol=2e-2, atol=2e-2)
    print("KERNEL_OK")
</pallas_src>

<mosaic_0001>
module attributes {stable_mosaic.version = 11 : i64} {
  func.func @_fused_localcnn_kernel(%arg0: i32, %arg1: memref<8x18x216xbf16, #tpu.memory_space<vmem>>, %arg2: memref<3x216x256xbf16, #tpu.memory_space<vmem>>, %arg3: memref<1x256xf32, #tpu.memory_space<vmem>>, %arg4: memref<1024x640xbf16, #tpu.memory_space<vmem>>, %arg5: memref<1x640xf32, #tpu.memory_space<vmem>>, %arg6: memref<640x128xbf16, #tpu.memory_space<vmem>>, %arg7: memref<1x128xf32, #tpu.memory_space<vmem>>, %arg8: memref<128x256xbf16, #tpu.memory_space<vmem>>, %arg9: memref<1x256xf32, #tpu.memory_space<vmem>>, %arg10: memref<8x256xf32, #tpu.memory_space<vmem>>, %arg11: memref<128x128xf32, #tpu.memory_space<vmem>>) attributes {dimension_semantics = [#tpu.dimension_semantics<parallel>], iteration_bounds = array<i64: 1>, scalar_prefetch = 0 : i64, scratch_operands = 1 : i64, tpu.core_type = #tpu.core_type<tc>, window_params = [{transform_indices = @transform_0, window_bounds = array<i64: 8, 18, 216>}, {pipeline_mode = #tpu.pipeline_mode<synchronous>, transform_indices = @transform_1, window_bounds = array<i64: 3, 216, 256>}, {pipeline_mode = #tpu.pipeline_mode<synchronous>, transform_indices = @transform_2, window_bounds = array<i64: 1, 256>}, {pipeline_mode = #tpu.pipeline_mode<synchronous>, transform_indices = @transform_3, window_bounds = array<i64: 1024, 640>}, {pipeline_mode = #tpu.pipeline_mode<synchronous>, transform_indices = @transform_4, window_bounds = array<i64: 1, 640>}, {pipeline_mode = #tpu.pipeline_mode<synchronous>, transform_indices = @transform_5, window_bounds = array<i64: 640, 128>}, {pipeline_mode = #tpu.pipeline_mode<synchronous>, transform_indices = @transform_6, window_bounds = array<i64: 1, 128>}, {pipeline_mode = #tpu.pipeline_mode<synchronous>, transform_indices = @transform_7, window_bounds = array<i64: 128, 256>}, {pipeline_mode = #tpu.pipeline_mode<synchronous>, transform_indices = @transform_8, window_bounds = array<i64: 1, 256>}, {transform_indices = @transform_9, window_bounds = array<i64: 8, 256>}]} {
    %c0 = arith.constant 0 : index
    %c0_0 = arith.constant 0 : index
    %c0_1 = arith.constant 0 : index
    %0 = vector.load %arg1[%c0, %c0_0, %c0_1] : memref<8x18x216xbf16, #tpu.memory_space<vmem>>, vector<8x16x216xbf16>
    %1 = vector.shape_cast %0 : vector<8x16x216xbf16> to vector<128x216xbf16>
    %c0_2 = arith.constant 0 : index
    %c0_3 = arith.constant 0 : index
    %c0_4 = arith.constant 0 : index
    %2 = vector.load %arg2[%c0_2, %c0_3, %c0_4] : memref<3x216x256xbf16, #tpu.memory_space<vmem>>, vector<1x216x256xbf16>
    %3 = vector.shape_cast %2 : vector<1x216x256xbf16> to vector<216x256xbf16>
    %cst = arith.constant dense<0.000000e+00> : vector<128x256xf32>
    %4 = tpu.matmul %1, %3, %cst {dimension_numbers = #tpu.dot_dimension_numbers<[1], [0], [0], [1], [0, 0, 1, 1], [], []>} : vector<128x216xbf16>, vector<216x256xbf16>, vector<128x256xf32> -> vector<128x256xf32>
    %c0_5 = arith.constant 0 : index
    %c1 = arith.constant 1 : index
    %c0_6 = arith.constant 0 : index
    %5 = vector.load %arg1[%c0_5, %c1, %c0_6] : memref<8x18x216xbf16, #tpu.memory_space<vmem>>, vector<8x16x216xbf16>
    %6 = vector.shape_cast %5 : vector<8x16x216xbf16> to vector<128x216xbf16>
    %c1_7 = arith.constant 1 : index
    %c0_8 = arith.constant 0 : index
    %c0_9 = arith.constant 0 : index
    %7 = vector.load %arg2[%c1_7, %c0_8, %c0_9] : memref<3x216x256xbf16, #tpu.memory_space<vmem>>, vector<1x216x256xbf16>
    %8 = vector.shape_cast %7 : vector<1x216x256xbf16> to vector<216x256xbf16>
    %cst_10 = arith.constant dense<0.000000e+00> : vector<128x256xf32>
    %9 = tpu.matmul %6, %8, %cst_10 {dimension_numbers = #tpu.dot_dimension_numbers<[1], [0], [0], [1], [0, 0, 1, 1], [], []>} : vector<128x216xbf16>, vector<216x256xbf16>, vector<128x256xf32> -> vector<128x256xf32>
    %10 = arith.addf %4, %9 : vector<128x256xf32>
    %c0_11 = arith.constant 0 : index
    %c2 = arith.constant 2 : index
    %c0_12 = arith.constant 0 : index
    %11 = vector.load %arg1[%c0_11, %c2, %c0_12] : memref<8x18x216xbf16, #tpu.memory_space<vmem>>, vector<8x16x216xbf16>
    %12 = vector.shape_cast %11 : vector<8x16x216xbf16> to vector<128x216xbf16>
    %c2_13 = arith.constant 2 : index
    %c0_14 = arith.constant 0 : index
    %c0_15 = arith.constant 0 : index
    %13 = vector.load %arg2[%c2_13, %c0_14, %c0_15] : memref<3x216x256xbf16, #tpu.memory_space<vmem>>, vector<1x216x256xbf16>
    %14 = vector.shape_cast %13 : vector<1x216x256xbf16> to vector<216x256xbf16>
    %cst_16 = arith.constant dense<0.000000e+00> : vector<128x256xf32>
    %15 = tpu.matmul %12, %14, %cst_16 {dimension_numbers = #tpu.dot_dimension_numbers<[1], [0], [0], [1], [0, 0, 1, 1], [], []>} : vector<128x216xbf16>, vector<216x256xbf16>, vector<128x256xf32> -> vector<128x256xf32>
    %16 = arith.addf %10, %15 : vector<128x256xf32>
    %c0_17 = arith.constant 0 : index
    %c0_18 = arith.constant 0 : index
    %17 = vector.load %arg3[%c0_17, %c0_18] : memref<1x256xf32, #tpu.memory_space<vmem>>, vector<1x256xf32>
    %18 = vector.broadcast %17 : vector<1x256xf32> to vector<128x256xf32>
    %19 = arith.addf %16, %18 : vector<128x256xf32>
    %cst_19 = arith.constant 0.000000e+00 : f32
    %20 = vector.broadcast %cst_19 : f32 to vector<128x256xf32>
    %21 = arith.maximumf %19, %20 : vector<128x256xf32>
    %22 = vector.extract_strided_slice %21 {offsets = [0, 0], sizes = [128, 128], strides = [1, 1]} : vector<128x256xf32> to vector<128x128xf32>
    %23 = vector.extract_strided_slice %21 {offsets = [0, 128], sizes = [128, 128], strides = [1, 1]} : vector<128x256xf32> to vector<128x128xf32>
    %24 = arith.maximumf %22, %23 : vector<128x128xf32>
    %c0_20 = arith.constant 0 : index
    %c0_21 = arith.constant 0 : index
    %25 = vector.load %arg11[%c0_20, %c0_21] : memref<128x128xf32, #tpu.memory_space<vmem>>, vector<128x128xf32>
    tpu.vector_store %arg11[%c0_20, %c0_21], %24 {strides = array<i32>} : memref<128x128xf32, #tpu.memory_space<vmem>>, vector<128x128xf32>,
    %c0_22 = arith.constant 0 : index
    %c0_23 = arith.constant 0 : index
    %26 = tpu.strided_load %arg11[%c0_22, %c0_23] {strides = array<i32: 16, 1>} : memref<128x128xf32, #tpu.memory_space<vmem>>, vector<8x128xf32>
    %c1_24 = arith.constant 1 : index
    %c0_25 = arith.constant 0 : index
    %27 = tpu.strided_load %arg11[%c1_24, %c0_25] {strides = array<i32: 16, 1>} : memref<128x128xf32, #tpu.memory_space<vmem>>, vector<8x128xf32>
    %28 = arith.maximumf %26, %27 : vector<8x128xf32>
    %c2_26 = arith.constant 2 : index
    %c0_27 = arith.constant 0 : index
    %29 = tpu.strided_load %arg11[%c2_26, %c0_27] {strides = array<i32: 16, 1>} : memref<128x128xf32, #tpu.memory_space<vmem>>, vector<8x128xf32>
    %c3 = arith.constant 3 : index
    %c0_28 = arith.constant 0 : index
    %30 = tpu.strided_load %arg11[%c3, %c0_28] {strides = array<i32: 16, 1>} : memref<128x128xf32, #tpu.memory_space<vmem>>, vector<8x128xf32>
    %31 = arith.maximumf %29, %30 : vector<8x128xf32>
    %c4 = arith.constant 4 : index
    %c0_29 = arith.constant 0 : index
    %32 = tpu.strided_load %arg11[%c4, %c0_29] {strides = array<i32: 16, 1>} : memref<128x128xf32, #tpu.memory_space<vmem>>, vector<8x128xf32>
    %c5 = arith.constant 5 : index
    %c0_30 = arith.constant 0 : index
    %33 = tpu.strided_load %arg11[%c5, %c0_30] {strides = array<i32: 16, 1>} : memref<128x128xf32, #tpu.memory_space<vmem>>, vector<8x128xf32>
    %34 = arith.maximumf %32, %33 : vector<8x128xf32>
    %c6 = arith.constant 6 : index
    %c0_31 = arith.constant 0 : index
    %35 = tpu.strided_load %arg11[%c6, %c0_31] {strides = array<i32: 16, 1>} : memref<128x128xf32, #tpu.memory_space<vmem>>, vector<8x128xf32>
    %c7 = arith.constant 7 : index
    %c0_32 = arith.constant 0 : index
    %36 = tpu.strided_load %arg11[%c7, %c0_32] {strides = array<i32: 16, 1>} : memref<128x128xf32, #tpu.memory_space<vmem>>, vector<8x128xf32>
    %37 = arith.maximumf %35, %36 : vector<8x128xf32>
    %c8 = arith.constant 8 : index
    %c0_33 = arith.constant 0 : index
    %38 = tpu.strided_load %arg11[%c8, %c0_33] {strides = array<i32: 16, 1>} : memref<128x128xf32, #tpu.memory_space<vmem>>, vector<8x128xf32>
    %c9 = arith.constant 9 : index
    %c0_34 = arith.constant 0 : index
    %39 = tpu.strided_load %arg11[%c9, %c0_34] {strides = array<i32: 16, 1>} : memref<128x128xf32, #tpu.memory_space<vmem>>, vector<8x128xf32>
    %40 = arith.maximumf %38, %39 : vector<8x128xf32>
    %c10 = arith.constant 10 : index
    %c0_35 = arith.constant 0 : index
    %41 = tpu.strided_load %arg11[%c10, %c0_35] {strides = array<i32: 16, 1>} : memref<128x128xf32, #tpu.memory_space<vmem>>, vector<8x128xf32>
    %c11 = arith.constant 11 : index
    %c0_36 = arith.constant 0 : index
    %42 = tpu.strided_load %arg11[%c11, %c0_36] {strides = array<i32: 16, 1>} : memref<128x128xf32, #tpu.memory_space<vmem>>, vector<8x128xf32>
    %43 = arith.maximumf %41, %42 : vector<8x128xf32>
    %c12 = arith.constant 12 : index
    %c0_37 = arith.constant 0 : index
    %44 = tpu.strided_load %arg11[%c12, %c0_37] {strides = array<i32: 16, 1>} : memref<128x128xf32, #tpu.memory_space<vmem>>, vector<8x128xf32>
    %c13 = arith.constant 13 : index
    %c0_38 = arith.constant 0 : index
    %45 = tpu.strided_load %arg11[%c13, %c0_38] {strides = array<i32: 16, 1>} : memref<128x128xf32, #tpu.memory_space<vmem>>, vector<8x128xf32>
    %46 = arith.maximumf %44, %45 : vector<8x128xf32>
    %c14 = arith.constant 14 : index
    %c0_39 = arith.constant 0 : index
    %47 = tpu.strided_load %arg11[%c14, %c0_39] {strides = array<i32: 16, 1>} : memref<128x128xf32, #tpu.memory_space<vmem>>, vector<8x128xf32>
    %c15 = arith.constant 15 : index
    %c0_40 = arith.constant 0 : index
    %48 = tpu.strided_load %arg11[%c15, %c0_40] {strides = array<i32: 16, 1>} : memref<128x128xf32, #tpu.memory_space<vmem>>, vector<8x128xf32>
    %49 = arith.maximumf %47, %48 : vector<8x128xf32>
    %50 = tpu.concatenate %28, %31, %34, %37, %40, %43, %46, %49 in 1 : vector<8x128xf32>, vector<8x128xf32>, vector<8x128xf32>, vector<8x128xf32>, vector<8x128xf32>, vector<8x128xf32>, vector<8x128xf32>, vector<8x128xf32> -> vector<8x1024xf32>
    %51 = arith.truncf %50 : vector<8x1024xf32> to vector<8x1024xbf16>
    %c0_41 = arith.constant 0 : index
    %c0_42 = arith.constant 0 : index
    %52 = vector.load %arg4[%c0_41, %c0_42] : memref<1024x640xbf16, #tpu.memory_space<vmem>>, vector<1024x640xbf16>
    %cst_43 = arith.constant dense<0.000000e+00> : vector<8x640xf32>
    %53 = tpu.matmul %51, %52, %cst_43 {dimension_numbers = #tpu.dot_dimension_numbers<[1], [0], [0], [1], [0, 0, 1, 1], [], []>} : vector<8x1024xbf16>, vector<1024x640xbf16>, vector<8x640xf32> -> vector<8x640xf32>
    %c0_44 = arith.constant 0 : index
    %c0_45 = arith.constant 0 : index
    %54 = vector.load %arg5[%c0_44, %c0_45] : memref<1x640xf32, #tpu.memory_space<vmem>>, vector<1x640xf32>
    %55 = vector.broadcast %54 : vector<1x640xf32> to vector<8x640xf32>
    %56 = arith.addf %53, %55 : vector<8x640xf32>
    %cst_46 = arith.constant 0.000000e+00 : f32
    %57 = vector.broadcast %cst_46 : f32 to vector<8x640xf32>
    %58 = arith.maximumf %56, %57 : vector<8x640xf32>
    %59 = arith.truncf %58 : vector<8x640xf32> to vector<8x640xbf16>
    %c0_47 = arith.constant 0 : index
    %c0_48 = arith.constant 0 : index
    %60 = vector.load %arg6[%c0_47, %c0_48] : memref<640x128xbf16, #tpu.memory_space<vmem>>, vector<640x128xbf16>
    %cst_49 = arith.constant dense<0.000000e+00> : vector<8x128xf32>
    %61 = tpu.matmul %59, %60, %cst_49 {dimension_numbers = #tpu.dot_dimension_numbers<[1], [0], [0], [1], [0, 0, 1, 1], [], []>} : vector<8x640xbf16>, vector<640x128xbf16>, vector<8x128xf32> -> vector<8x128xf32>
    %c0_50 = arith.constant 0 : index
    %c0_51 = arith.constant 0 : index
    %62 = vector.load %arg7[%c0_50, %c0_51] : memref<1x128xf32, #tpu.memory_space<vmem>>, vector<1x128xf32>
    %63 = vector.broadcast %62 : vector<1x128xf32> to vector<8x128xf32>
    %64 = arith.addf %61, %63 : vector<8x128xf32>
    %cst_52 = arith.constant 0.000000e+00 : f32
    %65 = vector.broadcast %cst_52 : f32 to vector<8x128xf32>
    %66 = arith.maximumf %64, %65 : vector<8x128xf32>
    %67 = arith.truncf %66 : vector<8x128xf32> to vector<8x128xbf16>
    %c0_53 = arith.constant 0 : index
    %c0_54 = arith.constant 0 : index
    %68 = vector.load %arg8[%c0_53, %c0_54] : memref<128x256xbf16, #tpu.memory_space<vmem>>, vector<128x256xbf16>
    %cst_55 = arith.constant dense<0.000000e+00> : vector<8x256xf32>
    %69 = tpu.matmul %67, %68, %cst_55 {dimension_numbers = #tpu.dot_dimension_numbers<[1], [0], [0], [1], [0, 0, 1, 1], [], []>} : vector<8x128xbf16>, vector<128x256xbf16>, vector<8x256xf32> -> vector<8x256xf32>
    %c0_56 = arith.constant 0 : index
    %c0_57 = arith.constant 0 : index
    %70 = vector.load %arg9[%c0_56, %c0_57] : memref<1x256xf32, #tpu.memory_space<vmem>>, vector<1x256xf32>
    %71 = vector.broadcast %70 : vector<1x256xf32> to vector<8x256xf32>
    %72 = arith.addf %69, %71 : vector<8x256xf32>
    %c0_58 = arith.constant 0 : index
    %c0_59 = arith.constant 0 : index
    %73 = vector.load %arg10[%c0_58, %c0_59] : memref<8x256xf32, #tpu.memory_space<vmem>>, vector<8x256xf32>
    tpu.vector_store %arg10[%c0_58, %c0_59], %72 {strides = array<i32>} : memref<8x256xf32, #tpu.memory_space<vmem>>, vector<8x256xf32>,
    return
  }
  func.func @transform_0(%arg0: i32) -> (i32, i32, i32) {
    %c0_i32 = arith.constant 0 : i32
    %c0_i32_0 = arith.constant 0 : i32
    %c0_i32_1 = arith.constant 0 : i32
    return %arg0, %c0_i32, %c0_i32_0 : i32, i32, i32
  }
  func.func @transform_1(%arg0: i32) -> (i32, i32, i32) {
    %c0_i32 = arith.constant 0 : i32
    %c0_i32_0 = arith.constant 0 : i32
    %c0_i32_1 = arith.constant 0 : i32
    %c0_i32_2 = arith.constant 0 : i32
    return %c0_i32, %c0_i32_0, %c0_i32_1 : i32, i32, i32
  }
  func.func @transform_2(%arg0: i32) -> (i32, i32) {
    %c0_i32 = arith.constant 0 : i32
    %c0_i32_0 = arith.constant 0 : i32
    %c0_i32_1 = arith.constant 0 : i32
    return %c0_i32, %c0_i32_0 : i32, i32
  }
  func.func @transform_3(%arg0: i32) -> (i32, i32) {
    %c0_i32 = arith.constant 0 : i32
    %c0_i32_0 = arith.constant 0 : i32
    %c0_i32_1 = arith.constant 0 : i32
    return %c0_i32, %c0_i32_0 : i32, i32
  }
  func.func @transform_4(%arg0: i32) -> (i32, i32) {
    %c0_i32 = arith.constant 0 : i32
    %c0_i32_0 = arith.constant 0 : i32
    %c0_i32_1 = arith.constant 0 : i32
    return %c0_i32, %c0_i32_0 : i32, i32
  }
  func.func @transform_5(%arg0: i32) -> (i32, i32) {
    %c0_i32 = arith.constant 0 : i32
    %c0_i32_0 = arith.constant 0 : i32
    %c0_i32_1 = arith.constant 0 : i32
    return %c0_i32, %c0_i32_0 : i32, i32
  }
  func.func @transform_6(%arg0: i32) -> (i32, i32) {
    %c0_i32 = arith.constant 0 : i32
    %c0_i32_0 = arith.constant 0 : i32
    %c0_i32_1 = arith.constant 0 : i32
    return %c0_i32, %c0_i32_0 : i32, i32
  }
  func.func @transform_7(%arg0: i32) -> (i32, i32) {
    %c0_i32 = arith.constant 0 : i32
    %c0_i32_0 = arith.constant 0 : i32
    %c0_i32_1 = arith.constant 0 : i32
    return %c0_i32, %c0_i32_0 : i32, i32
  }
  func.func @transform_8(%arg0: i32) -> (i32, i32) {
    %c0_i32 = arith.constant 0 : i32
    %c0_i32_0 = arith.constant 0 : i32
    %c0_i32_1 = arith.constant 0 : i32
    return %c0_i32, %c0_i32_0 : i32, i32
  }
  func.func @transform_9(%arg0: i32) -> (i32, i32) {
    %c0_i32 = arith.constant 0 : i32
    %c0_i32_0 = arith.constant 0 : i32
    return %arg0, %c0_i32 : i32, i32
  }
}

</mosaic_0001>

<bundles_post_ra>
// kernel: local_cnn_forward.1
= control target key start
LH: loop header
LB: loop body
LE: loop exit
PB: predicated region body
PF: predicated region fallthrough
CT: control target
= control target key end

     0   :  { %vm84_vm0 = vsmask.f32 3328  ;;  %vm85_vm1 = vsmask.f32 7440  ;;  %vm498_vm3 = vcmask 719872   ;;  %vm523_vm4 = vcmask 1043456   ;;  %s8501_s1 = inlined_call_operand.vmem [shape: bf16[3,216,256], index: 1, kind: input, shape index: {}]   ;;  %s8502_s0 = inlined_call_operand.vmem [shape: bf16[8,18,216], index: 0, kind: input, shape index: {}]   ;;  %s8503_s3 = inlined_call_operand.vmem [shape: bf16[1024,640], index: 3, kind: input, shape index: {}]   ;;  %s8504_s2 = inlined_call_operand.vmem [shape: f32[1,256], index: 2, kind: input, shape index: {}]   ;;  %s8505_s5 = inlined_call_operand.vmem [shape: bf16[640,128], index: 5, kind: input, shape index: {}]   ;;  %s8506_s4 = inlined_call_operand.vmem [shape: f32[1,640], index: 4, kind: input, shape index: {}]   ;;  %s8507_s7 = inlined_call_operand.vmem [shape: bf16[128,256], index: 7, kind: input, shape index: {}]   ;;  %s8508_s6 = inlined_call_operand.vmem [shape: f32[1,128], index: 6, kind: input, shape index: {}]   ;;  %s8509_s8 = inlined_call_operand.vmem [shape: f32[1,256], index: 8, kind: input, shape index: {}]   ;;  %s8510_s9 = inlined_call_operand.vmem [shape: f32[8,256], index: 9, kind: output, shape index: {}]  }
   0x1   :  { %v5752_v0 = vld [vmem:[%s8501_s1 + $0xdc] ss:$8 sps:$4 sm:$0xff]   ;;  %v5754_v1 = vld [vmem:[%s8501_s1 + $0xd8] ss:$8 sps:$4 sm:$0xff]   ;;  %v5755_v2 = vld [vmem:[%s8501_s1 + $0xec] ss:$8 sps:$4 sm:$0xff]  }
   0x2   :  { %530 = vmatprep.subr.bf16.mxu0 %v5752_v0  ;;  %v5757_v3 = vld [vmem:[%s8501_s1 + $0xe8] ss:$8 sps:$4 sm:$0xff]   ;;  %v5758_v4 = vld [vmem:[%s8501_s1 + $0xfc] ss:$8 sps:$4 sm:$0xff]   ;;  %v5760_v5 = vld [vmem:[%s8501_s1 + $0xf8] ss:$8 sps:$4 sm:$0xff]  }
   0x3   :  { %531 = vmatpush1.bf16.msra.mxu0 %v5754_v1  ;;  %v5761_v6 = vld [vmem:[%s8501_s1 + $0x10c] ss:$8 sps:$4 sm:$0xff]   ;;  %v5763_v7 = vld [vmem:[%s8501_s1 + $0x108] ss:$8 sps:$4 sm:$0xff]   ;;  %v5764_v8 = vld [vmem:[%s8501_s1 + $0x11c] ss:$8 sps:$4 sm:$0xff]  }
   0x4   :  { %532 = vmatprep.subr.bf16.mxu0 %v5755_v2  ;;  %v5766_v9 = vld [vmem:[%s8501_s1 + $0x118] ss:$8 sps:$4 sm:$0xff]   ;;  %v5767_v10 = vld [vmem:[%s8501_s1 + $0x12c] ss:$8 sps:$4 sm:$0xff]   ;;  %v5769_v11 = vld [vmem:[%s8501_s1 + $0x128] ss:$8 sps:$4 sm:$0xff]  }
   0x5   :  { %v6495_v12 = vld [vmem:[%s8502_s0] sm:$0xff]  ;;  %v6500_v13 = vld [vmem:[%s8502_s0 + $0x8] sm:$0xff]  ;;  %v6505_v14 = vld [vmem:[%s8502_s0 + $0x10] sm:$0x11]  ;;  %vm1017_vm5 = vcmask 1042432   ;;  %vm1018_vm6 = vcmask 1046532  }
   0x6   :  { %v88_v15 = vshrl.u32 %v6495_v12, 16  ;;  %v91_v16 = vshll.u32 %v6495_v12, 16  ;;  %v97_v17 = vshll.u32 %v6500_v13, 16  ;;  %v101_v18 = vshrl.u32 %v6500_v13, 16  ;;  %v5770_v20 = vld [vmem:[%s8501_s1 + $0x13c] ss:$8 sps:$4 sm:$0xff]   ;;  %vm6527_vm2 = vmor %vm84_vm0, %vm85_vm1 }
   0x7   :  { %533 = vmatpush1.bf16.msra.mxu0 %v5757_v3  ;;  %v107_v19 = vshll.u32 %v6505_v14, 16  ;;  %v4979_v23 = vcombine.high %v6495_v12, %v6500_v13  ;;  %v4978_v26 = vcombine.low %v6495_v12, %v6500_v13  ;;  %v5772_v27 = vld [vmem:[%s8501_s1 + $0x138] ss:$8 sps:$4 sm:$0xff]   ;;  %v5773_v28 = vld [vmem:[%s8501_s1 + $0x14c] ss:$8 sps:$4 sm:$0xff]   ;;  %vm6816_vm7 = vmor %vm1017_vm5, %vm1018_vm6  ;;  %vm6404_vm8 = vmmov 0  }
   0x8   :  { %534 = vmatprep.subr.bf16.mxu0 %v5758_v4  ;;  %v90_v21 = vrot.slane %v88_v15, 4  ;;  %v93_v22 = vrot.slane %v91_v16, 5  ;;  %v99_v24 = vrot.slane %v97_v17, 5  ;;  %v103_v25 = vrot.slane %v101_v18, 4  ;;  %v6534_v33 = vld [vmem:[%s8502_s0 + $0x18] sm:$0xff]  ;;  %v6539_v35 = vld [vmem:[%s8502_s0 + $0x20] sm:$0xff] }
   0x9   :  { %v109_v32 = vrot.slane %v107_v19, 5  ;;  %v4981_v37 = vcombine.high %v6534_v33, %v6539_v35  ;;  %v5775_v39 = vld [vmem:[%s8501_s1 + $0x148] ss:$8 sps:$4 sm:$0xff]   ;;  %v4980_v41 = vcombine.low %v6534_v33, %v6539_v35  ;;  %v5776_v42 = vld [vmem:[%s8501_s1 + $0x15c] ss:$8 sps:$4 sm:$0xff]   ;;  %v112_v49 = vshrl.u32 %v6534_v33, 16 }
   0xa   :  { %v94_v29 = vor.u32 %v93_v22, %v90_v21  ;;  %v104_v31 = vor.u32 %v103_v25, %v99_v24  ;;  %v6564_v44 = vld [vmem:[%s8502_s0 + $0x30] sm:$0xff]  ;;  %v6569_v45 = vld [vmem:[%s8502_s0 + $0x38] sm:$0xff]  ;;  %v115_v50 = vshll.u32 %v6534_v33, 16  ;;  %v6585_v51 = vld [vmem:[%s8502_s0 + $0x48] sm:$0xff]  ;;  %v121_v54 = vshll.u32 %v6539_v35, 16 }
   0xb   :  { %535 = vmatpush1.bf16.msra.mxu0 %v5760_v5  ;;  %v4983_v46 = vcombine.high %v6564_v44, %v6569_v45  ;;  %v5778_v47 = vld [vmem:[%s8501_s1 + $0x158] ss:$8 sps:$4 sm:$0xff]   ;;  %v5779_v48 = vld [vmem:[%s8501_s1 + $0x16c] ss:$8 sps:$4 sm:$0xff]   ;;  %v5781_v53 = vld [vmem:[%s8501_s1 + $0x168] ss:$8 sps:$4 sm:$0xff]   ;;  %v4982_v56 = vcombine.low %v6564_v44, %v6569_v45 }
   0xc   :  { %536 = vmatprep.subr.bf16.mxu0 %v5761_v6  ;;  %v95_v34 = vrot.slane %v94_v29, 4  ;;  %v105_v36 = vrot.slane %v104_v31, 4  ;;  %v6590_v52 = vld [vmem:[%s8502_s0 + $0x50] sm:$0xff]  ;;  %v125_v55 = vshrl.u32 %v6539_v35, 16  ;;  %v5782_v58 = vld [vmem:[%s8501_s1 + $0x17c] ss:$8 sps:$4 sm:$0xff]  }
   0xd   :  { %v4985_v57 = vcombine.high %v6585_v51, %v6590_v52  ;;  %v5784_v59 = vld [vmem:[%s8501_s1 + $0x178] ss:$8 sps:$4 sm:$0xff]   ;;  %v114_v60 = vrot.slane %v112_v49, 4  ;;  %v117_v61 = vrot.slane %v115_v50, 5  ;;  %v123_v62 = vrot.slane %v121_v54, 5  ;;  %v4924_v3 = vld [vmem:[%s8501_s1 + $0x1a8] sm:$0xff] }
   0xe   :  { %v6545_v38 = vsel %vm6527_vm2, %v95_v34, %v99_v24  ;;  %v6552_v40 = vsel %vm6527_vm2, %v105_v36, %v109_v32  ;;  %v127_v63 = vrot.slane %v125_v55, 4  ;;  %v5785_v0 = vld [vmem:[%s8501_s1 + $0x18c] ss:$8 sps:$4 sm:$0xff]   ;;  %v4984_v2 = vcombine.low %v6585_v51, %v6590_v52  ;;  %v5788_v15 = vld [vmem:[%s8501_s1 + $0x19c] ss:$8 sps:$4 sm:$0xff]  }
   0xf   :  { %537 = vmatpush1.bf16.msra.mxu0 %v5763_v7  ;;  %v4926_v43 = vcombine.high %v6545_v38, %v6552_v40  ;;  %v6613_v1 = vld [vmem:[%s8502_s0 + $0x28] sm:$0x11]  ;;  %v136_v4 = vshrl.u32 %v6564_v44, 16  ;;  %v139_v5 = vshll.u32 %v6564_v44, 16  ;;  %v145_v6 = vshll.u32 %v6569_v45, 16 }
  0x10   :  { %538 = vmatprep.subr.bf16.mxu0 %v5764_v8  ;;  %v149_v7 = vshrl.u32 %v6569_v45, 16  ;;  %v5787_v8 = vld [vmem:[%s8501_s1 + $0x188] ss:$8 sps:$4 sm:$0xff]   ;;  %v5790_v16 = vld [vmem:[%s8501_s1 + $0x198] ss:$8 sps:$4 sm:$0xff]   ;;  %v4968_v17 = vcombine.high %v4924_v3, %v4924_v3  ;;  %v4967_v22 = vcombine.low %v4924_v3, %v4924_v3  ;;  %v160_v29 = vshrl.u32 %v6585_v51, 16 }
  0x11   :  { %4970 = vmatprep.mubr.msk.bf16.mxu0 %vm498_vm3, %v4926_v43  ;;  %v138_v18 = vrot.slane %v136_v4, 4  ;;  %v141_v19 = vrot.slane %v139_v5, 5  ;;  %v163_v31 = vshll.u32 %v6585_v51, 16  ;;  %v169_v32 = vshll.u32 %v6590_v52, 16  ;;  %v5795_v36 = vld [vmem:[%s8501_s1 + $0x4] ss:$8 sps:$4 sm:$0xff]  }
  0x12   :  { %v151_v21 = vrot.slane %v149_v7, 4  ;;  %v173_v34 = vshrl.u32 %v6590_v52, 16  ;;  %v162_v54 = vrot.slane %v160_v29, 4  ;;  %v5798_v3 = vld [vmem:[%s8501_s1 + $0x14] ss:$8 sps:$4 sm:$0xff]  }
  0x13   :  { %539 = vmatpush1.bf16.msra.mxu0 %v5766_v9  ;;  %v118_v9 = vor.u32 %v117_v61, %v114_v60  ;;  %v165_v55 = vrot.slane %v163_v31, 5  ;;  %v5793_v60 = vld [vmem:[%s8501_s1] ss:$8 sps:$4 sm:$0xff]   ;;  %v6730_v29 = vld [vmem:[%s8502_s0 + $0xb0] sm:$0xff] }
  0x14   :  { %540 = vmatprep.subr.bf16.mxu0 %v5767_v10  ;;  %v128_v10 = vor.u32 %v127_v63, %v123_v62  ;;  %v6675_v61 = vld [vmem:[%s8502_s0 + $0x68] sm:$0xff]  ;;  %v5844_v12 = vld [vmem:[%s8501_s1 + $0x1d0] ss:$8 sps:$4 sm:$0xff]  }
  0x15   :  { %v119_v24 = vrot.slane %v118_v9, 4  ;;  %v6690_v9 = vld [vmem:[%s8502_s0 + $0x78] sm:$0xff] }
  0x16   :  { %v129_v25 = vrot.slane %v128_v10, 4  ;;  %v5852_v33 = vld [vmem:[%s8501_s1 + $0x1f0] ss:$8 sps:$4 sm:$0xff]  }
  0x17   :  { %541 = vmatpush1.bf16.msra.mxu0 %v5769_v11  ;;  %v131_v11 = vshll.u32 %v6613_v1, 16  ;;  %v6655_v49 = vsel %vm6527_vm2, %v119_v24, %v123_v62  ;;  %v5860_v44 = vld [vmem:[%s8501_s1 + $0x210] ss:$8 sps:$4 sm:$0xff]  }
  0x18   :  { %542 = vmatprep.subr.bf16.mxu0 %v5770_v20  ;;  %v147_v20 = vrot.slane %v145_v6, 5  ;;  %v5868_v51 = vld [vmem:[%s8501_s1 + $0x230] ss:$8 sps:$4 sm:$0xff]  }
  0x1b   :  { %543 = vmatpush1.bf16.msra.mxu0 %v5772_v27  ;;  %v133_v27 = vrot.slane %v131_v11, 5  ;;  %v193_v11 = vshll.u32 %v6675_v61, 16 }
  0x1c   :  { %544 = vmatprep.subr.bf16.mxu0 %v5773_v28  ;;  %v6637_v28 = vld [vmem:[%s8502_s0 + $0x40] sm:$0x11] }
  0x1d   :  { %v155_v43 = vshll.u32 %v6637_v28, 16  ;;  %v6659_v50 = vsel %vm6527_vm2, %v129_v25, %v133_v27  ;;  %v6725_v27 = vld [vmem:[%s8502_s0 + $0xa8] sm:$0xff] }
  0x1e   :  { %v4928_v7 = vcombine.high %v6655_v49, %v6659_v50 }
  0x1f   :  { %545 = vmatpush1.bf16.msra.mxu0 %v5775_v39  ;;  %v142_v39 = vor.u32 %v141_v19, %v138_v18  ;;  %v157_v6 = vrot.slane %v155_v43, 5  ;;  %v6708_v19 = vld [vmem:[%s8502_s0 + $0x98] sm:$0xff] }
  0x20   :  { %546 = vmatprep.subr.bf16.mxu0 %v5776_v42  ;;  %v152_v42 = vor.u32 %v151_v21, %v147_v20 }
  0x21   :  { %v143_v4 = vrot.slane %v142_v39, 4 }
  0x22   :  { %v153_v5 = vrot.slane %v152_v42, 4 }
  0x23   :  { %547 = vmatpush1.bf16.msra.mxu0 %v5778_v47  ;;  %v6650_v47 = vld [vmem:[%s8502_s0 + $0x60] sm:$0xff]  ;;  %v6716_v24 = vsel %vm6527_vm2, %v143_v4, %v147_v20  ;;  %v208_v4 = vshrl.u32 %v6690_v9, 16  ;;  %v241_v20 = vshll.u32 %v6708_v19, 16 }
  0x24   :  { %548 = vmatprep.subr.bf16.mxu0 %v5779_v48  ;;  %v525_v48 = vsel %vm523_vm4, %v4967_v22, 0  ;;  %v184_v62 = vshrl.u32 %v6650_v47, 16  ;;  %v187_v63 = vshll.u32 %v6650_v47, 16  ;;  %v4987_v21 = vcombine.high %v6650_v47, %v6675_v61 }
  0x25   :  { %v4986_v22 = vcombine.low %v6650_v47, %v6675_v61  ;;  %v6720_v25 = vsel %vm6527_vm2, %v153_v5, %v157_v6  ;;  %v1025_v5 = vrot.slane %v6505_v14, 5  ;;  %v5799_v6 = vld [vmem:[%s8501_s1 + $0x20] ss:$8 sps:$4 sm:$0xff]   ;;  %v5876_v47 = vld [vmem:[%s8501_s1 + $0x250] ss:$8 sps:$4 sm:$0xff]  }
  0x26   :  { %v189_v18 = vrot.slane %v187_v63, 5  ;;  %v4929_v14 = vcombine.low %v6716_v24, %v6720_v25 }
  0x27   :  { %549 = vmatpush1.bf16.msra.mxu0 %v5781_v53  ;;  %v6664_v53 = vld [vmem:[%s8502_s0 + $0x58] sm:$0x11] }
  0x28   :  { %550 = vmatprep.subr.bf16.mxu0 %v5782_v58  ;;  %v6667_v58 = vrot.slane %v169_v32, 5  ;;  %v5796_v32 = vld [vmem:[%s8501_s1 + $0x10] ss:$8 sps:$4 sm:$0xff]  }
  0x2b   :  { %551 = vmatpush1.bf16.msra.mxu0 %v5784_v59  ;;  %v175_v59 = vrot.slane %v173_v34, 4  ;;  %v5801_v34 = vld [vmem:[%s8501_s1 + $0x24] ss:$8 sps:$4 sm:$0xff]  }
  0x2c   :  { %552 = vmatprep.subr.bf16.mxu0 %v5785_v0  ;;  %v4925_v0 = vcombine.low %v6545_v38, %v6552_v40  ;;  %v6695_v38 = vld [vmem:[%s8502_s0 + $0x80] sm:$0xff]  ;;  %v166_v40 = vor.u32 %v165_v55, %v162_v54 }
  0x2d   :  { %v176_v10 = vor.u32 %v175_v59, %v6667_v58 }
  0x2e   :  { %v167_v43 = vrot.slane %v166_v40, 4  ;;  %v1029_v40 = vrot.slane %v6539_v35, 5  ;;  %v5858_v35 = vld [vmem:[%s8501_s1 + $0x204] ss:$8 sps:$4 sm:$0xff]  }
  0x2f   :  { %553 = vmatpush1.bf16.msra.mxu0 %v5787_v8  ;;  %v179_v8 = vshll.u32 %v6664_v53, 16  ;;  %v177_v59 = vrot.slane %v176_v10, 4 }
  0x30   :  { %554 = vmatprep.subr.bf16.mxu0 %v5788_v15  ;;  %v197_v15 = vshrl.u32 %v6675_v61, 16 }
  0x32   :  { %v199_v54 = vrot.slane %v197_v15, 4  ;;  %v5802_v15 = vld [vmem:[%s8501_s1 + $0x30] ss:$8 sps:$4 sm:$0xff]  }
  0x33   :  { %555 = vmatpush1.bf16.msra.mxu0 %v5790_v16  ;;  %v6703_v16 = vld [vmem:[%s8502_s0 + $0x90] sm:$0xff] }
  0x34   :  { %4969 = vmatprep.subr.msk.bf16.mxu0 %vm523_vm4, %v4968_v17  ;;  %v186_v17 = vrot.slane %v184_v62, 4  ;;  %v6754_v62 = vld [vmem:[%s8502_s0 + $0x70] sm:$0x11] }
  0x36   :  { %v190_v63 = vor.u32 %v189_v18, %v186_v17 }
  0x37   :  { %557 = vmatpush1.bf16.msra.mxu0 %v525_v48  ;;  %v195_v48 = vrot.slane %v193_v11, 5  ;;  %v203_v11 = vshll.u32 %v6754_v62, 16 }
  0x38   :  { %880 = vmatprep.subr.bf16.mxu0 %v5795_v36  ;;  %v191_v18 = vrot.slane %v190_v63, 4  ;;  %v5810_v36 = vld [vmem:[%s8501_s1 + $0x54] ss:$8 sps:$4 sm:$0xff]  }
  0x39   :  { %v200_v10 = vor.u32 %v199_v54, %v195_v48 }
  0x3a   :  { %563 = vmatmul.mubr.bf16.vlgmr.msra.gmra.mrb[0].mxu0 %v4925_v0  ;;  %v4927_v0 = vcombine.low %v6655_v49, %v6659_v50  ;;  %v5804_v49 = vld [vmem:[%s8501_s1 + $0x34] ss:$8 sps:$4 sm:$0xff]   ;;  %v6776_v50 = vsel %vm6527_vm2, %v167_v43, %v6667_v58  ;;  %v5807_v58 = vld [vmem:[%s8501_s1 + $0x44] ss:$8 sps:$4 sm:$0xff]   ;;  %v1036_v43 = vrot.slane %v6569_v45, 5 }
  0x3b   :  { %881 = vmatpush1.bf16.msra.mxu0 %v5793_v60  ;;  %4971 = vmatprep.mubr.msk.bf16.mxu0 %vm498_vm3, %v4928_v7  ;;  %v181_v60 = vrot.slane %v179_v8, 5  ;;  %v4930_v7 = vcombine.high %v6716_v24, %v6720_v25  ;;  %v1022_v8 = vrot.slane %v6500_v13, 5  ;;  %v221_v24 = vshrl.u32 %v6695_v38, 16  ;;  %v5849_v13 = vld [vmem:[%s8501_s1 + $0x1e4] ss:$8 sps:$4 sm:$0xff]  }
  0x3c   :  { %882 = vmatprep.subr.bf16.mxu0 %v5798_v3  ;;  %v211_v3 = vshll.u32 %v6690_v9, 16  ;;  %v6791_v25 = vrot.slane %v208_v4, 4  ;;  %v201_v63 = vrot.slane %v200_v10, 4  ;;  %v1038_v55 = vrot.slane %v1036_v43, 4  ;;  %v5836_v10 = vld [vmem:[%s8501_s1 + $0x1b0] ss:$8 sps:$4 sm:$0xff]  }
  0x3d   :  { %v6784_v17 = vsel %vm6527_vm2, %v177_v59, %v181_v60  ;;  %v1024_v54 = vrot.slane %v1022_v8, 4  ;;  %v1031_v59 = vrot.slane %v1029_v40, 4  ;;  %v1032_v60 = vrot.slane %v6613_v1, 5  ;;  %v5867_v45 = vld [vmem:[%s8501_s1 + $0x224] ss:$8 sps:$4 sm:$0xff]  }
  0x3e   :  { %v1039_v4 = vrot.slane %v6637_v28, 5  ;;  %v223_v39 = vrot.slane %v221_v24, 4  ;;  %v6809_v1 = vsel %vm6527_vm2, %v191_v18, %v195_v48  ;;  %v235_v28 = vshll.u32 %v6703_v16, 16  ;;  %v995_v48 = vld [vmem:[%s8502_s0 + $0x30] sm:$0xee] }
  0x3f   :  { %883 = vmatpush1.bf16.msra.mxu0 %v5796_v32  ;;  %v217_v32 = vshll.u32 %v6695_v38, 16  ;;  %v5805_v18 = vld [vmem:[%s8501_s1 + $0x40] ss:$8 sps:$4 sm:$0xff]   ;;  %v6831_v24 = vsel %vm6816_vm7, %v1024_v54, %v1025_v5 }
  0x40   :  { %884 = vmatprep.subr.bf16.mxu0 %v5801_v34  ;;  %v6793_v34 = vrot.slane %v211_v3, 5  ;;  %v4932_v3 = vcombine.high %v6776_v50, %v6784_v17  ;;  %v6851_v54 = vsel %vm6816_vm7, %v1038_v55, %v1039_v4  ;;  %v237_v55 = vrot.slane %v235_v28, 5 }
  0x41   :  { %v6801_v42 = vrot.slane %v217_v32, 5  ;;  %v994_v32 = vld [vmem:[%s8502_s0 + $0x18] sm:$0xee] }
  0x42   :  { %573 = vmatmul.mubr.bf16.gmra.mrb[4].mxu0 %v4927_v0  ;;  %v205_v0 = vrot.slane %v203_v11, 5 }
  0x43   :  { %885 = vmatpush1.bf16.msra.mxu0 %v5799_v6  ;;  %4972 = vmatprep.mubr.msk.bf16.mxu0 %vm498_vm3, %v4930_v7  ;;  %v232_v6 = vshrl.u32 %v6703_v16, 16  ;;  %v993_v7 = vld [vmem:[%s8502_s0] sm:$0xee] }
  0x44   :  { %886 = vmatprep.subr.bf16.mxu0 %v5804_v49  ;;  %v214_v49 = vor.u32 %v6793_v34, %v6791_v25  ;;  %v5031_v11 = vrot.slane %v993_v7, 9  ;;  %v5032_v25 = vrot.slane %v994_v32, 9  ;;  %v6835_v34 = vsel %vm6816_vm7, %v1031_v59, %v1032_v60 }
  0x45   :  { %v5033_v7 = vrot.slane %v995_v48, 9  ;;  %v1043_v48 = vrot.slane %v6590_v52, 5  ;;  %v5875_v52 = vld [vmem:[%s8501_s1 + $0x244] ss:$8 sps:$4 sm:$0xff]  }
  0x46   :  { %v6847_v5 = vsel %vm6816_vm7, %v5031_v11, %v1022_v8 }
  0x47   :  { %887 = vmatpush1.bf16.msra.mxu0 %v5802_v15  ;;  %v6842_v15 = vsel %vm6527_vm2, %v201_v63, %v205_v0  ;;  %v6864_v63 = vsel %vm6816_vm7, %v5032_v25, %v1029_v40  ;;  %v6868_v8 = vsel %vm6816_vm7, %v5033_v7, %v1036_v43  ;;  %v996_v40 = vld [vmem:[%s8502_s0 + $0x48] sm:$0xee]  ;;  %v245_v43 = vshrl.u32 %v6708_v19, 16  ;;  %v6904_v0 = vld [vmem:[%s8502_s0 + $0xa0] sm:$0x11] }
  0x48   :  { %888 = vmatprep.subr.bf16.mxu0 %v5807_v58  ;;  %v6856_v58 = vld [vmem:[%s8502_s0 + $0x88] sm:$0x11]  ;;  %v5034_v32 = vrot.slane %v996_v40, 9  ;;  %v1046_v25 = vrot.slane %v6664_v53, 5  ;;  %v1045_v4 = vrot.slane %v1043_v48, 4  ;;  %v4931_v40 = vcombine.low %v6776_v50, %v6784_v17 }
  0x49   :  { %v5813_v7 = vld [vmem:[%s8501_s1 + $0x64] ss:$8 sps:$4 sm:$0xff]   ;;  %v4934_v53 = vcombine.high %v6809_v1, %v6842_v15  ;;  %v247_v59 = vrot.slane %v245_v43, 4  ;;  %v5816_v17 = vld [vmem:[%s8501_s1 + $0x74] ss:$8 sps:$4 sm:$0xff]   ;;  %v1060_v31 = vrot.slane %v6856_v58, 5 }
  0x4a   :  { %583 = vmatmul.mubr.bf16.gmra.mrb[8].mxu0 %v4929_v14  ;;  %v5808_v14 = vld [vmem:[%s8501_s1 + $0x50] ss:$8 sps:$4 sm:$0xff]   ;;  %v6895_v11 = vsel %vm6816_vm7, %v5034_v32, %v1043_v48  ;;  %v5811_v32 = vld [vmem:[%s8501_s1 + $0x60] ss:$8 sps:$4 sm:$0xff]   ;;  %v243_v48 = vrot.slane %v241_v20, 5  ;;  %v6911_v50 = vsel %vm6816_vm7, %v1045_v4, %v1046_v25  ;;  %v251_v20 = vshll.u32 %v6904_v0, 16 }
  0x4b   :  { %889 = vmatpush1.bf16.msra.mxu0 %v5805_v18  ;;  %4973 = vmatprep.mubr.msk.bf16.mxu0 %vm498_vm3, %v4932_v3  ;;  %v224_v18 = vor.u32 %v223_v39, %v6801_v42  ;;  %v227_v3 = vshll.u32 %v6856_v58, 16  ;;  %v234_v39 = vrot.slane %v232_v6, 4  ;;  %v256_v4 = vshrl.u32 %v6725_v27, 16  ;;  %v997_v43 = vld [vmem:[%s8502_s0 + $0x60] sm:$0xee] }
  0x4c   :  { %890 = vmatprep.subr.bf16.mxu0 %v5810_v36  ;;  %v215_v36 = vrot.slane %v214_v49, 4  ;;  %v1050_v25 = vrot.slane %v6675_v61, 5  ;;  %v5883_v61 = vld [vmem:[%s8501_s1 + $0x264] ss:$8 sps:$4 sm:$0xff]  }
  0x4d   :  { %v225_v49 = vrot.slane %v224_v18, 4  ;;  %v229_v60 = vrot.slane %v227_v3, 5  ;;  %v5814_v18 = vld [vmem:[%s8501_s1 + $0x70] ss:$8 sps:$4 sm:$0xff]   ;;  %v238_v3 = vor.u32 %v237_v55, %v234_v39  ;;  %v253_v39 = vrot.slane %v251_v20, 5 }
  0x4e   :  { %v6924_v28 = vsel %vm6527_vm2, %v215_v36, %v6801_v42  ;;  %v248_v42 = vor.u32 %v247_v59, %v243_v48  ;;  %v5035_v36 = vrot.slane %v997_v43, 9  ;;  %v1052_v6 = vrot.slane %v1050_v25, 4 }
  0x4f   :  { %891 = vmatpush1.bf16.msra.mxu0 %v5808_v14  ;;  %v5819_v14 = vld [vmem:[%s8501_s1 + $0x84] ss:$8 sps:$4 sm:$0xff]   ;;  %v4933_v59 = vcombine.low %v6809_v1, %v6842_v15  ;;  %v1057_v1 = vrot.slane %v6695_v38, 5 }
  0x50   :  { %892 = vmatprep.subr.bf16.mxu0 %v5813_v7  ;;  %v1053_v7 = vrot.slane %v6754_v62, 5  ;;  %v230_v62 = vsel %vm6527_vm2, %v225_v49, %v229_v60  ;;  %v6946_v55 = vsel %vm6816_vm7, %v5035_v36, %v1050_v25  ;;  %v5817_v60 = vld [vmem:[%s8501_s1 + $0x80] ss:$8 sps:$4 sm:$0xff]   ;;  %v5822_v25 = vld [vmem:[%s8501_s1 + $0x94] ss:$8 sps:$4 sm:$0xff]   ;;  %v249_v20 = vrot.slane %v248_v42, 4 }
  0x51   :  { %v4936_v49 = vcombine.high %v6924_v28, %v230_v62 }
  0x52   :  { %593 = vmatmul.mubr.bf16.gmra.mrb[12].mxu0 %v4931_v40  ;;  %v259_v40 = vshll.u32 %v6725_v27, 16  ;;  %v6952_v43 = vsel %vm6816_vm7, %v1052_v6, %v1053_v7  ;;  %v239_v6 = vrot.slane %v238_v3, 4  ;;  %v254_v58 = vsel %vm6527_vm2, %v249_v20, %v253_v39  ;;  %v999_v20 = vld [vmem:[%s8502_s0 + $0x90] sm:$0xee] }
  0x53   :  { %893 = vmatpush1.bf16.msra.mxu0 %v5811_v32  ;;  %4974 = vmatprep.mubr.msk.bf16.mxu0 %vm498_vm3, %v4934_v53  ;;  %v265_v32 = vshll.u32 %v6730_v29, 16  ;;  %v269_v53 = vshrl.u32 %v6730_v29, 16 }
  0x54   :  { %894 = vmatprep.subr.bf16.mxu0 %v5816_v17  ;;  %v258_v17 = vrot.slane %v256_v4, 4  ;;  %v261_v36 = vrot.slane %v259_v40, 5  ;;  %v6968_v4 = vld [vmem:[%s8502_s0 + $0xb8] sm:$0x11]  ;;  %v998_v40 = vld [vmem:[%s8502_s0 + $0x78] sm:$0xee] }
  0x55   :  { %v267_v7 = vrot.slane %v265_v32, 5  ;;  %v275_v42 = vshll.u32 %v6968_v4, 16  ;;  %v5036_v32 = vrot.slane %v998_v40, 9  ;;  %v1067_v40 = vrot.slane %v6904_v0, 5 }
  0x56   :  { %v262_v3 = vor.u32 %v261_v36, %v258_v17  ;;  %v4935_v17 = vcombine.low %v6924_v28, %v230_v62  ;;  %v5828_v28 = vld [vmem:[%s8501_s1 + $0xb4] ss:$8 sps:$4 sm:$0xff]  }
  0x57   :  { %895 = vmatpush1.bf16.msra.mxu0 %v5814_v18  ;;  %v271_v18 = vrot.slane %v269_v53, 4  ;;  %v5825_v53 = vld [vmem:[%s8501_s1 + $0xa4] ss:$8 sps:$4 sm:$0xff]   ;;  %v6989_v15 = vsel %vm6816_vm7, %v5036_v32, %v1057_v1  ;;  %v5037_v32 = vrot.slane %v999_v20, 9 }
  0x58   :  { %896 = vmatprep.subr.bf16.mxu0 %v5819_v14  ;;  %v5820_v14 = vld [vmem:[%s8501_s1 + $0x90] ss:$8 sps:$4 sm:$0xff]   ;;  %v263_v62 = vrot.slane %v262_v3, 4 }
  0x5a   :  { %603 = vmatmul.mubr.bf16.gmra.mrb[16].mxu0 %v4933_v59  ;;  %v244_v59 = vsel %vm6527_vm2, %v239_v6, %v243_v48  ;;  %v5823_v48 = vld [vmem:[%s8501_s1 + $0xa0] ss:$8 sps:$4 sm:$0xff]   ;;  %v268_v3 = vsel %vm6527_vm2, %v263_v62, %v267_v7 }
  0x5b   :  { %897 = vmatpush1.bf16.msra.mxu0 %v5817_v60  ;;  %4975 = vmatprep.mubr.msk.bf16.mxu0 %vm498_vm3, %v4936_v49  ;;  %v272_v60 = vor.u32 %v271_v18, %v267_v7  ;;  %v1059_v49 = vrot.slane %v1057_v1, 4  ;;  %v4938_v36 = vcombine.high %v244_v59, %v254_v58  ;;  %v277_v1 = vrot.slane %v275_v42, 5 }
  0x5c   :  { %898 = vmatprep.subr.bf16.mxu0 %v5822_v25  ;;  %v1064_v18 = vrot.slane %v6708_v19, 5 }
  0x5d   :  { %v6994_v25 = vsel %vm6816_vm7, %v1059_v49, %v1060_v31  ;;  %v273_v31 = vrot.slane %v272_v60, 4  ;;  %v75_v60 = vld [vmem:[%s8501_s1 + $0xd0] sm:$0xff] }
  0x5e   :  { %v5077_v39 = vcombine.high %v6989_v15, %v6994_v25  ;;  %v5076_v6 = vcombine.low %v6989_v15, %v6994_v25  ;;  %v1066_v0 = vrot.slane %v1064_v18, 4  ;;  %v7027_v49 = vsel %vm6816_vm7, %v5037_v32, %v1064_v18  ;;  %v5899_v15 = vld [vmem:[%s8503_s3 + $0x30] ss:$20 sps:$4 sm:$0xff]   ;;  %v5902_v25 = vld [vmem:[%s8503_s3 + $0x28] ss:$20 sps:$4 sm:$0xff]  }
  0x5f   :  { %899 = vmatpush1.bf16.msra.mxu0 %v5820_v14  ;;  %v5826_v14 = vld [vmem:[%s8501_s1 + $0xb0] ss:$8 sps:$4 sm:$0xff]   ;;  %v278_v42 = vsel %vm6527_vm2, %v273_v31, %v277_v1  ;;  %v5021_v62 = vcombine.high %v75_v60, %v75_v60  ;;  %v5020_v31 = vcombine.low %v75_v60, %v75_v60  ;;  %v1074_v1 = vrot.slane %v6968_v4, 5 }
  0x60   :  { %900 = vmatprep.subr.bf16.mxu0 %v5825_v53  ;;  %v5831_v53 = vld [vmem:[%s8501_s1 + $0xc4] ss:$8 sps:$4 sm:$0xff]   ;;  %v7031_v7 = vsel %vm6816_vm7, %v1066_v0, %v1067_v40  ;;  %v4940_v30 = vcombine.high %v268_v3, %v278_v42  ;;  %v5838_v40 = vld [vmem:[%s8501_s1 + $0x1b4] ss:$8 sps:$4 sm:$0xff]  }
  0x61   :  { %v875_v18 = vsel %vm523_vm4, %v5020_v31, 0 }
  0x62   :  { %613 = vmatmul.mubr.bf16.gmra.mrb[20].mxu0 %v4935_v17  ;;  %v4937_v17 = vcombine.low %v244_v59, %v254_v58  ;;  %v1000_v59 = vld [vmem:[%s8502_s0 + $0xa8] sm:$0xee]  ;;  %v1071_v58 = vrot.slane %v6730_v29, 5 }
  0x63   :  { %4976 = vmatprep.mubr.msk.bf16.mxu0 %vm498_vm3, %v4938_v36  ;;  %901 = vmatpush1.bf16.msra.mxu0 %v5823_v48  ;;  %v5829_v48 = vld [vmem:[%s8501_s1 + $0xc0] ss:$8 sps:$4 sm:$0xff]   ;;  %v5079_v36 = vcombine.high %v7027_v49, %v7031_v7  ;;  %v5038_v20 = vrot.slane %v1000_v59, 9 }
  0x64   :  { %902 = vmatprep.subr.bf16.mxu0 %v5828_v28  ;;  %v5078_v28 = vcombine.low %v7027_v49, %v7031_v7  ;;  %v5905_v49 = vld [vmem:[%s8503_s3 + $0x58] ss:$20 sps:$4 sm:$0xff]   ;;  %v5908_v7 = vld [vmem:[%s8503_s3 + $0x50] ss:$20 sps:$4 sm:$0xff]  }
  0x65   :  { %v7053_v32 = vsel %vm6816_vm7, %v5038_v20, %v1071_v58 }
  0x67   :  { %903 = vmatpush1.bf16.msra.mxu0 %v5826_v14  ;;  %v1073_v14 = vrot.slane %v1071_v58, 4  ;;  %v8518_v58 = vcombine.low %v6703_v16, %v6708_v19 }
  0x68   :  { %904 = vmatprep.subr.bf16.mxu0 %v5831_v53  ;;  %v4939_v53 = vcombine.low %v268_v3, %v278_v42  ;;  %v5841_v3 = vld [vmem:[%s8501_s1 + $0x1c4] ss:$8 sps:$4 sm:$0xff]   ;;  %v5839_v42 = vld [vmem:[%s8501_s1 + $0x1c0] ss:$8 sps:$4 sm:$0xff]  }
  0x69   :  { %v7057_v4 = vsel %vm6816_vm7, %v1073_v14, %v1074_v1  ;;  %v8519_v1 = vcombine.high %v6725_v27, %v6730_v29  ;;  %v8524_v14 = vcombine.low %v6864_v63, %v6835_v34 }
  0x6a   :  { %623 = vmatmul.mubr.bf16.gmra.mrb[24].mxu0 %v4937_v17  ;;  %v5081_v0 = vcombine.high %v7053_v32, %v7057_v4  ;;  %v5080_v60 = vcombine.low %v7053_v32, %v7057_v4  ;;  %v5878_v17 = vld [vmem:[%s8501_s1 + $0x254] ss:$8 sps:$4 sm:$0xff]   ;;  %v5915_v4 = vld [vmem:[%s8503_s3 + $0xa4] ss:$20 sps:$4 sm:$0xff]  }
  0x6b   :  { %4977 = vmatprep.mubr.msk.bf16.mxu0 %vm498_vm3, %v4940_v30  ;;  %905 = vmatpush1.bf16.msra.mxu0 %v5829_v48  ;;  %v8517_v30 = vcombine.high %v6703_v16, %v6708_v19  ;;  %v5881_v48 = vld [vmem:[%s8501_s1 + $0x260] ss:$8 sps:$4 sm:$0xff]   ;;  %v8522_v16 = vcombine.low %v6847_v5, %v6831_v24  ;;  %v8523_v19 = vcombine.high %v6864_v63, %v6835_v34 }
  0x6c   :  { %5022 = vmatprep.subr.msk.bf16.mxu0 %vm523_vm4, %v5021_v62  ;;  %v5887_v62 = vld [vmem:[%s8501_s1 + $0x274] ss:$8 sps:$4 sm:$0xff]   ;;  %v8529_v34 = vcombine.high %v6946_v55, %v6952_v43  ;;  %v8530_v63 = vcombine.low %v6946_v55, %v6952_v43  ;;  %v5897_v55 = vld [vmem:[%s8503_s3 + $0x2c] ss:$20 sps:$4 sm:$0xff]  }
  0x6d   :  { %v5901_v43 = vld [vmem:[%s8503_s3 + $0x34] ss:$20 sps:$4 sm:$0xff]  }
  0x6e   :  { %v5911_v32 = vld [vmem:[%s8503_s3 + $0x80] ss:$20 sps:$4 sm:$0xff]  }
  0x6f   :  { %907 = vmatpush1.bf16.msra.mxu0 %v875_v18  ;;  %v8520_v18 = vcombine.low %v6725_v27, %v6730_v29  ;;  %v8525_v27 = vcombine.high %v6868_v8, %v6851_v54  ;;  %v8526_v29 = vcombine.low %v6868_v8, %v6851_v54  ;;  %v5891_v54 = vld [vmem:[%s8503_s3 + $0x4] ss:$20 sps:$4 sm:$0xff]   ;;  %v5893_v8 = vld [vmem:[%s8503_s3 + $0x8] ss:$20 sps:$4 sm:$0xff]  }
  0x70   :  { %1325 = vmatprep.subr.bf16.mxu0 %v5838_v40  ;;  %v8521_v40 = vcombine.high %v6847_v5, %v6831_v24  ;;  %v8527_v24 = vcombine.high %v6895_v11, %v6911_v50  ;;  %v8528_v5 = vcombine.low %v6895_v11, %v6911_v50  ;;  %3796 = vmatprep.subr.bf16.mxu1 %v5891_v54  ;;  %v5895_v11 = vld [vmem:[%s8503_s3 + $0xc] ss:$20 sps:$4 sm:$0xff]   ;;  %v5989_v54 = vld [vmem:[%s8503_s3 + $0x284] ss:$20 sps:$4 sm:$0xff]  }
  0x71   :  { %v5896_v50 = vld [vmem:[%s8503_s3] ss:$20 sps:$4 sm:$0xff]  }
  0x72   :  { %633 = vmatmul.mubr.bf16.gmra.mrb[28].mxu0 %v4939_v53  ;;  %3797 = vmatpush1.bf16.msra.mxu1 %v5896_v50  ;;  %v5914_v53 = vld [vmem:[%s8503_s3 + $0x78] ss:$20 sps:$4 sm:$0xff]  }
  0x73   :  { %5023 = vmatprep.mubr.msk.bf16.mxu0 %vm498_vm3, %v4979_v23  ;;  %v5846_v23 = vld [vmem:[%s8501_s1 + $0x1d4] ss:$8 sps:$4 sm:$0xff]   ;;  %3798 = vmatprep.subr.bf16.mxu1 %v5897_v55  ;;  %v1470_v55 = vld [vmem:[%s8504_s2] sm:$0x3] }
  0x76   :  { %3799 = vmatpush1.bf16.msra.mxu1 %v5902_v25 }
  0x7a   :  { %913 = vmatmul.mubr.bf16.vlgmr.msra.gmra.mrb[0].mxu0 %v4978_v26  ;;  %v5847_v26 = vld [vmem:[%s8501_s1 + $0x1e0] ss:$8 sps:$4 sm:$0xff]  }
  0x7b   :  { %1326 = vmatpush1.bf16.msra.mxu0 %v5836_v10  ;;  %5024 = vmatprep.mubr.msk.bf16.mxu0 %vm498_vm3, %v4981_v37  ;;  %v5854_v37 = vld [vmem:[%s8501_s1 + $0x1f4] ss:$8 sps:$4 sm:$0xff]  }
  0x7c   :  { %1327 = vmatprep.subr.bf16.mxu0 %v5841_v3  ;;  %v5920_v10 = vld [vmem:[%s8503_s3 + $0xa0] ss:$20 sps:$4 sm:$0xff]  }
  0x7d   :  { %v5921_v3 = vld [vmem:[%s8503_s3 + $0xcc] ss:$20 sps:$4 sm:$0xff]  }
  0x7f   :  { %1328 = vmatpush1.bf16.msra.mxu0 %v5839_v42  ;;  %v5925_v42 = vld [vmem:[%s8503_s3 + $0xd4] ss:$20 sps:$4 sm:$0xff]  }
  0x80   :  { %1329 = vmatprep.subr.bf16.mxu0 %v5846_v23  ;;  %v5923_v23 = vld [vmem:[%s8503_s3 + $0xd0] ss:$20 sps:$4 sm:$0xff]  }
  0x82   :  { %923 = vmatmul.mubr.bf16.gmra.mrb[4].mxu0 %v4980_v41  ;;  %v5856_v41 = vld [vmem:[%s8501_s1 + $0x200] ss:$8 sps:$4 sm:$0xff]  }
  0x83   :  { %1330 = vmatpush1.bf16.msra.mxu0 %v5844_v12  ;;  %5025 = vmatprep.mubr.msk.bf16.mxu0 %vm498_vm3, %v4983_v46  ;;  %v5862_v46 = vld [vmem:[%s8501_s1 + $0x214] ss:$8 sps:$4 sm:$0xff]  }
  0x84   :  { %1331 = vmatprep.subr.bf16.mxu0 %v5849_v13  ;;  %v5926_v12 = vld [vmem:[%s8503_s3 + $0xc8] ss:$20 sps:$4 sm:$0xff]  }
  0x85   :  { %v5927_v13 = vld [vmem:[%s8503_s3 + $0xf4] ss:$20 sps:$4 sm:$0xff]  }
  0x87   :  { %1332 = vmatpush1.bf16.msra.mxu0 %v5847_v26  ;;  %v5931_v26 = vld [vmem:[%s8503_s3 + $0xfc] ss:$20 sps:$4 sm:$0xff]  }
  0x88   :  { %1333 = vmatprep.subr.bf16.mxu0 %v5854_v37  ;;  %v5929_v37 = vld [vmem:[%s8503_s3 + $0xf8] ss:$20 sps:$4 sm:$0xff]  }
  0x8a   :  { %933 = vmatmul.mubr.bf16.gmra.mrb[8].mxu0 %v4982_v56  ;;  %v5865_v56 = vld [vmem:[%s8501_s1 + $0x220] ss:$8 sps:$4 sm:$0xff]  }
  0x8b   :  { %1334 = vmatpush1.bf16.msra.mxu0 %v5852_v33  ;;  %5026 = vmatprep.mubr.msk.bf16.mxu0 %vm498_vm3, %v4985_v57  ;;  %v5870_v57 = vld [vmem:[%s8501_s1 + $0x234] ss:$8 sps:$4 sm:$0xff]   ;;  %v5932_v33 = vld [vmem:[%s8503_s3 + $0xf0] ss:$20 sps:$4 sm:$0xff]  }
  0x8c   :  { %1335 = vmatprep.subr.bf16.mxu0 %v5858_v35  ;;  %v5933_v35 = vld [vmem:[%s8503_s3 + $0x11c] ss:$20 sps:$4 sm:$0xff]  }
  0x8f   :  { %1336 = vmatpush1.bf16.msra.mxu0 %v5856_v41  ;;  %v5937_v41 = vld [vmem:[%s8503_s3 + $0x124] ss:$20 sps:$4 sm:$0xff]  }
  0x90   :  { %1337 = vmatprep.subr.bf16.mxu0 %v5862_v46  ;;  %v5935_v46 = vld [vmem:[%s8503_s3 + $0x120] ss:$20 sps:$4 sm:$0xff]  }
  0x92   :  { %943 = vmatmul.mubr.bf16.gmra.mrb[12].mxu0 %v4984_v2  ;;  %v8515_v2 = vcombine.high %v6690_v9, %v6695_v38 }
  0x93   :  { %1338 = vmatpush1.bf16.msra.mxu0 %v5860_v44  ;;  %5027 = vmatprep.mubr.msk.bf16.mxu0 %vm498_vm3, %v4987_v21  ;;  %v5873_v21 = vld [vmem:[%s8501_s1 + $0x240] ss:$8 sps:$4 sm:$0xff]   ;;  %v5938_v44 = vld [vmem:[%s8503_s3 + $0x118] ss:$20 sps:$4 sm:$0xff]  }
  0x94   :  { %1339 = vmatprep.subr.bf16.mxu0 %v5867_v45  ;;  %v5939_v45 = vld [vmem:[%s8503_s3 + $0x144] ss:$20 sps:$4 sm:$0xff]  }
  0x97   :  { %1340 = vmatpush1.bf16.msra.mxu0 %v5865_v56  ;;  %v5943_v56 = vld [vmem:[%s8503_s3 + $0x14c] ss:$20 sps:$4 sm:$0xff]  }
  0x98   :  { %1341 = vmatprep.subr.bf16.mxu0 %v5870_v57  ;;  %v5941_v57 = vld [vmem:[%s8503_s3 + $0x148] ss:$20 sps:$4 sm:$0xff]  }
  0x9a   :  { %953 = vmatmul.mubr.bf16.gmra.mrb[16].mxu0 %v4986_v22  ;;  %v8516_v22 = vcombine.low %v6690_v9, %v6695_v38  ;;  %v5065_v9 = vld [vmem:[%s8501_s1 + $0x280] sm:$0xff]  ;;  %v5885_v38 = vld [vmem:[%s8501_s1 + $0x270] ss:$8 sps:$4 sm:$0xff]  }
  0x9b   :  { %1342 = vmatpush1.bf16.msra.mxu0 %v5868_v51  ;;  %5028 = vmatprep.mubr.msk.bf16.mxu0 %vm498_vm3, %v8515_v2  ;;  %v5109_v31 = vcombine.high %v5065_v9, %v5065_v9  ;;  %v5108_v59 = vcombine.low %v5065_v9, %v5065_v9  ;;  %v5944_v51 = vld [vmem:[%s8503_s3 + $0x140] ss:$20 sps:$4 sm:$0xff]  }
  0x9c   :  { %1343 = vmatprep.subr.bf16.mxu0 %v5875_v52  ;;  %v5945_v52 = vld [vmem:[%s8503_s3 + $0x16c] ss:$20 sps:$4 sm:$0xff]   ;;  %v5949_v2 = vld [vmem:[%s8503_s3 + $0x174] ss:$20 sps:$4 sm:$0xff]  }
  0x9d   :  { %v1320_v20 = vsel %vm523_vm4, %v5108_v59, 0  ;;  %v5959_v9 = vld [vmem:[%s8503_s3 + $0x1c0] ss:$20 sps:$4 sm:$0xff]  }
  0x9e   :  { %v5967_v59 = vld [vmem:[%s8503_s3 + $0x1ec] ss:$20 sps:$4 sm:$0xff]  }
  0x9f   :  { %1344 = vmatpush1.bf16.msra.mxu0 %v5873_v21  ;;  %v5947_v21 = vld [vmem:[%s8503_s3 + $0x170] ss:$20 sps:$4 sm:$0xff]  }
  0xa0   :  { %1345 = vmatprep.subr.bf16.mxu0 %v5878_v17  ;;  %v5950_v17 = vld [vmem:[%s8503_s3 + $0x168] ss:$20 sps:$4 sm:$0xff]  }
  0xa2   :  { %963 = vmatmul.mubr.bf16.gmra.mrb[20].mxu0 %v8516_v22  ;;  %v5953_v22 = vld [vmem:[%s8503_s3 + $0x198] ss:$20 sps:$4 sm:$0xff]  }
  0xa3   :  { %5029 = vmatprep.mubr.msk.bf16.mxu0 %vm498_vm3, %v8517_v30  ;;  %1346 = vmatpush1.bf16.msra.mxu0 %v5876_v47  ;;  %v5951_v47 = vld [vmem:[%s8503_s3 + $0x194] ss:$20 sps:$4 sm:$0xff]   ;;  %v5956_v30 = vld [vmem:[%s8503_s3 + $0x190] ss:$20 sps:$4 sm:$0xff]  }
  0xa4   :  { %1347 = vmatprep.subr.bf16.mxu0 %v5883_v61  ;;  %v5955_v61 = vld [vmem:[%s8503_s3 + $0x19c] ss:$20 sps:$4 sm:$0xff]  }
  0xa7   :  { %1348 = vmatpush1.bf16.msra.mxu0 %v5881_v48  ;;  %v5957_v48 = vld [vmem:[%s8503_s3 + $0x1bc] ss:$20 sps:$4 sm:$0xff]  }
  0xa8   :  { %1349 = vmatprep.subr.bf16.mxu0 %v5887_v62  ;;  %v5961_v62 = vld [vmem:[%s8503_s3 + $0x1c4] ss:$20 sps:$4 sm:$0xff]  }
  0xaa   :  { %973 = vmatmul.mubr.bf16.gmra.mrb[24].mxu0 %v8518_v58  ;;  %v5965_v58 = vld [vmem:[%s8503_s3 + $0x1e8] ss:$20 sps:$4 sm:$0xff]  }
  0xab   :  { %5030 = vmatprep.mubr.msk.bf16.mxu0 %vm498_vm3, %v8519_v1  ;;  %1350 = vmatpush1.bf16.msra.mxu0 %v5885_v38  ;;  %v5962_v38 = vld [vmem:[%s8503_s3 + $0x1b8] ss:$20 sps:$4 sm:$0xff]   ;;  %v5968_v1 = vld [vmem:[%s8503_s3 + $0x1e0] ss:$20 sps:$4 sm:$0xff]  }
  0xac   :  { %5110 = vmatprep.subr.msk.bf16.mxu0 %vm523_vm4, %v5109_v31  ;;  %v5963_v31 = vld [vmem:[%s8503_s3 + $0x1e4] ss:$20 sps:$4 sm:$0xff]  }
  0xaf   :  { %1352 = vmatpush1.bf16.msra.mxu0 %v1320_v20  ;;  %v5969_v20 = vld [vmem:[%s8503_s3 + $0x20c] ss:$20 sps:$4 sm:$0xff]  }
  0xb0   :  { %3960 = vmatprep.subr.bf16.mxu0 %v5895_v11  ;;  %v1472_v11 = vlaneseq }
  0xb2   :  { %983 = vmatmul.mubr.bf16.gmra.mrb[28].mxu0 %v8520_v18  ;;  %v5973_v18 = vld [vmem:[%s8503_s3 + $0x214] ss:$20 sps:$4 sm:$0xff]   ;;  %v7453_v50 = vshrl.u32 %v1472_v11, 7 }
  0xb3   :  { %5111 = vmatprep.mubr.msk.bf16.mxu0 %vm498_vm3, %v8521_v40  ;;  %v5971_v40 = vld [vmem:[%s8503_s3 + $0x210] ss:$20 sps:$4 sm:$0xff]  }
  0xba   :  { %1358 = vmatmul.mubr.bf16.vlgmr.msra.gmra.mrb[0].mxu0 %v8522_v16  ;;  %v5974_v16 = vld [vmem:[%s8503_s3 + $0x208] ss:$20 sps:$4 sm:$0xff]  }
  0xbb   :  { %5112 = vmatprep.mubr.msk.bf16.mxu0 %vm498_vm3, %v8523_v19  ;;  %3961 = vmatpush1.bf16.msra.mxu0 %v5893_v8  ;;  %v5975_v19 = vld [vmem:[%s8503_s3 + $0x234] ss:$20 sps:$4 sm:$0xff]   ;;  %v5992_v8 = vld [vmem:[%s8503_s3 + $0x28c] ss:$20 sps:$4 sm:$0xff]  }
  0xbc   :  { %3962 = vmatprep.subr.bf16.mxu0 %v5901_v43  ;;  %v7459_v43 = vsub.s32 0, %v7453_v50 }
  0xbe   :  { %v7465_v25 = vrot.slane %v1470_v55, %v7459_v43 }
  0xbf   :  { %3963 = vmatpush1.bf16.msra.mxu0 %v5899_v15  ;;  %v7462_v15 = vsub.s32 1, %v7453_v50 }
  0xc2   :  { %1368 = vmatmul.mubr.bf16.gmra.mrb[4].mxu0 %v8524_v14  ;;  %v5979_v14 = vld [vmem:[%s8503_s3 + $0x23c] ss:$20 sps:$4 sm:$0xff]  }
  0xc3   :  { %5113 = vmatprep.mubr.msk.bf16.mxu0 %vm498_vm3, %v8525_v27  ;;  %v5977_v27 = vld [vmem:[%s8503_s3 + $0x238] ss:$20 sps:$4 sm:$0xff]  }
  0xca   :  { %1378 = vmatmul.mubr.bf16.gmra.mrb[8].mxu0 %v8526_v29  ;;  %v5980_v29 = vld [vmem:[%s8503_s3 + $0x230] ss:$20 sps:$4 sm:$0xff]  }
  0xcb   :  { %5114 = vmatprep.mubr.msk.bf16.mxu0 %vm498_vm3, %v8527_v24  ;;  %v5981_v24 = vld [vmem:[%s8503_s3 + $0x25c] ss:$20 sps:$4 sm:$0xff]  }
  0xd2   :  { %1388 = vmatmul.mubr.bf16.gmra.mrb[12].mxu0 %v8528_v5  ;;  %v5985_v5 = vld [vmem:[%s8503_s3 + $0x264] ss:$20 sps:$4 sm:$0xff]  }
  0xd3   :  { %5115 = vmatprep.mubr.msk.bf16.mxu0 %vm498_vm3, %v8529_v34  ;;  %v5986_v34 = vld [vmem:[%s8503_s3 + $0x258] ss:$20 sps:$4 sm:$0xff]  }
  0xda   :  { %1398 = vmatmul.mubr.bf16.gmra.mrb[16].mxu0 %v8530_v63  ;;  %v5983_v63 = vld [vmem:[%s8503_s3 + $0x260] ss:$20 sps:$4 sm:$0xff]  }
  0xdb   :  { %5116 = vmatprep.mubr.msk.bf16.mxu0 %vm498_vm3, %v5077_v39  ;;  %v5903_v39 = vld [vmem:[%s8503_s3 + $0x54] ss:$20 sps:$4 sm:$0xff]  }
  0xdc   :  { %3800 = vmatprep.subr.bf16.mxu1 %v5903_v39  ;;  %v7468_v39 = vrot.slane %v1470_v55, %v7462_v15 }
  0xdd   :  { %3801 = vmatpush1.bf16.msra.mxu1 %v5908_v7 }
  0xe2   :  { %1408 = vmatmul.mubr.bf16.gmra.mrb[20].mxu0 %v5076_v6  ;;  %v5907_v6 = vld [vmem:[%s8503_s3 + $0x5c] ss:$20 sps:$4 sm:$0xff]  }
  0xe3   :  { %5117 = vmatprep.mubr.msk.bf16.mxu0 %vm498_vm3, %v5079_v36  ;;  %3964 = vmatprep.subr.bf16.mxu0 %v5907_v6  ;;  %v5909_v36 = vld [vmem:[%s8503_s3 + $0x7c] ss:$20 sps:$4 sm:$0xff]  }
  0xe4   :  { %3965 = vmatpush1.bf16.msra.mxu0 %v5905_v49  ;;  %3802 = vmatprep.subr.bf16.mxu1 %v5909_v36 }
  0xe5   :  { %3803 = vmatpush1.bf16.msra.mxu1 %v5914_v53 }
  0xe6   :  { %3804 = vmatprep.subr.bf16.mxu1 %v5915_v4 }
  0xe9   :  { %3805 = vmatpush1.bf16.msra.mxu1 %v5920_v10 }
  0xea   :  { %1418 = vmatmul.mubr.bf16.gmra.mrb[24].mxu0 %v5078_v28  ;;  %v5913_v28 = vld [vmem:[%s8503_s3 + $0x84] ss:$20 sps:$4 sm:$0xff]   ;;  %3806 = vmatprep.subr.bf16.mxu1 %v5921_v3 }
  0xeb   :  { %5118 = vmatprep.mubr.msk.bf16.mxu0 %vm498_vm3, %v5081_v0  ;;  %3966 = vmatprep.subr.bf16.mxu0 %v5913_v28  ;;  %v5919_v0 = vld [vmem:[%s8503_s3 + $0xac] ss:$20 sps:$4 sm:$0xff]  }
  0xec   :  { %3967 = vmatpush1.bf16.msra.mxu0 %v5911_v32 }
  0xed   :  { %3968 = vmatprep.subr.bf16.mxu0 %v5919_v0  ;;  %3807 = vmatpush1.bf16.msra.mxu1 %v5926_v12 }
  0xee   :  { %3808 = vmatprep.subr.bf16.mxu1 %v5927_v13 }
  0xf1   :  { %3809 = vmatpush1.bf16.msra.mxu1 %v5932_v33 }
  0xf2   :  { %1428 = vmatmul.mubr.bf16.gmra.mrb[28].mxu0 %v5080_v60  ;;  %v5917_v60 = vld [vmem:[%s8503_s3 + $0xa8] ss:$20 sps:$4 sm:$0xff]   ;;  %3810 = vmatprep.subr.bf16.mxu1 %v5933_v35 }
  0xf3   :  { %3969 = vmatpush1.bf16.msra.mxu0 %v5917_v60 }
  0xf4   :  { %3970 = vmatprep.subr.bf16.mxu0 %v5925_v42 }
  0xf5   :  { %3811 = vmatpush1.bf16.msra.mxu1 %v5938_v44 }
  0xf6   :  { %3812 = vmatprep.subr.bf16.mxu1 %v5939_v45 }
  0xf7   :  { %3971 = vmatpush1.bf16.msra.mxu0 %v5923_v23 }
  0xf8   :  { %3972 = vmatprep.subr.bf16.mxu0 %v5931_v26 }
  0xf9   :  { %3813 = vmatpush1.bf16.msra.mxu1 %v5944_v51 }
  0xfa   :  { %3814 = vmatprep.subr.bf16.mxu1 %v5945_v52 }
  0xfb   :  { %3973 = vmatpush1.bf16.msra.mxu0 %v5929_v37 }
  0xfc   :  { %3974 = vmatprep.subr.bf16.mxu0 %v5937_v41 }
  0xfd   :  { %3815 = vmatpush1.bf16.msra.mxu1 %v5950_v17 }
  0xfe   :  { %3816 = vmatprep.subr.bf16.mxu1 %v5951_v47 }
  0xff   :  { %3975 = vmatpush1.bf16.msra.mxu0 %v5935_v46 }
 0x100   :  { %3976 = vmatprep.subr.bf16.mxu0 %v5943_v56 }
 0x101   :  { %3817 = vmatpush1.bf16.msra.mxu1 %v5956_v30 }
 0x102   :  { %3818 = vmatprep.subr.bf16.mxu1 %v5957_v48 }
 0x103   :  { %3977 = vmatpush1.bf16.msra.mxu0 %v5941_v57 }
 0x104   :  { %3978 = vmatprep.subr.bf16.mxu0 %v5949_v2 }
 0x105   :  { %3819 = vmatpush1.bf16.msra.mxu1 %v5962_v38 }
 0x106   :  { %3820 = vmatprep.subr.bf16.mxu1 %v5963_v31 }
 0x107   :  { %3979 = vmatpush1.bf16.msra.mxu0 %v5947_v21 }
 0x108   :  { %3980 = vmatprep.subr.bf16.mxu0 %v5955_v61 }
 0x109   :  { %3821 = vmatpush1.bf16.msra.mxu1 %v5968_v1 }
 0x10a   :  { %3822 = vmatprep.subr.bf16.mxu1 %v5969_v20 }
 0x10b   :  { %3981 = vmatpush1.bf16.msra.mxu0 %v5953_v22 }
 0x10c   :  { %3982 = vmatprep.subr.bf16.mxu0 %v5961_v62 }
 0x10d   :  { %3823 = vmatpush1.bf16.msra.mxu1 %v5974_v16 }
 0x10e   :  { %3824 = vmatprep.subr.bf16.mxu1 %v5975_v19 }
 0x10f   :  { %3983 = vmatpush1.bf16.msra.mxu0 %v5959_v9 }
 0x110   :  { %3984 = vmatprep.subr.bf16.mxu0 %v5967_v59 }
 0x111   :  { %3825 = vmatpush1.bf16.msra.mxu1 %v5980_v29 }
 0x112   :  { %3826 = vmatprep.subr.bf16.mxu1 %v5981_v24 }
 0x113   :  { %3985 = vmatpush1.bf16.msra.mxu0 %v5965_v58 }
 0x114   :  { %3986 = vmatprep.subr.bf16.mxu0 %v5973_v18 }
 0x115   :  { %3827 = vmatpush1.bf16.msra.mxu1 %v5986_v34 }
 0x116   :  { %3837 = vmatprep.subr.bf16.mxu1 %v5989_v54 }
 0x117   :  { %3987 = vmatpush1.bf16.msra.mxu0 %v5971_v40 }
 0x118   :  { %3988 = vmatprep.subr.bf16.mxu0 %v5979_v14 }
 0x11b   :  { %3989 = vmatpush1.bf16.msra.mxu0 %v5977_v27 }
 0x11c   :  { %3990 = vmatprep.subr.bf16.mxu0 %v5985_v5 }
 0x11f   :  { %3991 = vmatpush1.bf16.msra.mxu0 %v5983_v63 }
 0x120   :  { %4001 = vmatprep.subr.bf16.mxu0 %v5992_v8 }
 0x18d   :  { %v1359_v6 = vpop.f32.mrb[0].mxu0 }
 0x18e   :  { %v1482_v49 = vadd.f32 %v7465_v25, %v1359_v6  ;;  %v1361_v7 = vpop.f32.mrb[1].mxu0 }
 0x18f   :  { %v1483_v36 = vadd.f32 %v7468_v39, %v1361_v7  ;;  %v1363_v28 = vpop.f32.mrb[2].mxu0 }
 0x190   :  { %v1514_v32 = vmax.f32 %v1482_v49, 0.0  ;;  %v1484_v53 = vadd.f32 %v7465_v25, %v1363_v28  ;;  %v1365_v4 = vpop.f32.mrb[3].mxu0 }
 0x191   :  { %v1515_v0 = vmax.f32 %v1483_v36, 0.0  ;;  %v1485_v60 = vadd.f32 %v7468_v39, %v1365_v4 }
 0x192   :  { %v1516_v10 = vmax.f32 %v1484_v53, 0.0 }
 0x193   :  { %v1546_v3 = vmax.f32 %v1514_v32, %v1515_v0  ;;  %v1517_v42 = vmax.f32 %v1485_v60, 0.0 }
 0x195   :  { %1562 = vst [vmem:[#allocation2] sm:$0xff] %v1546_v3  ;;  %v1547_v23 = vmax.f32 %v1516_v10, %v1517_v42  ;;  %v1369_v12 = vpop.f32.mrb[4].mxu0 }
 0x196   :  { %v1486_v13 = vadd.f32 %v7465_v25, %v1369_v12  ;;  %v1371_v26 = vpop.f32.mrb[5].mxu0 }
 0x197   :  { %1563 = vst [vmem:[#allocation2 + $0x8] sm:$0xff] %v1547_v23  ;;  %v1487_v37 = vadd.f32 %v7468_v39, %v1371_v26  ;;  %v1373_v33 = vpop.f32.mrb[6].mxu0 }
 0x198   :  { %v1518_v35 = vmax.f32 %v1486_v13, 0.0  ;;  %v1488_v41 = vadd.f32 %v7465_v25, %v1373_v33  ;;  %v1375_v46 = vpop.f32.mrb[7].mxu0 }
 0x199   :  { %v1519_v44 = vmax.f32 %v1487_v37, 0.0  ;;  %v1489_v45 = vadd.f32 %v7468_v39, %v1375_v46 }
 0x19a   :  { %v1520_v56 = vmax.f32 %v1488_v41, 0.0 }
 0x19b   :  { %v1548_v57 = vmax.f32 %v1518_v35, %v1519_v44  ;;  %v1521_v51 = vmax.f32 %v1489_v45, 0.0 }
 0x19d   :  { %1564 = vst [vmem:[#allocation2 + $0x10] sm:$0xff] %v1548_v57  ;;  %v1549_v52 = vmax.f32 %v1520_v56, %v1521_v51  ;;  %v1379_v2 = vpop.f32.mrb[8].mxu0 }
 0x19e   :  { %v1490_v21 = vadd.f32 %v7465_v25, %v1379_v2  ;;  %v1381_v17 = vpop.f32.mrb[9].mxu0 }
 0x19f   :  { %1565 = vst [vmem:[#allocation2 + $0x18] sm:$0xff] %v1549_v52  ;;  %v1491_v47 = vadd.f32 %v7468_v39, %v1381_v17  ;;  %v1383_v61 = vpop.f32.mrb[10].mxu0 }
 0x1a0   :  { %v1522_v22 = vmax.f32 %v1490_v21, 0.0  ;;  %v1492_v30 = vadd.f32 %v7465_v25, %v1383_v61  ;;  %v1385_v48 = vpop.f32.mrb[11].mxu0 }
 0x1a1   :  { %v1523_v62 = vmax.f32 %v1491_v47, 0.0  ;;  %v1493_v9 = vadd.f32 %v7468_v39, %v1385_v48 }
 0x1a2   :  { %v1524_v38 = vmax.f32 %v1492_v30, 0.0 }
 0x1a3   :  { %v1550_v31 = vmax.f32 %v1522_v22, %v1523_v62  ;;  %v1525_v59 = vmax.f32 %v1493_v9, 0.0 }
 0x1a5   :  { %1566 = vst [vmem:[#allocation2 + $0x20] sm:$0xff] %v1550_v31  ;;  %v1551_v58 = vmax.f32 %v1524_v38, %v1525_v59  ;;  %v1389_v1 = vpop.f32.mrb[12].mxu0 }
 0x1a6   :  { %v1494_v20 = vadd.f32 %v7465_v25, %v1389_v1  ;;  %v1391_v18 = vpop.f32.mrb[13].mxu0 }
 0x1a7   :  { %1567 = vst [vmem:[#allocation2 + $0x28] sm:$0xff] %v1551_v58  ;;  %v1495_v40 = vadd.f32 %v7468_v39, %v1391_v18  ;;  %v1393_v16 = vpop.f32.mrb[14].mxu0 }
 0x1a8   :  { %v1526_v19 = vmax.f32 %v1494_v20, 0.0  ;;  %v1496_v14 = vadd.f32 %v7465_v25, %v1393_v16  ;;  %v1395_v27 = vpop.f32.mrb[15].mxu0 }
 0x1a9   :  { %v1527_v29 = vmax.f32 %v1495_v40, 0.0  ;;  %v1497_v24 = vadd.f32 %v7468_v39, %v1395_v27 }
 0x1aa   :  { %v1528_v5 = vmax.f32 %v1496_v14, 0.0 }
 0x1ab   :  { %v1552_v34 = vmax.f32 %v1526_v19, %v1527_v29  ;;  %v1529_v63 = vmax.f32 %v1497_v24, 0.0 }
 0x1ad   :  { %1568 = vst [vmem:[#allocation2 + $0x30] sm:$0xff] %v1552_v34  ;;  %v1553_v54 = vmax.f32 %v1528_v5, %v1529_v63  ;;  %v1399_v8 = vpop.f32.mrb[16].mxu0 }
 0x1ae   :  { %v1498_v11 = vadd.f32 %v7465_v25, %v1399_v8  ;;  %v1401_v55 = vpop.f32.mrb[17].mxu0  ;;  %v1603_v8 = vld [vmem:[#allocation2 + $0x3] ss:$16 sm:$0x3] }
 0x1af   :  { %1569 = vst [vmem:[#allocation2 + $0x38] sm:$0xff] %v1553_v54  ;;  %v1499_v6 = vadd.f32 %v7468_v39, %v1401_v55  ;;  %v1403_v49 = vpop.f32.mrb[18].mxu0  ;;  %v1595_v54 = vld [vmem:[#allocation2 + $0x2] ss:$16 sm:$0x3] }
 0x1b0   :  { %v1530_v7 = vmax.f32 %v1498_v11, 0.0  ;;  %v1500_v36 = vadd.f32 %v7465_v25, %v1403_v49  ;;  %v1405_v28 = vpop.f32.mrb[19].mxu0  ;;  %v1586_v49 = vld [vmem:[#allocation2 + $0x1] ss:$16 sm:$0x3] }
 0x1b1   :  { %v1531_v32 = vmax.f32 %v1499_v6, 0.0  ;;  %v1501_v53 = vadd.f32 %v7468_v39, %v1405_v28  ;;  %v1578_v6 = vld [vmem:[#allocation2] ss:$16 sm:$0x3] }
 0x1b2   :  { %v1532_v4 = vmax.f32 %v1500_v36, 0.0 }
 0x1b3   :  { %v1554_v0 = vmax.f32 %v1530_v7, %v1531_v32  ;;  %v1533_v60 = vmax.f32 %v1501_v53, 0.0  ;;  %v1629_v32 = vld [vmem:[#allocation2 + $0x6] ss:$16 sm:$0x3] }
 0x1b4   :  { %v1596_v5 = vld [vmem:[#allocation2 + $0x2] ss:$16 sm:$0xc]  ;;  %v1604_v63 = vld [vmem:[#allocation2 + $0x3] ss:$16 sm:$0xc] }
 0x1b5   :  { %1570 = vst [vmem:[#allocation2 + $0x40] sm:$0xff] %v1554_v0  ;;  %v1555_v10 = vmax.f32 %v1532_v4, %v1533_v60  ;;  %v1409_v3 = vpop.f32.mrb[20].mxu0  ;;  %v1579_v11 = vld [vmem:[#allocation2] ss:$16 sm:$0xc]  ;;  %v1597_v53 = vor.u32 %v1596_v5, %v1595_v54  ;;  %v1605_v4 = vor.u32 %v1604_v63, %v1603_v8 }
 0x1b6   :  { %v1502_v42 = vadd.f32 %v7465_v25, %v1409_v3  ;;  %v1411_v23 = vpop.f32.mrb[21].mxu0  ;;  %v1587_v55 = vld [vmem:[#allocation2 + $0x1] ss:$16 sm:$0xc]  ;;  %v6005_v5 = vld [vmem:[%s8503_s3 + $0x2f8] ss:$20 sps:$4 sm:$0xff]  }
 0x1b7   :  { %1571 = vst [vmem:[#allocation2 + $0x48] sm:$0xff] %v1555_v10  ;;  %v1503_v12 = vadd.f32 %v7468_v39, %v1411_v23  ;;  %v1413_v13 = vpop.f32.mrb[22].mxu0  ;;  %v1630_v7 = vld [vmem:[#allocation2 + $0x6] ss:$16 sm:$0xc]  ;;  %v1580_v10 = vor.u32 %v1579_v11, %v1578_v6  ;;  %v1588_v3 = vor.u32 %v1587_v55, %v1586_v49 }
 0x1b8   :  { %v1534_v26 = vmax.f32 %v1502_v42, 0.0  ;;  %v1504_v37 = vadd.f32 %v7465_v25, %v1413_v13  ;;  %v1415_v33 = vpop.f32.mrb[23].mxu0  ;;  %v6013_v63 = vld [vmem:[%s8503_s3 + $0x324] ss:$20 sps:$4 sm:$0xff]   ;;  %v6016_v54 = vld [vmem:[%s8503_s3 + $0x32c] ss:$20 sps:$4 sm:$0xff]  }
 0x1b9   :  { %v1535_v35 = vmax.f32 %v1503_v12, 0.0  ;;  %v1505_v41 = vadd.f32 %v7468_v39, %v1415_v33  ;;  %v6011_v8 = vld [vmem:[%s8503_s3 + $0x320] ss:$20 sps:$4 sm:$0xff]   ;;  %v6014_v11 = vld [vmem:[%s8503_s3 + $0x328] ss:$20 sps:$4 sm:$0xff]  }
 0x1ba   :  { %v1536_v46 = vmax.f32 %v1504_v37, 0.0  ;;  %v6019_v55 = vld [vmem:[%s8503_s3 + $0x34c] ss:$20 sps:$4 sm:$0xff]   ;;  %v6022_v6 = vld [vmem:[%s8503_s3 + $0x354] ss:$20 sps:$4 sm:$0xff]  }
 0x1bb   :  { %v1556_v44 = vmax.f32 %v1534_v26, %v1535_v35  ;;  %v1537_v45 = vmax.f32 %v1505_v41, 0.0  ;;  %v1631_v26 = vor.u32 %v1630_v7, %v1629_v32  ;;  %v6017_v49 = vld [vmem:[%s8503_s3 + $0x348] ss:$20 sps:$4 sm:$0xff]   ;;  %v6020_v7 = vld [vmem:[%s8503_s3 + $0x350] ss:$20 sps:$4 sm:$0xff]  }
 0x1bc   :  { %v6026_v32 = vld [vmem:[%s8503_s3 + $0x378] ss:$20 sps:$4 sm:$0xff]  }
 0x1bd   :  { %1572 = vst [vmem:[#allocation2 + $0x50] sm:$0xff] %v1556_v44  ;;  %v1557_v56 = vmax.f32 %v1536_v46, %v1537_v45  ;;  %v1419_v57 = vpop.f32.mrb[24].mxu0 }
 0x1be   :  { %v1506_v51 = vadd.f32 %v7465_v25, %v1419_v57  ;;  %v1421_v52 = vpop.f32.mrb[25].mxu0 }
 0x1bf   :  { %1573 = vst [vmem:[#allocation2 + $0x58] sm:$0xff] %v1557_v56  ;;  %v1507_v2 = vadd.f32 %v7468_v39, %v1421_v52  ;;  %v1423_v21 = vpop.f32.mrb[26].mxu0 }
 0x1c0   :  { %v1538_v17 = vmax.f32 %v1506_v51, 0.0  ;;  %v1508_v47 = vadd.f32 %v7465_v25, %v1423_v21  ;;  %v1425_v61 = vpop.f32.mrb[27].mxu0 }
 0x1c1   :  { %v1539_v22 = vmax.f32 %v1507_v2, 0.0  ;;  %v1509_v30 = vadd.f32 %v7468_v39, %v1425_v61 }
 0x1c2   :  { %v1540_v48 = vmax.f32 %v1508_v47, 0.0 }
 0x1c3   :  { %v1558_v62 = vmax.f32 %v1538_v17, %v1539_v22  ;;  %v1541_v9 = vmax.f32 %v1509_v30, 0.0 }
 0x1c4   :  { %v1598_v36 = vld [vmem:[#allocation2 + $0x2] ss:$16 sm:$0x30]  ;;  %v1606_v28 = vld [vmem:[#allocation2 + $0x3] ss:$16 sm:$0x30] }
 0x1c5   :  { %1574 = vst [vmem:[#allocation2 + $0x60] sm:$0xff] %v1558_v62  ;;  %v1559_v38 = vmax.f32 %v1540_v48, %v1541_v9  ;;  %v1429_v31 = vpop.f32.mrb[28].mxu0  ;;  %v1581_v0 = vld [vmem:[#allocation2] ss:$16 sm:$0x30]  ;;  %v1599_v12 = vor.u32 %v1598_v36, %v1597_v53  ;;  %v1607_v13 = vor.u32 %v1606_v28, %v1605_v4 }
 0x1c6   :  { %v1510_v59 = vadd.f32 %v7465_v25, %v1429_v31  ;;  %v1431_v58 = vpop.f32.mrb[29].mxu0  ;;  %v1589_v60 = vld [vmem:[#allocation2 + $0x1] ss:$16 sm:$0x30]  ;;  %v1582_v41 = vor.u32 %v1581_v0, %v1580_v10  ;;  %v6034_v53 = vld [vmem:[%s8503_s3 + $0x3a4] ss:$20 sps:$4 sm:$0xff]  }
 0x1c7   :  { %1575 = vst [vmem:[#allocation2 + $0x68] sm:$0xff] %v1559_v38  ;;  %v1511_v1 = vadd.f32 %v7468_v39, %v1431_v58  ;;  %v1433_v20 = vpop.f32.mrb[30].mxu0  ;;  %v1632_v42 = vld [vmem:[#allocation2 + $0x6] ss:$16 sm:$0x30]  ;;  %v1590_v46 = vor.u32 %v1589_v60, %v1588_v3 }
 0x1c8   :  { %v1542_v18 = vmax.f32 %v1510_v59, 0.0  ;;  %v1512_v40 = vadd.f32 %v7465_v25, %v1433_v20  ;;  %v1435_v16 = vpop.f32.mrb[31].mxu0  ;;  %v1638_v25 = vld [vmem:[#allocation2 + $0x7] ss:$16 sm:$0xc]  ;;  %v1633_v51 = vor.u32 %v1632_v42, %v1631_v26 }
 0x1c9   :  { %v1543_v19 = vmax.f32 %v1511_v1, 0.0  ;;  %v1513_v14 = vadd.f32 %v7468_v39, %v1435_v16  ;;  %v1637_v39 = vld [vmem:[#allocation2 + $0x7] ss:$16 sm:$0x3]  ;;  %v5990_v38 = vld [vmem:[%s8503_s3 + $0x288] ss:$20 sps:$4 sm:$0xff]  }
 0x1ca   :  { %v1544_v27 = vmax.f32 %v1512_v40, 0.0  ;;  %v1640_v23 = vld [vmem:[#allocation2 + $0x7] ss:$16 sm:$0x30]  ;;  %v1639_v37 = vor.u32 %v1638_v25, %v1637_v39  ;;  %v5995_v58 = vld [vmem:[%s8503_s3 + $0x2ac] ss:$20 sps:$4 sm:$0xff]  }
 0x1cb   :  { %v1560_v29 = vmax.f32 %v1542_v18, %v1543_v19  ;;  %v1545_v24 = vmax.f32 %v1513_v14, 0.0  ;;  %v5987_v9 = vld [vmem:[%s8503_s3 + $0x280] ss:$20 sps:$4 sm:$0xff]   ;;  %v5993_v18 = vld [vmem:[%s8503_s3 + $0x2a8] ss:$20 sps:$4 sm:$0xff]  }
 0x1cc   :  { %v1641_v52 = vor.u32 %v1640_v23, %v1639_v37  ;;  %v5998_v1 = vld [vmem:[%s8503_s3 + $0x2b4] ss:$20 sps:$4 sm:$0xff]   ;;  %v5996_v40 = vld [vmem:[%s8503_s3 + $0x2b0] ss:$20 sps:$4 sm:$0xff]   ;;  %v6029_v4 = vld [vmem:[%s8503_s3 + $0x398] ss:$20 sps:$4 sm:$0xff]  }
 0x1cd   :  { %1576 = vst [vmem:[#allocation2 + $0x70] sm:$0xff] %v1560_v29  ;;  %v1561_v34 = vmax.f32 %v1544_v27, %v1545_v24  ;;  %v6001_v16 = vld [vmem:[%s8503_s3 + $0x2d4] ss:$20 sps:$4 sm:$0xff]   ;;  %v6004_v19 = vld [vmem:[%s8503_s3 + $0x2dc] ss:$20 sps:$4 sm:$0xff]  }
 0x1ce   :  { %v5999_v14 = vld [vmem:[%s8503_s3 + $0x2d0] ss:$20 sps:$4 sm:$0xff]   ;;  %v6002_v27 = vld [vmem:[%s8503_s3 + $0x2d8] ss:$20 sps:$4 sm:$0xff]   ;;  %v6025_v25 = vld [vmem:[%s8503_s3 + $0x374] ss:$20 sps:$4 sm:$0xff]  }
 0x1cf   :  { %1577 = vst [vmem:[#allocation2 + $0x78] sm:$0xff] %v1561_v34  ;;  %v6007_v29 = vld [vmem:[%s8503_s3 + $0x2fc] ss:$20 sps:$4 sm:$0xff]   ;;  %v6010_v24 = vld [vmem:[%s8503_s3 + $0x304] ss:$20 sps:$4 sm:$0xff]  }
 0x1d0   :  { %v6008_v34 = vld [vmem:[%s8503_s3 + $0x300] ss:$20 sps:$4 sm:$0xff]   ;;  %v6028_v36 = vld [vmem:[%s8503_s3 + $0x37c] ss:$20 sps:$4 sm:$0xff]   ;;  %v6037_v60 = vld [vmem:[%s8503_s3 + $0x3c4] ss:$20 sps:$4 sm:$0xff]  }
 0x1d1   :  { %v6023_v28 = vld [vmem:[%s8503_s3 + $0x370] ss:$20 sps:$4 sm:$0xff]   ;;  %v6032_v0 = vld [vmem:[%s8503_s3 + $0x3a0] ss:$20 sps:$4 sm:$0xff]   ;;  %v6038_v42 = vld [vmem:[%s8503_s3 + $0x3c8] ss:$20 sps:$4 sm:$0xff]  }
 0x1d2   :  { %v6031_v39 = vld [vmem:[%s8503_s3 + $0x39c] ss:$20 sps:$4 sm:$0xff]   ;;  %v6040_v10 = vld [vmem:[%s8503_s3 + $0x3cc] ss:$20 sps:$4 sm:$0xff]   ;;  %v6049_v37 = vld [vmem:[%s8503_s3 + $0x414] ss:$20 sps:$4 sm:$0xff]  }
 0x1d3   :  { %v6035_v3 = vld [vmem:[%s8503_s3 + $0x3c0] ss:$20 sps:$4 sm:$0xff]   ;;  %v6044_v26 = vld [vmem:[%s8503_s3 + $0x3f0] ss:$20 sps:$4 sm:$0xff]  }
 0x1d4   :  { %v1600_v33 = vld [vmem:[#allocation2 + $0x2] ss:$16 sm:$0xc0]  ;;  %v1608_v35 = vld [vmem:[#allocation2 + $0x3] ss:$16 sm:$0xc0] }
 0x1d5   :  { %v1601_v44 = vor.u32 %v1600_v33, %v1599_v12  ;;  %v1609_v45 = vor.u32 %v1608_v35, %v1607_v13  ;;  %v1583_v56 = vld [vmem:[#allocation2] ss:$16 sm:$0xc0]  ;;  %v1591_v57 = vld [vmem:[#allocation2 + $0x1] ss:$16 sm:$0xc0] }
 0x1d6   :  { %v1584_v2 = vor.u32 %v1583_v56, %v1582_v41  ;;  %v1592_v21 = vor.u32 %v1591_v57, %v1590_v46  ;;  %v1634_v17 = vld [vmem:[#allocation2 + $0x6] ss:$16 sm:$0xc0]  ;;  %v1642_v47 = vld [vmem:[#allocation2 + $0x7] ss:$16 sm:$0xc0] }
 0x1d7   :  { %v1610_v61 = vmax.f32 %v1601_v44, %v1609_v45  ;;  %v1635_v22 = vor.u32 %v1634_v17, %v1633_v51  ;;  %v1643_v30 = vor.u32 %v1642_v47, %v1641_v52  ;;  %v6043_v23 = vld [vmem:[%s8503_s3 + $0x3ec] ss:$20 sps:$4 sm:$0xff]   ;;  %v6046_v12 = vld [vmem:[%s8503_s3 + $0x3f4] ss:$20 sps:$4 sm:$0xff]   ;;  %v6052_v33 = vld [vmem:[%s8503_s3 + $0x41c] ss:$20 sps:$4 sm:$0xff]  }
 0x1d8   :  { %v1593_v48 = vmax.f32 %v1584_v2, %v1592_v21  ;;  %v6041_v13 = vld [vmem:[%s8503_s3 + $0x3e8] ss:$20 sps:$4 sm:$0xff]   ;;  %v6047_v35 = vld [vmem:[%s8503_s3 + $0x410] ss:$20 sps:$4 sm:$0xff]   ;;  %v6050_v41 = vld [vmem:[%s8503_s3 + $0x418] ss:$20 sps:$4 sm:$0xff]  }
 0x1d9   :  { %v7502_v62 = vpack.c.bf16 %v1610_v61, %v1610_v61  ;;  %v1644_v31 = vmax.f32 %v1635_v22, %v1643_v30  ;;  %v6055_v46 = vld [vmem:[%s8503_s3 + $0x43c] ss:$20 sps:$4 sm:$0xff]   ;;  %v6058_v44 = vld [vmem:[%s8503_s3 + $0x444] ss:$20 sps:$4 sm:$0xff]   ;;  %v6056_v56 = vld [vmem:[%s8503_s3 + $0x440] ss:$20 sps:$4 sm:$0xff]  }
 0x1da   :  { %v7510_v59 = vpack.c.bf16 %v1593_v48, %v1593_v48  ;;  %v6053_v45 = vld [vmem:[%s8503_s3 + $0x438] ss:$20 sps:$4 sm:$0xff]   ;;  %v6059_v52 = vld [vmem:[%s8503_s3 + $0x460] ss:$20 sps:$4 sm:$0xff]   ;;  %v6062_v2 = vld [vmem:[%s8503_s3 + $0x468] ss:$20 sps:$4 sm:$0xff]  }
 0x1db   :  { %3828 = vmatprep.mubr.bf16.mxu1 %v7502_v62  ;;  %3992 = vmatprep.mubr.bf16.mxu0 %v7502_v62  ;;  %v7522_v20 = vpack.c.bf16 %v1644_v31, %v1644_v31  ;;  %v6061_v57 = vld [vmem:[%s8503_s3 + $0x464] ss:$20 sps:$4 sm:$0xff]   ;;  %v6064_v51 = vld [vmem:[%s8503_s3 + $0x46c] ss:$20 sps:$4 sm:$0xff]   ;;  %v6070_v17 = vld [vmem:[%s8503_s3 + $0x494] ss:$20 sps:$4 sm:$0xff]  }
 0x1dc   :  { %3829 = vmatmul.mubr.bf16.vlgmr.msra.gmra.mrb[0].mxu1 %v7510_v59  ;;  %3993 = vmatmul.mubr.bf16.vlgmr.msra.gmra.mrb[32].mxu0 %v7510_v59  ;;  %v6067_v21 = vld [vmem:[%s8503_s3 + $0x48c] ss:$20 sps:$4 sm:$0xff]   ;;  %v1613_v47 = vld [vmem:[#allocation2 + $0x4] ss:$16 sm:$0xc] }
 0x1dd   :  { %3838 = vmatpush1.bf16.msra.mxu1 %v5987_v9  ;;  %4002 = vmatpush1.bf16.msra.mxu0 %v5990_v38  ;;  %v1621_v61 = vld [vmem:[#allocation2 + $0x5] ss:$16 sm:$0xc]  ;;  %v1664_v22 = vld [vmem:[#allocation2 + $0xa] ss:$16 sm:$0xc] }
 0x1de   :  { %3869 = vmatprep.mubr.bf16.mxu1 %v7522_v20  ;;  %4033 = vmatprep.mubr.bf16.mxu0 %v7522_v20  ;;  %v1672_v30 = vld [vmem:[#allocation2 + $0xb] ss:$16 sm:$0xc]  ;;  %v6068_v9 = vld [vmem:[%s8503_s3 + $0x490] ss:$20 sps:$4 sm:$0xff]  }
 0x1df   :  { %3839 = vmatprep.subr.bf16.mxu1 %v5995_v58  ;;  %4003 = vmatprep.subr.bf16.mxu0 %v5998_v1  ;;  %v6065_v48 = vld [vmem:[%s8503_s3 + $0x488] ss:$20 sps:$4 sm:$0xff]   ;;  %v1612_v38 = vld [vmem:[#allocation2 + $0x4] ss:$16 sm:$0x3] }
 0x1e0   :  { %v1615_v31 = vld [vmem:[#allocation2 + $0x4] ss:$16 sm:$0x30]  ;;  %v1620_v58 = vld [vmem:[#allocation2 + $0x5] ss:$16 sm:$0x3] }
 0x1e1   :  { %3840 = vmatpush1.bf16.msra.mxu1 %v5993_v18  ;;  %4004 = vmatpush1.bf16.msra.mxu0 %v5996_v40  ;;  %v1623_v1 = vld [vmem:[#allocation2 + $0x5] ss:$16 sm:$0x30]  ;;  %v6076_v40 = vld [vmem:[%s8503_s3 + $0x4bc] ss:$20 sps:$4 sm:$0xff]  }
 0x1e2   :  { %3841 = vmatprep.subr.bf16.mxu1 %v6001_v16  ;;  %4005 = vmatprep.subr.bf16.mxu0 %v6004_v19  ;;  %v6073_v18 = vld [vmem:[%s8503_s3 + $0x4b4] ss:$20 sps:$4 sm:$0xff]  }
 0x1e3   :  { %v1663_v16 = vld [vmem:[#allocation2 + $0xa] ss:$16 sm:$0x3] }
 0x1e4   :  { %v1666_v19 = vld [vmem:[#allocation2 + $0xa] ss:$16 sm:$0x30] }
 0x1e5   :  { %3842 = vmatpush1.bf16.msra.mxu1 %v5999_v14  ;;  %4006 = vmatpush1.bf16.msra.mxu0 %v6002_v27  ;;  %v1671_v14 = vld [vmem:[#allocation2 + $0xb] ss:$16 sm:$0x3] }
 0x1e6   :  { %3843 = vmatprep.subr.bf16.mxu1 %v6007_v29  ;;  %4007 = vmatprep.subr.bf16.mxu0 %v6010_v24  ;;  %v1674_v27 = vld [vmem:[#allocation2 + $0xb] ss:$16 sm:$0x30]  ;;  %v1617_v29 = vld [vmem:[#allocation2 + $0x4] ss:$16 sm:$0xc0] }
 0x1e7   :  { %v1625_v24 = vld [vmem:[#allocation2 + $0x5] ss:$16 sm:$0xc0] }
 0x1e9   :  { %3844 = vmatpush1.bf16.msra.mxu1 %v6005_v5  ;;  %4008 = vmatpush1.bf16.msra.mxu0 %v6008_v34  ;;  %v1614_v5 = vor.u32 %v1613_v47, %v1612_v38  ;;  %v1622_v34 = vor.u32 %v1621_v61, %v1620_v58  ;;  %v6109_v47 = vld [vmem:[%s8503_s3 + $0x5a4] ss:$20 sps:$4 sm:$0xff]   ;;  %v6112_v61 = vld [vmem:[%s8503_s3 + $0x5ac] ss:$20 sps:$4 sm:$0xff]   ;;  %v6113_v38 = vld [vmem:[%s8503_s3 + $0x5c8] ss:$20 sps:$4 sm:$0xff]  }
 0x1ea   :  { %3845 = vmatprep.subr.bf16.mxu1 %v6013_v63  ;;  %4009 = vmatprep.subr.bf16.mxu0 %v6016_v54  ;;  %v1668_v63 = vld [vmem:[#allocation2 + $0xa] ss:$16 sm:$0xc0]  ;;  %v1676_v54 = vld [vmem:[#allocation2 + $0xb] ss:$16 sm:$0xc0] }
 0x1eb   :  { %v6121_v58 = vld [vmem:[%s8503_s3 + $0x5f4] ss:$20 sps:$4 sm:$0xff]  }
 0x1ed   :  { %3846 = vmatpush1.bf16.msra.mxu1 %v6011_v8  ;;  %4010 = vmatpush1.bf16.msra.mxu0 %v6014_v11  ;;  %v6071_v8 = vld [vmem:[%s8503_s3 + $0x4b0] ss:$20 sps:$4 sm:$0xff]   ;;  %v6074_v11 = vld [vmem:[%s8503_s3 + $0x4b8] ss:$20 sps:$4 sm:$0xff]  }
 0x1ee   :  { %3847 = vmatprep.subr.bf16.mxu1 %v6019_v55  ;;  %4011 = vmatprep.subr.bf16.mxu0 %v6022_v6  ;;  %v1665_v55 = vor.u32 %v1664_v22, %v1663_v16  ;;  %v1673_v6 = vor.u32 %v1672_v30, %v1671_v14  ;;  %v6107_v22 = vld [vmem:[%s8503_s3 + $0x5a0] ss:$20 sps:$4 sm:$0xff]   ;;  %v6110_v30 = vld [vmem:[%s8503_s3 + $0x5a8] ss:$20 sps:$4 sm:$0xff]   ;;  %v6125_v14 = vld [vmem:[%s8503_s3 + $0x618] ss:$20 sps:$4 sm:$0xff]  }
 0x1ef   :  { %v6127_v16 = vld [vmem:[%s8503_s3 + $0x61c] ss:$20 sps:$4 sm:$0xff]  }
 0x1f1   :  { %3848 = vmatpush1.bf16.msra.mxu1 %v6017_v49  ;;  %4012 = vmatpush1.bf16.msra.mxu0 %v6020_v7  ;;  %v1616_v49 = vor.u32 %v1615_v31, %v1614_v5  ;;  %v1624_v7 = vor.u32 %v1623_v1, %v1622_v34  ;;  %v6116_v31 = vld [vmem:[%s8503_s3 + $0x5d0] ss:$20 sps:$4 sm:$0xff]   ;;  %v6131_v5 = vld [vmem:[%s8503_s3 + $0x640] ss:$20 sps:$4 sm:$0xff]   ;;  %v6134_v34 = vld [vmem:[%s8503_s3 + $0x648] ss:$20 sps:$4 sm:$0xff]  }
 0x1f2   :  { %3849 = vmatprep.subr.bf16.mxu1 %v6025_v25  ;;  %4013 = vmatprep.subr.bf16.mxu0 %v6028_v36  ;;  %v1667_v25 = vor.u32 %v1666_v19, %v1665_v55  ;;  %v1675_v36 = vor.u32 %v1674_v27, %v1673_v6  ;;  %v6124_v1 = vld [vmem:[%s8503_s3 + $0x5fc] ss:$20 sps:$4 sm:$0xff]   ;;  %v6130_v19 = vld [vmem:[%s8503_s3 + $0x624] ss:$20 sps:$4 sm:$0xff]   ;;  %v6128_v27 = vld [vmem:[%s8503_s3 + $0x620] ss:$20 sps:$4 sm:$0xff]  }
 0x1f3   :  { %v6145_v55 = vld [vmem:[%s8503_s3 + $0x694] ss:$20 sps:$4 sm:$0xff]   ;;  %v6148_v6 = vld [vmem:[%s8503_s3 + $0x69c] ss:$20 sps:$4 sm:$0xff]  }
 0x1f5   :  { %3850 = vmatpush1.bf16.msra.mxu1 %v6023_v28  ;;  %4014 = vmatpush1.bf16.msra.mxu0 %v6026_v32  ;;  %v6079_v28 = vld [vmem:[%s8503_s3 + $0x4dc] ss:$20 sps:$4 sm:$0xff]   ;;  %v6082_v32 = vld [vmem:[%s8503_s3 + $0x4e4] ss:$20 sps:$4 sm:$0xff]  }
 0x1f6   :  { %3851 = vmatprep.subr.bf16.mxu1 %v6031_v39  ;;  %4015 = vmatprep.subr.bf16.mxu0 %v6034_v53  ;;  %v1618_v39 = vor.u32 %v1617_v29, %v1616_v49  ;;  %v1626_v53 = vor.u32 %v1625_v24, %v1624_v7  ;;  %v6133_v29 = vld [vmem:[%s8503_s3 + $0x644] ss:$20 sps:$4 sm:$0xff]   ;;  %v6136_v24 = vld [vmem:[%s8503_s3 + $0x64c] ss:$20 sps:$4 sm:$0xff]  }
 0x1f7   :  { %v6143_v49 = vld [vmem:[%s8503_s3 + $0x690] ss:$20 sps:$4 sm:$0xff]   ;;  %v6146_v7 = vld [vmem:[%s8503_s3 + $0x698] ss:$20 sps:$4 sm:$0xff]  }
 0x1f9   :  { %3852 = vmatpush1.bf16.msra.mxu1 %v6029_v4  ;;  %4016 = vmatpush1.bf16.msra.mxu0 %v6032_v0  ;;  %v6077_v4 = vld [vmem:[%s8503_s3 + $0x4d8] ss:$20 sps:$4 sm:$0xff]   ;;  %v6080_v0 = vld [vmem:[%s8503_s3 + $0x4e0] ss:$20 sps:$4 sm:$0xff]  }
 0x1fa   :  { %3853 = vmatprep.subr.bf16.mxu1 %v6037_v60  ;;  %4017 = vmatprep.subr.bf16.mxu0 %v6040_v10  ;;  %v1669_v60 = vor.u32 %v1668_v63, %v1667_v25  ;;  %v1677_v10 = vor.u32 %v1676_v54, %v1675_v36  ;;  %v6139_v63 = vld [vmem:[%s8503_s3 + $0x66c] ss:$20 sps:$4 sm:$0xff]   ;;  %v6142_v54 = vld [vmem:[%s8503_s3 + $0x674] ss:$20 sps:$4 sm:$0xff]   ;;  %v6151_v25 = vld [vmem:[%s8503_s3 + $0x6bc] ss:$20 sps:$4 sm:$0xff]  }
 0x1fb   :  { %v6154_v36 = vld [vmem:[%s8503_s3 + $0x6c4] ss:$20 sps:$4 sm:$0xff]  }
 0x1fd   :  { %3854 = vmatpush1.bf16.msra.mxu1 %v6035_v3  ;;  %4018 = vmatpush1.bf16.msra.mxu0 %v6038_v42  ;;  %v1627_v3 = vmax.f32 %v1618_v39, %v1626_v53  ;;  %v6085_v42 = vld [vmem:[%s8503_s3 + $0x504] ss:$20 sps:$4 sm:$0xff]   ;;  %v6160_v53 = vld [vmem:[%s8503_s3 + $0x6ec] ss:$20 sps:$4 sm:$0xff]  }
 0x1fe   :  { %3855 = vmatprep.subr.bf16.mxu1 %v6043_v23  ;;  %4019 = vmatprep.subr.bf16.mxu0 %v6046_v12  ;;  %v6088_v23 = vld [vmem:[%s8503_s3 + $0x50c] ss:$20 sps:$4 sm:$0xff]   ;;  %v6157_v39 = vld [vmem:[%s8503_s3 + $0x6e4] ss:$20 sps:$4 sm:$0xff]  }
 0x1ff   :  { %v6083_v12 = vld [vmem:[%s8503_s3 + $0x500] ss:$20 sps:$4 sm:$0xff]  }
 0x201   :  { %3856 = vmatpush1.bf16.msra.mxu1 %v6041_v13  ;;  %4020 = vmatpush1.bf16.msra.mxu0 %v6044_v26  ;;  %v1678_v13 = vmax.f32 %v1669_v60, %v1677_v10  ;;  %v6086_v26 = vld [vmem:[%s8503_s3 + $0x508] ss:$20 sps:$4 sm:$0xff]  }
 0x202   :  { %3857 = vmatprep.subr.bf16.mxu1 %v6049_v37  ;;  %4021 = vmatprep.subr.bf16.mxu0 %v6052_v33  ;;  %v6091_v37 = vld [vmem:[%s8503_s3 + $0x52c] ss:$20 sps:$4 sm:$0xff]   ;;  %v6094_v33 = vld [vmem:[%s8503_s3 + $0x534] ss:$20 sps:$4 sm:$0xff]  }
 0x203   :  { %v1655_v60 = vld [vmem:[#allocation2 + $0x9] ss:$16 sm:$0xc] }
 0x204   :  { %v6158_v10 = vld [vmem:[%s8503_s3 + $0x6e8] ss:$20 sps:$4 sm:$0xff]  }
 0x205   :  { %3858 = vmatpush1.bf16.msra.mxu1 %v6047_v35  ;;  %4022 = vmatpush1.bf16.msra.mxu0 %v6050_v41  ;;  %v7718_v35 = vpack.c.bf16 %v1627_v3, %v1627_v3  ;;  %v7720_v41 = vpack.c.bf16 %v1678_v13, %v1678_v13  ;;  %v6163_v3 = vld [vmem:[%s8503_s3 + $0x70c] ss:$20 sps:$4 sm:$0xff]   ;;  %v1649_v13 = vld [vmem:[#allocation2 + $0x8] ss:$16 sm:$0x30] }
 0x206   :  { %3859 = vmatprep.subr.bf16.mxu1 %v6055_v46  ;;  %4023 = vmatprep.subr.bf16.mxu0 %v6058_v44  ;;  %v6089_v46 = vld [vmem:[%s8503_s3 + $0x528] ss:$20 sps:$4 sm:$0xff]   ;;  %v6092_v44 = vld [vmem:[%s8503_s3 + $0x530] ss:$20 sps:$4 sm:$0xff]  }
 0x209   :  { %3860 = vmatpush1.bf16.msra.mxu1 %v6053_v45  ;;  %4024 = vmatpush1.bf16.msra.mxu0 %v6056_v56  ;;  %v6097_v45 = vld [vmem:[%s8503_s3 + $0x554] ss:$20 sps:$4 sm:$0xff]   ;;  %v6100_v56 = vld [vmem:[%s8503_s3 + $0x55c] ss:$20 sps:$4 sm:$0xff]  }
 0x20a   :  { %3861 = vmatprep.subr.bf16.mxu1 %v6061_v57  ;;  %4025 = vmatprep.subr.bf16.mxu0 %v6064_v51  ;;  %v6095_v57 = vld [vmem:[%s8503_s3 + $0x550] ss:$20 sps:$4 sm:$0xff]   ;;  %v6098_v51 = vld [vmem:[%s8503_s3 + $0x558] ss:$20 sps:$4 sm:$0xff]  }
 0x20d   :  { %3862 = vmatpush1.bf16.msra.mxu1 %v6059_v52  ;;  %4026 = vmatpush1.bf16.msra.mxu0 %v6062_v2  ;;  %v6103_v52 = vld [vmem:[%s8503_s3 + $0x57c] ss:$20 sps:$4 sm:$0xff]   ;;  %v6106_v2 = vld [vmem:[%s8503_s3 + $0x584] ss:$20 sps:$4 sm:$0xff]  }
 0x20e   :  { %3863 = vmatprep.subr.bf16.mxu1 %v6067_v21  ;;  %4027 = vmatprep.subr.bf16.mxu0 %v6070_v17  ;;  %v6101_v21 = vld [vmem:[%s8503_s3 + $0x578] ss:$20 sps:$4 sm:$0xff]   ;;  %v6104_v17 = vld [vmem:[%s8503_s3 + $0x580] ss:$20 sps:$4 sm:$0xff]  }
 0x211   :  { %3864 = vmatpush1.bf16.msra.mxu1 %v6065_v48  ;;  %4028 = vmatpush1.bf16.msra.mxu0 %v6068_v9  ;;  %v6115_v48 = vld [vmem:[%s8503_s3 + $0x5cc] ss:$20 sps:$4 sm:$0xff]   ;;  %v6118_v9 = vld [vmem:[%s8503_s3 + $0x5d4] ss:$20 sps:$4 sm:$0xff]  }
 0x212   :  { %3865 = vmatprep.subr.bf16.mxu1 %v6073_v18  ;;  %4029 = vmatprep.subr.bf16.mxu0 %v6076_v40  ;;  %v6119_v18 = vld [vmem:[%s8503_s3 + $0x5f0] ss:$20 sps:$4 sm:$0xff]   ;;  %v6122_v40 = vld [vmem:[%s8503_s3 + $0x5f8] ss:$20 sps:$4 sm:$0xff]  }
 0x215   :  { %3866 = vmatpush1.bf16.msra.mxu1 %v6071_v8  ;;  %4030 = vmatpush1.bf16.msra.mxu0 %v6074_v11  ;;  %v6137_v8 = vld [vmem:[%s8503_s3 + $0x668] ss:$20 sps:$4 sm:$0xff]   ;;  %v6140_v11 = vld [vmem:[%s8503_s3 + $0x670] ss:$20 sps:$4 sm:$0xff]  }
 0x216   :  { %3867 = vmatprep.subr.bf16.mxu1 %v6079_v28  ;;  %4031 = vmatprep.subr.bf16.mxu0 %v6082_v32  ;;  %v6149_v28 = vld [vmem:[%s8503_s3 + $0x6b8] ss:$20 sps:$4 sm:$0xff]   ;;  %v6152_v32 = vld [vmem:[%s8503_s3 + $0x6c0] ss:$20 sps:$4 sm:$0xff]  }
 0x219   :  { %3868 = vmatpush1.bf16.msra.mxu1 %v6077_v4  ;;  %4032 = vmatpush1.bf16.msra.mxu0 %v6080_v0  ;;  %v6155_v4 = vld [vmem:[%s8503_s3 + $0x6e0] ss:$20 sps:$4 sm:$0xff]   ;;  %v1647_v0 = vld [vmem:[#allocation2 + $0x8] ss:$16 sm:$0xc] }
 0x21a   :  { %3878 = vmatprep.subr.bf16.mxu1 %v6085_v42  ;;  %4042 = vmatprep.subr.bf16.mxu0 %v6088_v23  ;;  %v6166_v42 = vld [vmem:[%s8503_s3 + $0x714] ss:$20 sps:$4 sm:$0xff]  }
 0x21b   :  { %v6161_v23 = vld [vmem:[%s8503_s3 + $0x708] ss:$20 sps:$4 sm:$0xff]  }
 0x21c   :  { %3870 = vmatmul.mubr.bf16.vlgmr.msra.gmra.mrb[0].mxu1 %v7718_v35  ;;  %4034 = vmatmul.mubr.bf16.vlgmr.msra.gmra.mrb[32].mxu0 %v7718_v35 }
 0x21d   :  { %3879 = vmatpush1.bf16.msra.mxu1 %v6083_v12  ;;  %3910 = vmatprep.mubr.bf16.mxu1 %v7720_v41  ;;  %v1646_v12 = vld [vmem:[#allocation2 + $0x8] ss:$16 sm:$0x3] }
 0x21e   :  { %4043 = vmatpush1.bf16.msra.mxu0 %v6086_v26  ;;  %4074 = vmatprep.mubr.bf16.mxu0 %v7720_v41  ;;  %v1654_v26 = vld [vmem:[#allocation2 + $0x9] ss:$16 sm:$0x3] }
 0x21f   :  { %3880 = vmatprep.subr.bf16.mxu1 %v6091_v37  ;;  %4044 = vmatprep.subr.bf16.mxu0 %v6094_v33  ;;  %v1657_v37 = vld [vmem:[#allocation2 + $0x9] ss:$16 sm:$0x30]  ;;  %v1698_v33 = vld [vmem:[#allocation2 + $0xe] ss:$16 sm:$0xc] }
 0x221   :  { %3881 = vmatpush1.bf16.msra.mxu1 %v6089_v46  ;;  %v6164_v46 = vld [vmem:[%s8503_s3 + $0x710] ss:$20 sps:$4 sm:$0xff]  }
 0x222   :  { %4045 = vmatpush1.bf16.msra.mxu0 %v6092_v44  ;;  %3882 = vmatprep.subr.bf16.mxu1 %v6097_v45  ;;  %v6169_v44 = vld [vmem:[%s8503_s3 + $0x734] ss:$20 sps:$4 sm:$0xff]   ;;  %v1697_v45 = vld [vmem:[#allocation2 + $0xe] ss:$16 sm:$0x3] }
 0x223   :  { %4046 = vmatprep.subr.bf16.mxu0 %v6100_v56  ;;  %v1700_v56 = vld [vmem:[#allocation2 + $0xe] ss:$16 sm:$0x30] }
 0x225   :  { %3883 = vmatpush1.bf16.msra.mxu1 %v6095_v57  ;;  %v6172_v57 = vld [vmem:[%s8503_s3 + $0x73c] ss:$20 sps:$4 sm:$0xff]  }
 0x226   :  { %4047 = vmatpush1.bf16.msra.mxu0 %v6098_v51  ;;  %3884 = vmatprep.subr.bf16.mxu1 %v6103_v52  ;;  %v1706_v51 = vld [vmem:[#allocation2 + $0xf] ss:$16 sm:$0xc]  ;;  %v1648_v52 = vor.u32 %v1647_v0, %v1646_v12 }
 0x227   :  { %4048 = vmatprep.subr.bf16.mxu0 %v6106_v2  ;;  %v1651_v2 = vld [vmem:[#allocation2 + $0x8] ss:$16 sm:$0xc0]  ;;  %v6208_v12 = vld [vmem:[%s8503_s3 + $0x82c] ss:$20 sps:$4 sm:$0xff]  }
 0x228   :  { %v6194_v0 = vld [vmem:[%s8503_s3 + $0x7d8] ss:$20 sps:$4 sm:$0xff]  }
 0x229   :  { %3885 = vmatpush1.bf16.msra.mxu1 %v6101_v21  ;;  %v1656_v21 = vor.u32 %v1655_v60, %v1654_v26  ;;  %v6199_v60 = vld [vmem:[%s8503_s3 + $0x7fc] ss:$20 sps:$4 sm:$0xff]  }
 0x22a   :  { %4049 = vmatpush1.bf16.msra.mxu0 %v6104_v17  ;;  %3886 = vmatprep.subr.bf16.mxu1 %v6109_v47  ;;  %v1705_v17 = vld [vmem:[#allocation2 + $0xf] ss:$16 sm:$0x3]  ;;  %v1659_v47 = vld [vmem:[#allocation2 + $0x9] ss:$16 sm:$0xc0] }
 0x22b   :  { %4050 = vmatprep.subr.bf16.mxu0 %v6112_v61  ;;  %v1699_v61 = vor.u32 %v1698_v33, %v1697_v45  ;;  %v6206_v26 = vld [vmem:[%s8503_s3 + $0x828] ss:$20 sps:$4 sm:$0xff]  }
 0x22c   :  { %v6214_v33 = vld [vmem:[%s8503_s3 + $0x854] ss:$20 sps:$4 sm:$0xff]  }
 0x22d   :  { %3887 = vmatpush1.bf16.msra.mxu1 %v6107_v22  ;;  %v1708_v22 = vld [vmem:[#allocation2 + $0xf] ss:$16 sm:$0x30]  ;;  %v6217_v45 = vld [vmem:[%s8503_s3 + $0x874] ss:$20 sps:$4 sm:$0xff]  }
 0x22e   :  { %4051 = vmatpush1.bf16.msra.mxu0 %v6110_v30  ;;  %3888 = vmatprep.subr.bf16.mxu1 %v6115_v48  ;;  %v6167_v30 = vld [vmem:[%s8503_s3 + $0x730] ss:$20 sps:$4 sm:$0xff]   ;;  %v1650_v48 = vor.u32 %v1649_v13, %v1648_v52  ;;  %v6203_v13 = vld [vmem:[%s8503_s3 + $0x820] ss:$20 sps:$4 sm:$0xff]  }
 0x22f   :  { %4052 = vmatprep.subr.bf16.mxu0 %v6118_v9  ;;  %v1658_v9 = vor.u32 %v1657_v37, %v1656_v21  ;;  %v6211_v37 = vld [vmem:[%s8503_s3 + $0x84c] ss:$20 sps:$4 sm:$0xff]   ;;  %v6223_v52 = vld [vmem:[%s8503_s3 + $0x89c] ss:$20 sps:$4 sm:$0xff]  }
 0x230   :  { %v6221_v21 = vld [vmem:[%s8503_s3 + $0x898] ss:$20 sps:$4 sm:$0xff]  }
 0x231   :  { %3889 = vmatpush1.bf16.msra.mxu1 %v6113_v38  ;;  %v1707_v38 = vor.u32 %v1706_v51, %v1705_v17  ;;  %v6218_v51 = vld [vmem:[%s8503_s3 + $0x878] ss:$20 sps:$4 sm:$0xff]   ;;  %v6224_v17 = vld [vmem:[%s8503_s3 + $0x8a0] ss:$20 sps:$4 sm:$0xff]  }
 0x232   :  { %4053 = vmatpush1.bf16.msra.mxu0 %v6116_v31  ;;  %3890 = vmatprep.subr.bf16.mxu1 %v6121_v58  ;;  %v1701_v31 = vor.u32 %v1700_v56, %v1699_v61  ;;  %v1702_v58 = vld [vmem:[#allocation2 + $0xe] ss:$16 sm:$0xc0] }
 0x233   :  { %4054 = vmatprep.subr.bf16.mxu0 %v6124_v1  ;;  %v1710_v1 = vld [vmem:[#allocation2 + $0xf] ss:$16 sm:$0xc0] }
 0x234   :  { %v6220_v56 = vld [vmem:[%s8503_s3 + $0x87c] ss:$20 sps:$4 sm:$0xff]   ;;  %v6232_v61 = vld [vmem:[%s8503_s3 + $0x8cc] ss:$20 sps:$4 sm:$0xff]  }
 0x235   :  { %3891 = vmatpush1.bf16.msra.mxu1 %v6119_v18  ;;  %v6170_v18 = vld [vmem:[%s8503_s3 + $0x738] ss:$20 sps:$4 sm:$0xff]  }
 0x236   :  { %4055 = vmatpush1.bf16.msra.mxu0 %v6122_v40  ;;  %3892 = vmatprep.subr.bf16.mxu1 %v6127_v16  ;;  %v6175_v40 = vld [vmem:[%s8503_s3 + $0x75c] ss:$20 sps:$4 sm:$0xff]   ;;  %v1652_v16 = vor.u32 %v1651_v2, %v1650_v48  ;;  %v6226_v2 = vld [vmem:[%s8503_s3 + $0x8a4] ss:$20 sps:$4 sm:$0xff]   ;;  %v6235_v48 = vld [vmem:[%s8503_s3 + $0x8ec] ss:$20 sps:$4 sm:$0xff]  }
 0x237   :  { %4056 = vmatprep.subr.bf16.mxu0 %v6130_v19  ;;  %v1660_v19 = vor.u32 %v1659_v47, %v1658_v9  ;;  %v6229_v47 = vld [vmem:[%s8503_s3 + $0x8c4] ss:$20 sps:$4 sm:$0xff]   ;;  %v6238_v9 = vld [vmem:[%s8503_s3 + $0x8f4] ss:$20 sps:$4 sm:$0xff]  }
 0x239   :  { %3893 = vmatpush1.bf16.msra.mxu1 %v6125_v14  ;;  %v1709_v14 = vor.u32 %v1708_v22, %v1707_v38  ;;  %v6227_v22 = vld [vmem:[%s8503_s3 + $0x8c0] ss:$20 sps:$4 sm:$0xff]   ;;  %v6233_v38 = vld [vmem:[%s8503_s3 + $0x8e8] ss:$20 sps:$4 sm:$0xff]  }
 0x23a   :  { %4057 = vmatpush1.bf16.msra.mxu0 %v6128_v27  ;;  %3894 = vmatprep.subr.bf16.mxu1 %v6133_v29  ;;  %v6178_v27 = vld [vmem:[%s8503_s3 + $0x764] ss:$20 sps:$4 sm:$0xff]   ;;  %v1703_v29 = vor.u32 %v1702_v58, %v1701_v31  ;;  %v6241_v58 = vld [vmem:[%s8503_s3 + $0x914] ss:$20 sps:$4 sm:$0xff]  }
 0x23b   :  { %4058 = vmatprep.subr.bf16.mxu0 %v6136_v24  ;;  %v1711_v24 = vor.u32 %v1710_v1, %v1709_v14  ;;  %v6236_v31 = vld [vmem:[%s8503_s3 + $0x8f0] ss:$20 sps:$4 sm:$0xff]   ;;  %v6245_v14 = vld [vmem:[%s8503_s3 + $0x938] ss:$20 sps:$4 sm:$0xff]  }
 0x23c   :  { %v6244_v1 = vld [vmem:[%s8503_s3 + $0x91c] ss:$20 sps:$4 sm:$0xff]  }
 0x23d   :  { %3895 = vmatpush1.bf16.msra.mxu1 %v6131_v5  ;;  %v6173_v5 = vld [vmem:[%s8503_s3 + $0x758] ss:$20 sps:$4 sm:$0xff]  }
 0x23e   :  { %4059 = vmatpush1.bf16.msra.mxu0 %v6134_v34  ;;  %3896 = vmatprep.subr.bf16.mxu1 %v6139_v63  ;;  %v6176_v34 = vld [vmem:[%s8503_s3 + $0x760] ss:$20 sps:$4 sm:$0xff]   ;;  %v1661_v63 = vmax.f32 %v1652_v16, %v1660_v19  ;;  %v6247_v16 = vld [vmem:[%s8503_s3 + $0x93c] ss:$20 sps:$4 sm:$0xff]   ;;  %v6250_v19 = vld [vmem:[%s8503_s3 + $0x944] ss:$20 sps:$4 sm:$0xff]  }
 0x23f   :  { %4060 = vmatprep.subr.bf16.mxu0 %v6142_v54  ;;  %v6181_v54 = vld [vmem:[%s8503_s3 + $0x784] ss:$20 sps:$4 sm:$0xff]  }
 0x241   :  { %3897 = vmatpush1.bf16.msra.mxu1 %v6137_v8  ;;  %v6184_v8 = vld [vmem:[%s8503_s3 + $0x78c] ss:$20 sps:$4 sm:$0xff]  }
 0x242   :  { %4061 = vmatpush1.bf16.msra.mxu0 %v6140_v11  ;;  %3898 = vmatprep.subr.bf16.mxu1 %v6145_v55  ;;  %v1712_v11 = vmax.f32 %v1703_v29, %v1711_v24  ;;  %v6179_v55 = vld [vmem:[%s8503_s3 + $0x780] ss:$20 sps:$4 sm:$0xff]   ;;  %v6253_v29 = vld [vmem:[%s8503_s3 + $0x964] ss:$20 sps:$4 sm:$0xff]  }
 0x243   :  { %4062 = vmatprep.subr.bf16.mxu0 %v6148_v6  ;;  %v7909_v6 = vpack.c.bf16 %v1661_v63, %v1661_v63  ;;  %v6256_v24 = vld [vmem:[%s8503_s3 + $0x96c] ss:$20 sps:$4 sm:$0xff]   ;;  %v6254_v63 = vld [vmem:[%s8503_s3 + $0x968] ss:$20 sps:$4 sm:$0xff]  }
 0x245   :  { %3899 = vmatpush1.bf16.msra.mxu1 %v6143_v49  ;;  %v6182_v49 = vld [vmem:[%s8503_s3 + $0x788] ss:$20 sps:$4 sm:$0xff]  }
 0x246   :  { %4063 = vmatpush1.bf16.msra.mxu0 %v6146_v7  ;;  %3900 = vmatprep.subr.bf16.mxu1 %v6151_v25  ;;  %v6187_v7 = vld [vmem:[%s8503_s3 + $0x7ac] ss:$20 sps:$4 sm:$0xff]   ;;  %v7918_v25 = vpack.c.bf16 %v1712_v11, %v1712_v11 }
 0x247   :  { %4064 = vmatprep.subr.bf16.mxu0 %v6154_v36  ;;  %v6190_v36 = vld [vmem:[%s8503_s3 + $0x7b4] ss:$20 sps:$4 sm:$0xff]   ;;  %v1680_v11 = vld [vmem:[#allocation2 + $0xc] ss:$16 sm:$0x3] }
 0x249   :  { %3901 = vmatpush1.bf16.msra.mxu1 %v6149_v28  ;;  %v6185_v28 = vld [vmem:[%s8503_s3 + $0x7a8] ss:$20 sps:$4 sm:$0xff]  }
 0x24a   :  { %4065 = vmatpush1.bf16.msra.mxu0 %v6152_v32  ;;  %3902 = vmatprep.subr.bf16.mxu1 %v6157_v39  ;;  %v6188_v32 = vld [vmem:[%s8503_s3 + $0x7b0] ss:$20 sps:$4 sm:$0xff]   ;;  %v6193_v39 = vld [vmem:[%s8503_s3 + $0x7d4] ss:$20 sps:$4 sm:$0xff]  }
 0x24b   :  { %4066 = vmatprep.subr.bf16.mxu0 %v6160_v53  ;;  %v6196_v53 = vld [vmem:[%s8503_s3 + $0x7dc] ss:$20 sps:$4 sm:$0xff]  }
 0x24d   :  { %3903 = vmatpush1.bf16.msra.mxu1 %v6155_v4  ;;  %v6191_v4 = vld [vmem:[%s8503_s3 + $0x7d0] ss:$20 sps:$4 sm:$0xff]  }
 0x24e   :  { %4067 = vmatpush1.bf16.msra.mxu0 %v6158_v10  ;;  %3904 = vmatprep.subr.bf16.mxu1 %v6163_v3  ;;  %v6202_v10 = vld [vmem:[%s8503_s3 + $0x804] ss:$20 sps:$4 sm:$0xff]  }
 0x24f   :  { %4068 = vmatprep.subr.bf16.mxu0 %v6166_v42  ;;  %v6197_v3 = vld [vmem:[%s8503_s3 + $0x7f8] ss:$20 sps:$4 sm:$0xff]   ;;  %v6200_v42 = vld [vmem:[%s8503_s3 + $0x800] ss:$20 sps:$4 sm:$0xff]  }
 0x251   :  { %3905 = vmatpush1.bf16.msra.mxu1 %v6161_v23  ;;  %v6205_v23 = vld [vmem:[%s8503_s3 + $0x824] ss:$20 sps:$4 sm:$0xff]  }
 0x252   :  { %4069 = vmatpush1.bf16.msra.mxu0 %v6164_v46  ;;  %3906 = vmatprep.subr.bf16.mxu1 %v6169_v44  ;;  %v6209_v46 = vld [vmem:[%s8503_s3 + $0x848] ss:$20 sps:$4 sm:$0xff]   ;;  %v6212_v44 = vld [vmem:[%s8503_s3 + $0x850] ss:$20 sps:$4 sm:$0xff]  }
 0x253   :  { %4070 = vmatprep.subr.bf16.mxu0 %v6172_v57  ;;  %v6215_v57 = vld [vmem:[%s8503_s3 + $0x870] ss:$20 sps:$4 sm:$0xff]  }
 0x255   :  { %3907 = vmatpush1.bf16.msra.mxu1 %v6167_v30  ;;  %v6230_v30 = vld [vmem:[%s8503_s3 + $0x8c8] ss:$20 sps:$4 sm:$0xff]  }
 0x256   :  { %4071 = vmatpush1.bf16.msra.mxu0 %v6170_v18  ;;  %3908 = vmatprep.subr.bf16.mxu1 %v6175_v40  ;;  %v6239_v18 = vld [vmem:[%s8503_s3 + $0x910] ss:$20 sps:$4 sm:$0xff]   ;;  %v6242_v40 = vld [vmem:[%s8503_s3 + $0x918] ss:$20 sps:$4 sm:$0xff]  }
 0x257   :  { %4072 = vmatprep.subr.bf16.mxu0 %v6178_v27  ;;  %v6248_v27 = vld [vmem:[%s8503_s3 + $0x940] ss:$20 sps:$4 sm:$0xff]  }
 0x259   :  { %3909 = vmatpush1.bf16.msra.mxu1 %v6173_v5  ;;  %v6251_v5 = vld [vmem:[%s8503_s3 + $0x960] ss:$20 sps:$4 sm:$0xff]  }
 0x25a   :  { %4073 = vmatpush1.bf16.msra.mxu0 %v6176_v34  ;;  %3919 = vmatprep.subr.bf16.mxu1 %v6181_v54  ;;  %v1681_v34 = vld [vmem:[#allocation2 + $0xc] ss:$16 sm:$0xc] }
 0x25b   :  { %4083 = vmatprep.subr.bf16.mxu0 %v6184_v8  ;;  %v6259_v54 = vld [vmem:[%s8503_s3 + $0x98c] ss:$20 sps:$4 sm:$0xff]   ;;  %v6262_v8 = vld [vmem:[%s8503_s3 + $0x994] ss:$20 sps:$4 sm:$0xff]  }
 0x25c   :  { %3911 = vmatmul.mubr.bf16.vlgmr.msra.gmra.mrb[0].mxu1 %v7909_v6 }
 0x25d   :  { %4075 = vmatmul.mubr.bf16.vlgmr.msra.gmra.mrb[32].mxu0 %v7909_v6  ;;  %3920 = vmatpush1.bf16.msra.mxu1 %v6179_v55  ;;  %v1689_v55 = vld [vmem:[#allocation2 + $0xd] ss:$16 sm:$0xc] }
 0x25e   :  { %3951 = vmatprep.mubr.bf16.mxu1 %v7918_v25  ;;  %4084 = vmatpush1.bf16.msra.mxu0 %v6182_v49  ;;  %v1683_v49 = vld [vmem:[#allocation2 + $0xc] ss:$16 sm:$0x30] }
 0x25f   :  { %4115 = vmatprep.mubr.bf16.mxu0 %v7918_v25  ;;  %3921 = vmatprep.subr.bf16.mxu1 %v6187_v7  ;;  %v1688_v7 = vld [vmem:[#allocation2 + $0xd] ss:$16 sm:$0x3] }
 0x260   :  { %4085 = vmatprep.subr.bf16.mxu0 %v6190_v36  ;;  %v6257_v36 = vld [vmem:[%s8503_s3 + $0x988] ss:$20 sps:$4 sm:$0xff]  }
 0x261   :  { %3922 = vmatpush1.bf16.msra.mxu1 %v6185_v28  ;;  %v1685_v28 = vld [vmem:[#allocation2 + $0xc] ss:$16 sm:$0xc0] }
 0x262   :  { %4086 = vmatpush1.bf16.msra.mxu0 %v6188_v32  ;;  %3923 = vmatprep.subr.bf16.mxu1 %v6193_v39  ;;  %v1691_v32 = vld [vmem:[#allocation2 + $0xd] ss:$16 sm:$0x30]  ;;  %v6260_v39 = vld [vmem:[%s8503_s3 + $0x990] ss:$20 sps:$4 sm:$0xff]  }
 0x263   :  { %4087 = vmatprep.subr.bf16.mxu0 %v6196_v53  ;;  %v6265_v53 = vld [vmem:[%s8503_s3 + $0x9b4] ss:$20 sps:$4 sm:$0xff]  }
 0x265   :  { %3924 = vmatpush1.bf16.msra.mxu1 %v6191_v4  ;;  %v1682_v4 = vor.u32 %v1681_v34, %v1680_v11  ;;  %v6303_v34 = vld [vmem:[%s8503_s3 + $0x4c0] ss:$20 sps:$4 sm:$0xff]   ;;  %v6307_v11 = vld [vmem:[%s8503_s3 + $0x650] ss:$20 sps:$4 sm:$0xff]  }
 0x266   :  { %4088 = vmatpush1.bf16.msra.mxu0 %v6194_v0  ;;  %3925 = vmatprep.subr.bf16.mxu1 %v6199_v60  ;;  %v1690_v0 = vor.u32 %v1689_v55, %v1688_v7  ;;  %v6268_v60 = vld [vmem:[%s8503_s3 + $0x9bc] ss:$20 sps:$4 sm:$0xff]   ;;  %v6310_v7 = vld [vmem:[%s8503_s3 + $0x538] ss:$20 sps:$4 sm:$0xff]  }
 0x267   :  { %4089 = vmatprep.subr.bf16.mxu0 %v6202_v10  ;;  %v1693_v10 = vld [vmem:[#allocation2 + $0xd] ss:$16 sm:$0xc0]  ;;  %v6308_v55 = vld [vmem:[%s8503_s3 + $0x510] ss:$20 sps:$4 sm:$0xff]  }
 0x269   :  { %3926 = vmatpush1.bf16.msra.mxu1 %v6197_v3  ;;  %v1684_v3 = vor.u32 %v1683_v49, %v1682_v4  ;;  %v6309_v49 = vld [vmem:[%s8503_s3 + $0x678] ss:$20 sps:$4 sm:$0xff]  }
 0x26a   :  { %4090 = vmatpush1.bf16.msra.mxu0 %v6200_v42  ;;  %3927 = vmatprep.subr.bf16.mxu1 %v6205_v23  ;;  %v1692_v42 = vor.u32 %v1691_v32, %v1690_v0  ;;  %v6263_v23 = vld [vmem:[%s8503_s3 + $0x9b0] ss:$20 sps:$4 sm:$0xff]   ;;  %v6318_v4 = vld [vmem:[%s8503_s3 + $0x5d8] ss:$20 sps:$4 sm:$0xff]   ;;  %v6319_v0 = vld [vmem:[%s8503_s3 + $0x740] ss:$20 sps:$4 sm:$0xff]  }
 0x26b   :  { %4091 = vmatprep.subr.bf16.mxu0 %v6208_v12  ;;  %v6266_v12 = vld [vmem:[%s8503_s3 + $0x9b8] ss:$20 sps:$4 sm:$0xff]   ;;  %v6315_v32 = vld [vmem:[%s8503_s3 + $0x6f0] ss:$20 sps:$4 sm:$0xff]  }
 0x26d   :  { %3928 = vmatpush1.bf16.msra.mxu1 %v6203_v13  ;;  %v6271_v13 = vld [vmem:[%s8503_s3 + $0x9dc] ss:$20 sps:$4 sm:$0xff]  }
 0x26e   :  { %4092 = vmatpush1.bf16.msra.mxu0 %v6206_v26  ;;  %3929 = vmatprep.subr.bf16.mxu1 %v6211_v37  ;;  %v1686_v26 = vor.u32 %v1685_v28, %v1684_v3  ;;  %v1694_v37 = vor.u32 %v1693_v10, %v1692_v42  ;;  %v6312_v28 = vld [vmem:[%s8503_s3 + $0x560] ss:$20 sps:$4 sm:$0xff]   ;;  %v6321_v10 = vld [vmem:[%s8503_s3 + $0x768] ss:$20 sps:$4 sm:$0xff]   ;;  %v6323_v42 = vld [vmem:[%s8503_s3 + $0x8d0] ss:$20 sps:$4 sm:$0xff]  }
 0x26f   :  { %4093 = vmatprep.subr.bf16.mxu0 %v6214_v33  ;;  %v6274_v33 = vld [vmem:[%s8503_s3 + $0x9e4] ss:$20 sps:$4 sm:$0xff]   ;;  %v6322_v3 = vld [vmem:[%s8503_s3 + $0x628] ss:$20 sps:$4 sm:$0xff]  }
 0x271   :  { %3930 = vmatpush1.bf16.msra.mxu1 %v6209_v46  ;;  %v6269_v46 = vld [vmem:[%s8503_s3 + $0x9d8] ss:$20 sps:$4 sm:$0xff]  }
 0x272   :  { %4094 = vmatpush1.bf16.msra.mxu0 %v6212_v44  ;;  %3931 = vmatprep.subr.bf16.mxu1 %v6217_v45  ;;  %v6272_v44 = vld [vmem:[%s8503_s3 + $0x9e0] ss:$20 sps:$4 sm:$0xff]   ;;  %v1695_v45 = vmax.f32 %v1686_v26, %v1694_v37 }
 0x273   :  { %4095 = vmatprep.subr.bf16.mxu0 %v6220_v56  ;;  %v6275_v56 = vld [vmem:[%s8503_s3 + $0x150] ss:$20 sps:$4 sm:$0xff]   ;;  %v6327_v26 = vld [vmem:[%s8503_s3 + $0x920] ss:$20 sps:$4 sm:$0xff]  }
 0x274   :  { %v6328_v37 = vld [vmem:[%s8503_s3 + $0x7e0] ss:$20 sps:$4 sm:$0xff]  }
 0x275   :  { %3932 = vmatpush1.bf16.msra.mxu1 %v6215_v57  ;;  %v6276_v57 = vld [vmem:[%s8503_s3 + $0x10] ss:$20 sps:$4 sm:$0xff]  }
 0x276   :  { %4096 = vmatpush1.bf16.msra.mxu0 %v6218_v51  ;;  %3933 = vmatprep.subr.bf16.mxu1 %v6223_v52  ;;  %v8106_v51 = vpack.c.bf16 %v1695_v45, %v1695_v45  ;;  %v6277_v52 = vld [vmem:[%s8503_s3 + $0x178] ss:$20 sps:$4 sm:$0xff]  }
 0x277   :  { %4097 = vmatprep.subr.bf16.mxu0 %v6226_v2  ;;  %v6278_v2 = vld [vmem:[%s8503_s3 + $0x38] ss:$20 sps:$4 sm:$0xff]  }
 0x278   :  { %v6334_v45 = vld [vmem:[%s8503_s3 + $0x858] ss:$20 sps:$4 sm:$0xff]  }
 0x279   :  { %3934 = vmatpush1.bf16.msra.mxu1 %v6221_v21  ;;  %v6279_v21 = vld [vmem:[%s8503_s3 + $0x1a0] ss:$20 sps:$4 sm:$0xff]  }
 0x27a   :  { %4098 = vmatpush1.bf16.msra.mxu0 %v6224_v17  ;;  %3935 = vmatprep.subr.bf16.mxu1 %v6229_v47  ;;  %v6280_v17 = vld [vmem:[%s8503_s3 + $0x60] ss:$20 sps:$4 sm:$0xff]   ;;  %v6281_v47 = vld [vmem:[%s8503_s3 + $0x1c8] ss:$20 sps:$4 sm:$0xff]  }
 0x27b   :  { %4099 = vmatprep.subr.bf16.mxu0 %v6232_v61  ;;  %v6283_v61 = vld [vmem:[%s8503_s3 + $0x1f0] ss:$20 sps:$4 sm:$0xff]  }
 0x27d   :  { %3936 = vmatpush1.bf16.msra.mxu1 %v6227_v22  ;;  %v6284_v22 = vld [vmem:[%s8503_s3 + $0xb0] ss:$20 sps:$4 sm:$0xff]  }
 0x27e   :  { %4100 = vmatpush1.bf16.msra.mxu0 %v6230_v30  ;;  %3937 = vmatprep.subr.bf16.mxu1 %v6235_v48  ;;  %v6285_v30 = vld [vmem:[%s8503_s3 + $0x218] ss:$20 sps:$4 sm:$0xff]  }
 0x27f   :  { %4101 = vmatprep.subr.bf16.mxu0 %v6238_v9  ;;  %v6286_v48 = vld [vmem:[%s8503_s3 + $0xd8] ss:$20 sps:$4 sm:$0xff]   ;;  %v6287_v9 = vld [vmem:[%s8503_s3 + $0x240] ss:$20 sps:$4 sm:$0xff]  }
 0x281   :  { %3938 = vmatpush1.bf16.msra.mxu1 %v6233_v38  ;;  %v6288_v38 = vld [vmem:[%s8503_s3 + $0x100] ss:$20 sps:$4 sm:$0xff]  }
 0x282   :  { %4102 = vmatpush1.bf16.msra.mxu0 %v6236_v31  ;;  %3939 = vmatprep.subr.bf16.mxu1 %v6241_v58  ;;  %v6289_v31 = vld [vmem:[%s8503_s3 + $0x268] ss:$20 sps:$4 sm:$0xff]  }
 0x283   :  { %4103 = vmatprep.subr.bf16.mxu0 %v6244_v1  ;;  %v6290_v58 = vld [vmem:[%s8503_s3 + $0x128] ss:$20 sps:$4 sm:$0xff]   ;;  %v6291_v1 = vld [vmem:[%s8503_s3 + $0x3d0] ss:$20 sps:$4 sm:$0xff]  }
 0x285   :  { %3940 = vmatpush1.bf16.msra.mxu1 %v6239_v18  ;;  %v6292_v18 = vld [vmem:[%s8503_s3 + $0x290] ss:$20 sps:$4 sm:$0xff]  }
 0x286   :  { %4104 = vmatpush1.bf16.msra.mxu0 %v6242_v40  ;;  %3941 = vmatprep.subr.bf16.mxu1 %v6247_v16  ;;  %v6293_v40 = vld [vmem:[%s8503_s3 + $0x3f8] ss:$20 sps:$4 sm:$0xff]  }
 0x287   :  { %4105 = vmatprep.subr.bf16.mxu0 %v6250_v19  ;;  %v6294_v16 = vld [vmem:[%s8503_s3 + $0x2b8] ss:$20 sps:$4 sm:$0xff]   ;;  %v6295_v19 = vld [vmem:[%s8503_s3 + $0x420] ss:$20 sps:$4 sm:$0xff]  }
 0x289   :  { %3942 = vmatpush1.bf16.msra.mxu1 %v6245_v14  ;;  %v6296_v14 = vld [vmem:[%s8503_s3 + $0x2e0] ss:$20 sps:$4 sm:$0xff]  }
 0x28a   :  { %4106 = vmatpush1.bf16.msra.mxu0 %v6248_v27  ;;  %3943 = vmatprep.subr.bf16.mxu1 %v6253_v29  ;;  %v6299_v27 = vld [vmem:[%s8503_s3 + $0x470] ss:$20 sps:$4 sm:$0xff]  }
 0x28b   :  { %4107 = vmatprep.subr.bf16.mxu0 %v6256_v24  ;;  %v6300_v29 = vld [vmem:[%s8503_s3 + $0x330] ss:$20 sps:$4 sm:$0xff]   ;;  %v6301_v24 = vld [vmem:[%s8503_s3 + $0x498] ss:$20 sps:$4 sm:$0xff]  }
 0x28d   :  { %3944 = vmatpush1.bf16.msra.mxu1 %v6251_v5  ;;  %v6302_v5 = vld [vmem:[%s8503_s3 + $0x358] ss:$20 sps:$4 sm:$0xff]  }
 0x28e   :  { %4108 = vmatpush1.bf16.msra.mxu0 %v6254_v63  ;;  %3945 = vmatprep.subr.bf16.mxu1 %v6259_v54  ;;  %v6304_v63 = vld [vmem:[%s8503_s3 + $0x380] ss:$20 sps:$4 sm:$0xff]   ;;  %v6305_v54 = vld [vmem:[%s8503_s3 + $0x4e8] ss:$20 sps:$4 sm:$0xff]  }
 0x28f   :  { %4109 = vmatprep.subr.bf16.mxu0 %v6262_v8  ;;  %v6306_v8 = vld [vmem:[%s8503_s3 + $0x3a8] ss:$20 sps:$4 sm:$0xff]  }
 0x291   :  { %3946 = vmatpush1.bf16.msra.mxu1 %v6257_v36  ;;  %v6311_v36 = vld [vmem:[%s8503_s3 + $0x6a0] ss:$20 sps:$4 sm:$0xff]  }
 0x292   :  { %4110 = vmatpush1.bf16.msra.mxu0 %v6260_v39  ;;  %3947 = vmatprep.subr.bf16.mxu1 %v6265_v53  ;;  %v6316_v39 = vld [vmem:[%s8503_s3 + $0x5b0] ss:$20 sps:$4 sm:$0xff]   ;;  %v6317_v53 = vld [vmem:[%s8503_s3 + $0x718] ss:$20 sps:$4 sm:$0xff]  }
 0x293   :  { %4111 = vmatprep.subr.bf16.mxu0 %v6268_v60  ;;  %v6320_v60 = vld [vmem:[%s8503_s3 + $0x600] ss:$20 sps:$4 sm:$0xff]  }
 0x295   :  { %3948 = vmatpush1.bf16.msra.mxu1 %v6263_v23  ;;  %v6324_v23 = vld [vmem:[%s8503_s3 + $0x790] ss:$20 sps:$4 sm:$0xff]  }
 0x296   :  { %4112 = vmatpush1.bf16.msra.mxu0 %v6266_v12  ;;  %3949 = vmatprep.subr.bf16.mxu1 %v6271_v13  ;;  %v6325_v12 = vld [vmem:[%s8503_s3 + $0x8f8] ss:$20 sps:$4 sm:$0xff]  }
 0x297   :  { %4113 = vmatprep.subr.bf16.mxu0 %v6274_v33  ;;  %v6326_v13 = vld [vmem:[%s8503_s3 + $0x7b8] ss:$20 sps:$4 sm:$0xff]   ;;  %v6331_v33 = vld [vmem:[%s8503_s3 + $0x970] ss:$20 sps:$4 sm:$0xff]  }
 0x299   :  { %3950 = vmatpush1.bf16.msra.mxu1 %v6269_v46  ;;  %v6332_v46 = vld [vmem:[%s8503_s3 + $0x830] ss:$20 sps:$4 sm:$0xff]  }
 0x29a   :  { %4114 = vmatpush1.bf16.msra.mxu0 %v6272_v44  ;;  %5496 = vmatprep.subr.bf16.mxu1 %v6275_v56  ;;  %v6333_v44 = vld [vmem:[%s8503_s3 + $0x998] ss:$20 sps:$4 sm:$0xff]   ;;  %v6335_v56 = vld [vmem:[%s8503_s3 + $0x9c0] ss:$20 sps:$4 sm:$0xff]  }
 0x29c   :  { %3952 = vmatmul.mubr.bf16.vlgmr.msra.gmra.mrb[0].mxu1 %v8106_v51 }
 0x29d   :  { %4116 = vmatmul.mubr.bf16.vlgmr.msra.gmra.mrb[32].mxu0 %v8106_v51  ;;  %5497 = vmatpush3.bf16.msra.mxu1 %v6276_v57  ;;  %v6336_v57 = vld [vmem:[%s8503_s3 + $0x880] ss:$20 sps:$4 sm:$0xff]  }
 0x29e   :  { %4156 = vmatprep.mubr.bf16.mxu1 %v7502_v62  ;;  %5498 = vmatprep.subr.bf16.mxu1 %v6277_v52  ;;  %v6282_v62 = vld [vmem:[%s8503_s3 + $0x88] ss:$20 sps:$4 sm:$0xff]  }
 0x29f   :  { %v6337_v52 = vld [vmem:[%s8503_s3 + $0x9e8] ss:$20 sps:$4 sm:$0xff]  }
 0x2a1   :  { %5499 = vmatpush3.bf16.msra.mxu1 %v6278_v2  ;;  %v6338_v2 = vld [vmem:[%s8503_s3 + $0x8a8] ss:$20 sps:$4 sm:$0xff]  }
 0x2a2   :  { %5500 = vmatprep.subr.bf16.mxu1 %v6279_v21  ;;  %v6339_v21 = vld [vmem:[%s8505_s5 + $0x40] sm:$0xff]  }
 0x2a5   :  { %5501 = vmatpush3.bf16.msra.mxu1 %v6280_v17  ;;  %v6340_v17 = vld [vmem:[%s8505_s5] sm:$0xff]  }
 0x2a6   :  { %5502 = vmatprep.subr.bf16.mxu1 %v6281_v47  ;;  %v6341_v47 = vld [vmem:[%s8505_s5 + $0x48] sm:$0xff]  }
 0x2a9   :  { %5503 = vmatpush3.bf16.msra.mxu1 %v6282_v62  ;;  %v6342_v62 = vld [vmem:[%s8505_s5 + $0x8] sm:$0xff]  }
 0x2aa   :  { %5504 = vmatprep.subr.bf16.mxu1 %v6283_v61  ;;  %v6343_v61 = vld [vmem:[%s8505_s5 + $0x50] sm:$0xff]  }
 0x2ad   :  { %5505 = vmatpush3.bf16.msra.mxu1 %v6284_v22  ;;  %v6344_v22 = vld [vmem:[%s8505_s5 + $0x10] sm:$0xff]  }
 0x2ae   :  { %5506 = vmatprep.subr.bf16.mxu1 %v6285_v30  ;;  %v6346_v30 = vld [vmem:[%s8505_s5 + $0x18] sm:$0xff]  }
 0x2b1   :  { %5507 = vmatpush3.bf16.msra.mxu1 %v6286_v48  ;;  %v6347_v48 = vld [vmem:[%s8505_s5 + $0x60] sm:$0xff]  }
 0x2b2   :  { %5508 = vmatprep.subr.bf16.mxu1 %v6287_v9  ;;  %v6348_v9 = vld [vmem:[%s8505_s5 + $0x20] sm:$0xff]  }
 0x2b5   :  { %5509 = vmatpush3.bf16.msra.mxu1 %v6288_v38  ;;  %v6349_v38 = vld [vmem:[%s8505_s5 + $0x68] sm:$0xff]  }
 0x2b6   :  { %5510 = vmatprep.subr.bf16.mxu1 %v6289_v31  ;;  %v6350_v31 = vld [vmem:[%s8505_s5 + $0x28] sm:$0xff]  }
 0x2b9   :  { %5511 = vmatpush3.bf16.msra.mxu1 %v6290_v58  ;;  %v6351_v58 = vld [vmem:[%s8505_s5 + $0x70] sm:$0xff]  }
 0x2ba   :  { %5518 = vmatprep.subr.bf16.mxu1 %v6291_v1  ;;  %v6352_v1 = vld [vmem:[%s8505_s5 + $0x30] sm:$0xff]  }
 0x2bc   :  { %4157 = vmatmul.mubr.bf16.vlgmr.msra.gmra.mrb[4].mxu1 %v7510_v59  ;;  %v6297_v59 = vld [vmem:[%s8503_s3 + $0x448] ss:$20 sps:$4 sm:$0xff]  }
 0x2bd   :  { %5519 = vmatpush3.bf16.msra.mxu1 %v6292_v18  ;;  %4196 = vmatprep.mubr.bf16.mxu1 %v7522_v20  ;;  %v6298_v20 = vld [vmem:[%s8503_s3 + $0x308] ss:$20 sps:$4 sm:$0xff]  }
 0x2be   :  { %5520 = vmatprep.subr.bf16.mxu1 %v6293_v40  ;;  %v6353_v18 = vld [vmem:[%s8505_s5 + $0x78] sm:$0xff]  }
 0x2bf   :  { %v6354_v40 = vld [vmem:[%s8505_s5 + $0x38] sm:$0xff]  }
 0x2c1   :  { %5521 = vmatpush3.bf16.msra.mxu1 %v6294_v16  ;;  %v6355_v16 = vld [vmem:[%s8505_s5 + $0xc0] sm:$0xff]  }
 0x2c2   :  { %5522 = vmatprep.subr.bf16.mxu1 %v6295_v19  ;;  %v6371_v19 = vld [vmem:[%s8505_s5 + $0x100] sm:$0xff]  }
 0x2c5   :  { %5523 = vmatpush3.bf16.msra.mxu1 %v6296_v14  ;;  %v6403_v14 = vmov 0.0  }
 0x2c6   :  { %5524 = vmatprep.subr.bf16.mxu1 %v6297_v59  ;;  %5637 = vmatprep.subr.bf16.mxu0 %v6403_v14  ;;  %v6372_v59 = vld [vmem:[%s8505_s5 + $0x108] sm:$0xff]  }
 0x2c7   :  { %5638 = vmatpush3.bf16.msra.mxu0 %v6371_v19  ;;  %5653 = vmatprep.mubr.msk.bf16.mxu0 %vm6404_vm8, %v6403_v14 }
 0x2c8   :  { %5639 = vmatprep.subr.bf16.mxu0 %v6403_v14 }
 0x2c9   :  { %5525 = vmatpush3.bf16.msra.mxu1 %v6298_v20  ;;  %v6373_v20 = vld [vmem:[%s8505_s5 + $0x110] sm:$0xff]  }
 0x2ca   :  { %5526 = vmatprep.subr.bf16.mxu1 %v6299_v27  ;;  %v6374_v27 = vld [vmem:[%s8505_s5 + $0x118] sm:$0xff]  }
 0x2cb   :  { %5640 = vmatpush3.bf16.msra.mxu0 %v6372_v59 }
 0x2cc   :  { %5641 = vmatprep.subr.bf16.mxu0 %v6403_v14 }
 0x2cd   :  { %5527 = vmatpush3.bf16.msra.mxu1 %v6300_v29  ;;  %v6375_v29 = vld [vmem:[%s8505_s5 + $0x120] sm:$0xff]  }
 0x2ce   :  { %5528 = vmatprep.subr.bf16.mxu1 %v6301_v24  ;;  %v6376_v24 = vld [vmem:[%s8505_s5 + $0x128] sm:$0xff]  }
 0x2cf   :  { %5642 = vmatpush3.bf16.msra.mxu0 %v6373_v20 }
 0x2d0   :  { %5643 = vmatprep.subr.bf16.mxu0 %v6403_v14 }
 0x2d1   :  { %5529 = vmatpush3.bf16.msra.mxu1 %v6302_v5  ;;  %v8376_v5 = vld [vmem:[%s8506_s4] sm:$0x1f] }
 0x2d2   :  { %5530 = vmatprep.subr.bf16.mxu1 %v6303_v34  ;;  %v2121_v34 = vsub.s32 3, %v7453_v50 }
 0x2d3   :  { %5644 = vmatpush3.bf16.msra.mxu0 %v6374_v27 }
 0x2d4   :  { %5645 = vmatprep.subr.bf16.mxu0 %v6403_v14 }
 0x2d5   :  { %5531 = vmatpush3.bf16.msra.mxu1 %v6304_v63  ;;  %v2110_v63 = vrot.slane %v8376_v5, %v7459_v43 }
 0x2d6   :  { %5532 = vmatprep.subr.bf16.mxu1 %v6305_v54  ;;  %v2114_v54 = vrot.slane %v8376_v5, %v7462_v15 }
 0x2d7   :  { %5646 = vmatpush3.bf16.msra.mxu0 %v6375_v29 }
 0x2d8   :  { %5647 = vmatprep.subr.bf16.mxu0 %v6403_v14 }
 0x2d9   :  { %5533 = vmatpush3.bf16.msra.mxu1 %v6306_v8  ;;  %v2122_v8 = vrot.slane %v8376_v5, %v2121_v34 }
 0x2da   :  { %5540 = vmatprep.subr.bf16.mxu1 %v6307_v11 }
 0x2db   :  { %5648 = vmatpush3.bf16.msra.mxu0 %v6376_v24 }
 0x2dc   :  { %4197 = vmatmul.mubr.bf16.vlgmr.msra.gmra.mrb[8].mxu1 %v7718_v35  ;;  %v6313_v35 = vld [vmem:[%s8503_s3 + $0x6c8] ss:$20 sps:$4 sm:$0xff]   ;;  %5649 = vmatprep.subr.bf16.mxu0 %v6403_v14 }
 0x2dd   :  { %5541 = vmatpush3.bf16.msra.mxu1 %v6308_v55  ;;  %4236 = vmatprep.mubr.bf16.mxu1 %v7720_v41  ;;  %v6314_v41 = vld [vmem:[%s8503_s3 + $0x588] ss:$20 sps:$4 sm:$0xff]  }
 0x2de   :  { %5542 = vmatprep.subr.bf16.mxu1 %v6309_v49 }
 0x2e1   :  { %5543 = vmatpush3.bf16.msra.mxu1 %v6310_v7 }
 0x2e2   :  { %5544 = vmatprep.subr.bf16.mxu1 %v6311_v36 }
 0x2e5   :  { %5545 = vmatpush3.bf16.msra.mxu1 %v6312_v28 }
 0x2e6   :  { %5546 = vmatprep.subr.bf16.mxu1 %v6313_v35 }
 0x2e9   :  { %5547 = vmatpush3.bf16.msra.mxu1 %v6314_v41 }
 0x2ea   :  { %5548 = vmatprep.subr.bf16.mxu1 %v6315_v32 }
 0x2ed   :  { %5549 = vmatpush3.bf16.msra.mxu1 %v6316_v39 }
 0x2ee   :  { %5550 = vmatprep.subr.bf16.mxu1 %v6317_v53 }
 0x2f1   :  { %5551 = vmatpush3.bf16.msra.mxu1 %v6318_v4 }
 0x2f2   :  { %5552 = vmatprep.subr.bf16.mxu1 %v6319_v0 }
 0x2f5   :  { %5553 = vmatpush3.bf16.msra.mxu1 %v6320_v60 }
 0x2f6   :  { %5554 = vmatprep.subr.bf16.mxu1 %v6321_v10 }
 0x2f9   :  { %5555 = vmatpush3.bf16.msra.mxu1 %v6322_v3  ;;  %v6356_v3 = vld [vmem:[%s8505_s5 + $0x80] sm:$0xff]  }
 0x2fa   :  { %5562 = vmatprep.subr.bf16.mxu1 %v6323_v42 }
 0x2fc   :  { %4237 = vmatmul.mubr.bf16.vlgmr.msra.gmra.mrb[12].mxu1 %v7909_v6  ;;  %v6329_v6 = vld [vmem:[%s8503_s3 + $0x948] ss:$20 sps:$4 sm:$0xff]  }
 0x2fd   :  { %5563 = vmatpush3.bf16.msra.mxu1 %v6324_v23  ;;  %4276 = vmatprep.mubr.bf16.mxu1 %v7918_v25  ;;  %v6330_v25 = vld [vmem:[%s8503_s3 + $0x808] ss:$20 sps:$4 sm:$0xff]  }
 0x2fe   :  { %5564 = vmatprep.subr.bf16.mxu1 %v6325_v12  ;;  %v6357_v23 = vld [vmem:[%s8505_s5 + $0xc8] sm:$0xff]  }
 0x301   :  { %5565 = vmatpush3.bf16.msra.mxu1 %v6326_v13  ;;  %v6377_v13 = vld [vmem:[%s8505_s5 + $0x130] sm:$0xff]  }
 0x302   :  { %5566 = vmatprep.subr.bf16.mxu1 %v6327_v26  ;;  %v6358_v26 = vld [vmem:[%s8505_s5 + $0x88] sm:$0xff]   ;;  %5650 = vmatpush3.bf16.msra.mxu0 %v6377_v13 }
 0x303   :  { %5651 = vmatprep.subr.bf16.mxu0 %v6403_v14 }
 0x305   :  { %5567 = vmatpush3.bf16.msra.mxu1 %v6328_v37  ;;  %v6359_v37 = vld [vmem:[%s8505_s5 + $0xd0] sm:$0xff]  }
 0x306   :  { %5568 = vmatprep.subr.bf16.mxu1 %v6329_v6  ;;  %v6378_v6 = vld [vmem:[%s8505_s5 + $0x138] sm:$0xff]  }
 0x307   :  { %5652 = vmatpush3.bf16.msra.mxu0 %v6378_v6 }
 0x309   :  { %5569 = vmatpush3.bf16.msra.mxu1 %v6330_v25  ;;  %v6360_v25 = vld [vmem:[%s8505_s5 + $0x90] sm:$0xff]  }
 0x30a   :  { %5570 = vmatprep.subr.bf16.mxu1 %v6331_v33  ;;  %v6361_v33 = vld [vmem:[%s8505_s5 + $0xd8] sm:$0xff]  }
 0x30d   :  { %5571 = vmatpush3.bf16.msra.mxu1 %v6332_v46  ;;  %v6362_v46 = vld [vmem:[%s8505_s5 + $0x98] sm:$0xff]  }
 0x30e   :  { %5572 = vmatprep.subr.bf16.mxu1 %v6333_v44  ;;  %v6363_v44 = vld [vmem:[%s8505_s5 + $0xe0] sm:$0xff]  }
 0x311   :  { %5573 = vmatpush3.bf16.msra.mxu1 %v6334_v45  ;;  %v6364_v45 = vld [vmem:[%s8505_s5 + $0xa0] sm:$0xff]  }
 0x312   :  { %5574 = vmatprep.subr.bf16.mxu1 %v6335_v56  ;;  %v2117_v56 = vsub.s32 2, %v7453_v50 }
 0x315   :  { %5575 = vmatpush3.bf16.msra.mxu1 %v6336_v57  ;;  %v6365_v57 = vld [vmem:[%s8505_s5 + $0xe8] sm:$0xff]  }
 0x316   :  { %5576 = vmatprep.subr.bf16.mxu1 %v6337_v52  ;;  %v6366_v52 = vld [vmem:[%s8505_s5 + $0xa8] sm:$0xff]  }
 0x319   :  { %5577 = vmatpush3.bf16.msra.mxu1 %v6338_v2  ;;  %v2118_v2 = vrot.slane %v8376_v5, %v2117_v56 }
 0x31a   :  { %5584 = vmatprep.subr.bf16.mxu1 %v6339_v21  ;;  %v6367_v21 = vld [vmem:[%s8505_s5 + $0xf0] sm:$0xff]  }
 0x31c   :  { %4277 = vmatmul.mubr.bf16.vlgmr.msra.gmra.mrb[16].mxu1 %v8106_v51  ;;  %v6345_v51 = vld [vmem:[%s8505_s5 + $0x58] sm:$0xff]  }
 0x31d   :  { %5585 = vmatpush3.bf16.msra.mxu1 %v6340_v17  ;;  %v6368_v17 = vld [vmem:[%s8505_s5 + $0xb0] sm:$0xff]  }
 0x31e   :  { %5586 = vmatprep.subr.bf16.mxu1 %v6341_v47 }
 0x321   :  { %5587 = vmatpush3.bf16.msra.mxu1 %v6342_v62  ;;  %v6369_v62 = vld [vmem:[%s8505_s5 + $0xf8] sm:$0xff]  }
 0x322   :  { %5588 = vmatprep.subr.bf16.mxu1 %v6343_v61 }
 0x325   :  { %5589 = vmatpush3.bf16.msra.mxu1 %v6344_v22 }
 0x326   :  { %5590 = vmatprep.subr.bf16.mxu1 %v6345_v51 }
 0x329   :  { %5591 = vmatpush3.bf16.msra.mxu1 %v6346_v30 }
 0x32a   :  { %5592 = vmatprep.subr.bf16.mxu1 %v6347_v48  ;;  %v6370_v48 = vld [vmem:[%s8505_s5 + $0xb8] sm:$0xff]  }
 0x32d   :  { %5593 = vmatpush3.bf16.msra.mxu1 %v6348_v9 }
 0x32e   :  { %5594 = vmatprep.subr.bf16.mxu1 %v6349_v38 }
 0x331   :  { %5595 = vmatpush3.bf16.msra.mxu1 %v6350_v31 }
 0x332   :  { %5596 = vmatprep.subr.bf16.mxu1 %v6351_v58  ;;  %v2125_v58 = vsub.s32 4, %v7453_v50  ;;  %v6379_v50 = vld [vmem:[%s8507_s7] ss:$8 sps:$4 sm:$0xff]  }
 0x335   :  { %5597 = vmatpush3.bf16.msra.mxu1 %v6352_v1  ;;  %v2126_v1 = vrot.slane %v8376_v5, %v2125_v58  ;;  %v6381_v5 = vld [vmem:[%s8507_s7 + $0x4] ss:$8 sps:$4 sm:$0xff]  }
 0x336   :  { %5598 = vmatprep.subr.bf16.mxu1 %v6353_v18 }
 0x339   :  { %5599 = vmatpush3.bf16.msra.mxu1 %v6354_v40 }
 0x33a   :  { %5606 = vmatprep.subr.bf16.mxu1 %v6355_v16 }
 0x36f   :  { %v3953_v11 = vpop.f32.mrb[0].mxu1 }
 0x370   :  { %v5657_v55 = vadd.f32 %v3953_v11, %v2110_v63  ;;  %v4117_v49 = vpop.f32.mrb[32].mxu0  ;;  %v3955_v7 = vpop.f32.mrb[1].mxu1 }
 0x371   :  { %v5658_v36 = vadd.f32 %v3955_v7, %v2114_v54  ;;  %v4119_v28 = vpop.f32.mrb[33].mxu0  ;;  %v3957_v35 = vpop.f32.mrb[2].mxu1  ;;  %v5659_v47 = vadd.f32 %v4117_v49, %v2118_v2  ;;  %v6384_v7 = vld [vmem:[%s8507_s7 + $0x14] ss:$8 sps:$4 sm:$0xff]  }
 0x372   :  { %v4284_v41 = vmax.f32 %v5657_v55, 0.0  ;;  %v5660_v32 = vadd.f32 %v4119_v28, %v2122_v8  ;;  %v4121_v39 = vpop.f32.mrb[34].mxu0  ;;  %v3958_v53 = vpop.f32.mrb[3].mxu1  ;;  %v6382_v35 = vld [vmem:[%s8507_s7 + $0x10] ss:$8 sps:$4 sm:$0xff]  }
 0x373   :  { %v4285_v4 = vmax.f32 %v5658_v36, 0.0  ;;  %v4122_v0 = vpop.f32.mrb[35].mxu0  ;;  %v4286_v9 = vmax.f32 %v5659_v47, 0.0  ;;  %v6385_v53 = vld [vmem:[%s8507_s7 + $0x20] ss:$8 sps:$4 sm:$0xff]  }
 0x374   :  { %v4287_v60 = vmax.f32 %v5660_v32, 0.0  ;;  %v4289_v42 = vpack.c.bf16 %v4284_v41, %v4284_v41  ;;  %v6387_v41 = vld [vmem:[%s8507_s7 + $0x24] ss:$8 sps:$4 sm:$0xff]   ;;  %v6388_v0 = vld [vmem:[%s8507_s7 + $0x30] ss:$8 sps:$4 sm:$0xff]  }
 0x375   :  { %v4290_v10 = vpack.c.bf16 %v4285_v4, %v4285_v4  ;;  %v4291_v31 = vpack.c.bf16 %v4286_v9, %v4286_v9  ;;  %v6390_v4 = vld [vmem:[%s8507_s7 + $0x34] ss:$8 sps:$4 sm:$0xff]  }
 0x376   :  { %v4292_v12 = vpack.c.bf16 %v4287_v60, %v4287_v60  ;;  %v6393_v60 = vld [vmem:[%s8507_s7 + $0x44] ss:$8 sps:$4 sm:$0xff]  }
 0x377   :  { %4653 = vmatprep.mubr.bf16.mxu1 %v4290_v10  ;;  %v6391_v10 = vld [vmem:[%s8507_s7 + $0x40] ss:$8 sps:$4 sm:$0xff]  }
 0x378   :  { %4654 = vmatmul.mubr.bf16.vlgmr.msra.gmra.mrb[20].mxu1 %v4289_v42  ;;  %v6394_v42 = vld [vmem:[%s8507_s7 + $0x50] ss:$8 sps:$4 sm:$0xff]  }
 0x379   :  { %5607 = vmatpush3.bf16.msra.mxu1 %v6356_v3  ;;  %4693 = vmatprep.mubr.bf16.mxu1 %v4292_v12  ;;  %v6396_v3 = vld [vmem:[%s8507_s7 + $0x54] ss:$8 sps:$4 sm:$0xff]   ;;  %v6397_v12 = vld [vmem:[%s8507_s7 + $0x60] ss:$8 sps:$4 sm:$0xff]  }
 0x37a   :  { %5608 = vmatprep.subr.bf16.mxu1 %v6357_v23  ;;  %v6399_v23 = vld [vmem:[%s8507_s7 + $0x64] ss:$8 sps:$4 sm:$0xff]  }
 0x37d   :  { %5609 = vmatpush3.bf16.msra.mxu1 %v6358_v26 }
 0x37e   :  { %5610 = vmatprep.subr.bf16.mxu1 %v6359_v37 }
 0x381   :  { %5611 = vmatpush3.bf16.msra.mxu1 %v6360_v25 }
 0x382   :  { %5612 = vmatprep.subr.bf16.mxu1 %v6361_v33  ;;  %v6400_v33 = vld [vmem:[%s8507_s7 + $0x70] ss:$8 sps:$4 sm:$0xff]  }
 0x385   :  { %5613 = vmatpush3.bf16.msra.mxu1 %v6362_v46  ;;  %v6402_v46 = vld [vmem:[%s8507_s7 + $0x74] ss:$8 sps:$4 sm:$0xff]  }
 0x386   :  { %5614 = vmatprep.subr.bf16.mxu1 %v6363_v44  ;;  %v6405_v44 = vmov 0  }
 0x389   :  { %5615 = vmatpush3.bf16.msra.mxu1 %v6364_v45  ;;  %v5439_v45 = vld [vmem:[%s8508_s6] ss:$0 sm:$0xff] }
 0x38a   :  { %5616 = vmatprep.subr.bf16.mxu1 %v6365_v57 }
 0x38d   :  { %5617 = vmatpush3.bf16.msra.mxu1 %v6366_v52 }
 0x38e   :  { %5618 = vmatprep.subr.bf16.mxu1 %v6367_v21 }
 0x38f   :  { %v5512_v61 = vpop.f32.mrb[4].mxu1 }
 0x390   :  { %v5513_v22 = vpop.f32.mrb[5].mxu1 }
 0x391   :  { %v5514_v51 = vadd.f32 %v5513_v22, %v5512_v61  ;;  %5619 = vmatpush3.bf16.msra.mxu1 %v6368_v17  ;;  %v5515_v30 = vpop.f32.mrb[6].mxu1 }
 0x392   :  { %v5516_v38 = vpop.f32.mrb[7].mxu1  ;;  %5620 = vmatprep.subr.bf16.mxu1 %v6369_v62 }
 0x393   :  { %v4159_v16 = vadd.f32 %v5514_v51, %v2126_v1  ;;  %v4759_v38 = vld [vmem:[%s8509_s8] sm:$0x3] }
 0x394   :  { %v4768_v58 = vrot.slane %v4759_v38, %v7462_v15 }
 0x395   :  { %5621 = vmatpush3.bf16.msra.mxu1 %v6370_v48 }
 0x396   :  { %4851 = vmatprep.subr.bf16.mxu1 %v6381_v5 }
 0x398   :  { %4694 = vmatmul.mubr.bf16.vlgmr.msra.gmra.mrb[24].mxu1 %v4291_v31  ;;  %v4764_v31 = vrot.slane %v4759_v38, %v7459_v43 }
 0x399   :  { %4852 = vmatpush1.bf16.msra.mxu1 %v6379_v50  ;;  %4883 = vmatprep.mubr.bf16.mxu1 %v6405_v44 }
 0x39a   :  { %4853 = vmatprep.subr.bf16.mxu1 %v6384_v7 }
 0x39d   :  { %4854 = vmatpush1.bf16.msra.mxu1 %v6382_v35 }
 0x39e   :  { %4855 = vmatprep.subr.bf16.mxu1 %v6387_v41 }
 0x3a1   :  { %4856 = vmatpush1.bf16.msra.mxu1 %v6385_v53 }
 0x3a2   :  { %4857 = vmatprep.subr.bf16.mxu1 %v6390_v4 }
 0x3a5   :  { %4858 = vmatpush1.bf16.msra.mxu1 %v6388_v0 }
 0x3a6   :  { %4859 = vmatprep.subr.bf16.mxu1 %v6393_v60 }
 0x3a9   :  { %4860 = vmatpush1.bf16.msra.mxu1 %v6391_v10 }
 0x3aa   :  { %4861 = vmatprep.subr.bf16.mxu1 %v6396_v3 }
 0x3ad   :  { %4862 = vmatpush1.bf16.msra.mxu1 %v6394_v42 }
 0x3ae   :  { %4863 = vmatprep.subr.bf16.mxu1 %v6399_v23 }
 0x3af   :  { %v5534_v18 = vpop.f32.mrb[8].mxu1 }
 0x3b0   :  { %v5535_v40 = vpop.f32.mrb[9].mxu1 }
 0x3b1   :  { %v5536_v19 = vadd.f32 %v5535_v40, %v5534_v18  ;;  %v5537_v14 = vpop.f32.mrb[10].mxu1  ;;  %4864 = vmatpush1.bf16.msra.mxu1 %v6397_v12 }
 0x3b2   :  { %v5538_v59 = vpop.f32.mrb[11].mxu1  ;;  %4865 = vmatprep.subr.bf16.mxu1 %v6402_v46 }
 0x3b3   :  { %v4199_v20 = vadd.f32 %v5536_v19, %v4159_v16 }
 0x3b5   :  { %4866 = vmatpush1.bf16.msra.mxu1 %v6400_v33 }
 0x3cf   :  { %v5556_v27 = vpop.f32.mrb[12].mxu1 }
 0x3d0   :  { %v5557_v29 = vpop.f32.mrb[13].mxu1 }
 0x3d1   :  { %v5558_v24 = vadd.f32 %v5557_v29, %v5556_v27  ;;  %v5559_v34 = vpop.f32.mrb[14].mxu1 }
 0x3d2   :  { %v5560_v63 = vpop.f32.mrb[15].mxu1 }
 0x3d3   :  { %v4239_v54 = vadd.f32 %v5558_v24, %v4199_v20 }
 0x3ef   :  { %v5578_v8 = vpop.f32.mrb[16].mxu1 }
 0x3f0   :  { %v5579_v11 = vpop.f32.mrb[17].mxu1 }
 0x3f1   :  { %v5580_v55 = vadd.f32 %v5579_v11, %v5578_v8  ;;  %v5581_v49 = vpop.f32.mrb[18].mxu1 }
 0x3f2   :  { %v5582_v36 = vpop.f32.mrb[19].mxu1 }
 0x3f3   :  { %v4279_v28 = vadd.f32 %v5580_v55, %v4239_v54 }
 0x3f5   :  { %v4288_v32 = vmax.f32 %v4279_v28, 0.0 }
 0x3f7   :  { %v4293_v39 = vpack.c.bf16 %v4288_v32, %v4288_v32 }
 0x3f9   :  { %5654 = vmatmul.mubr.bf16.vlgmr.msra.gmra.mrb[36].mxu0 %v4293_v39 }
 0x44b   :  { %v5600_v13 = vpop.f32.mrb[20].mxu1 }
 0x44c   :  { %v5601_v26 = vpop.f32.mrb[21].mxu1 }
 0x44d   :  { %v5602_v37 = vadd.f32 %v5601_v26, %v5600_v13  ;;  %v5603_v6 = vpop.f32.mrb[22].mxu1 }
 0x44e   :  { %v5604_v25 = vpop.f32.mrb[23].mxu1 }
 0x44f   :  { %v4656_v52 = vadd.f32 %v5602_v37, %v5439_v45 }
 0x46b   :  { %v5622_v56 = vpop.f32.mrb[24].mxu1 }
 0x46c   :  { %v5623_v57 = vpop.f32.mrb[25].mxu1 }
 0x46d   :  { %v5624_v2 = vadd.f32 %v5623_v57, %v5622_v56  ;;  %v5625_v21 = vpop.f32.mrb[26].mxu1 }
 0x46e   :  { %v5626_v17 = vpop.f32.mrb[27].mxu1 }
 0x46f   :  { %v4696_v47 = vadd.f32 %v5624_v2, %v4656_v52 }
 0x4cc   :  { %v4735_v62 = vpop.f32.mrb[36].mxu0 }
 0x4cd   :  { %v4736_v61 = vadd.f32 %v4735_v62, %v4696_v47  ;;  %v5655_v22 = vpop.f32.mrb[37].mxu0 }
 0x4ce   :  { %v4738_v51 = vpop.f32.mrb[38].mxu0 }
 0x4cf   :  { %v4741_v30 = vmax.f32 %v4736_v61, 0.0  ;;  %v5656_v48 = vpop.f32.mrb[39].mxu0 }
 0x4d1   :  { %v4742_v9 = vpack.c.bf16 %v4741_v30, %v4741_v30 }
 0x4d3   :  { %4884 = vmatmul.mubr.bf16.vlgmr.msra.gmra.mrb[28].mxu1 %v4742_v9 }
 0x5a6   :  { %v4885_v1 = vpop.f32.mrb[28].mxu1 }
 0x5a7   :  { %v4886_v18 = vadd.f32 %v4885_v1, %v4764_v31  ;;  %v4887_v40 = vpop.f32.mrb[29].mxu1 }
 0x5a8   :  { %v4888_v16 = vadd.f32 %v4887_v40, %v4768_v58  ;;  %v4889_v19 = vpop.f32.mrb[30].mxu1 }
 0x5a9   :  { %4892 = vst [vmem:[%s8510_s9] sm:$0xff] %v4886_v18  ;;  %v4890_v14 = vpop.f32.mrb[31].mxu1 }
 0x5aa   :  { %4893 = vst [vmem:[%s8510_s9 + $0x8] sm:$0xff] %v4888_v16 }

</bundles_post_ra>
